<compile_context>
chip_gen: v7x
topology: tpu7x:2x2x1
jax: 0.10.0
libtpu: 0.0.40
codegen_flags: <defaults>
</compile_context>

<pallas_src>
import functools

import jax
import jax.numpy as jnp
import numpy as np
from jax.experimental import pallas as pl
from jax.experimental.pallas import tpu as pltpu


# ----------------------------------------------------------------------------------
# Fused Pallas kernel (one batch tile per grid step)
# ----------------------------------------------------------------------------------
def fused_kernel(num_layers, x_ref, attr_ref, *refs):
    """Full MultiBranchModel forward for one batch tile.

    x_ref:    [T, Bt, Din]   time-major (transposed in the wrapper)
    attr_ref: [Bt, A]
    refs:     wih0 [Din,4H], whh0 [H,4H], b0 [1,4H],
              then per layer l>=1: wcat_l [2H,4H] (= [whh_l; wih_l]), b_l [1,4H],
              then head: w1 [A,F], b1 [1,F], w2 [F,F], b2 [1,F],
                         wf_ts [H,1], wf_attr [F,1], bf [1,1],
              then out_ref [Bt, 1].
    """
    n_lstm = 3 + 2 * (num_layers - 1)
    lstm_refs = refs[:n_lstm]
    (w1_ref, b1_ref, w2_ref, b2_ref,
     wf_ts_ref, wf_attr_ref, bf_ref, out_ref) = refs[n_lstm:]

    T, Bt, _ = x_ref.shape
    H = lstm_refs[1].shape[0]

    wih0 = lstm_refs[0][...]
    whh0 = lstm_refs[1][...]
    b0 = lstm_refs[2][...]

    # Hoisted layer-0 input projection + bias: one big matmul instead of T tiny ones.
    x = x_ref[...]                                                       # [T, Bt, Din]
    gx0 = (jnp.dot(x.reshape(T * Bt, -1), wih0,
                   preferred_element_type=jnp.float32) + b0).reshape(T, Bt, 4 * H)

    # Hoist upper-layer weight reads and bias broadcasts out of the unrolled time loop.
    wcats, biases = [], []
    for l in range(1, num_layers):
        wcats.append(lstm_refs[3 + 2 * (l - 1)][...])                    # [2H, 4H]
        biases.append(jnp.broadcast_to(lstm_refs[3 + 2 * (l - 1) + 1][...], (Bt, 4 * H)))

    def cell(gates, c_prev):
        sig = jax.nn.sigmoid(gates)                 # EUP on the whole [Bt,4H] vreg
        i = sig[:, 0 * H:1 * H]
        f = sig[:, 1 * H:2 * H]
        o = sig[:, 3 * H:4 * H]
        g = jnp.tanh(gates[:, 2 * H:3 * H])         # tanh only on the g slice (1/4 vreg)
        c = f * c_prev + i * g
        h = o * jnp.tanh(c)
        return h, c

    h = [jnp.zeros((Bt, H), jnp.float32) for _ in range(num_layers)]
    c = [jnp.zeros((Bt, H), jnp.float32) for _ in range(num_layers)]

    # Wavefronted recurrence: layer l's step t runs as soon as h_{l-1,t} is available,
    # so layer0_{t+1} and layer1_t are independent and can overlap in the schedule.
    for t in range(T):                                                   # T static: unrolled
        gates0 = gx0[t] + jnp.dot(h[0], whh0, preferred_element_type=jnp.float32)
        h[0], c[0] = cell(gates0, c[0])
        for l in range(1, num_layers):
            kin = jnp.concatenate([h[l], h[l - 1]], axis=-1)             # [Bt, 2H]
            gates = jnp.dot(kin, wcats[l - 1],
                            preferred_element_type=jnp.float32) + biases[l - 1]
            h[l], c[l] = cell(gates, c[l])

    ts_feat = h[-1]                                                      # lstm_out[:, -1, :]

    # ---- Attribute MLP branch (Linear -> ReLU -> Linear -> ReLU) -------------------
    a1 = jnp.maximum(jnp.dot(attr_ref[...], w1_ref[...],
                             preferred_element_type=jnp.float32) + b1_ref[...], 0.0)
    a2 = jnp.maximum(jnp.dot(a1, w2_ref[...],
                             preferred_element_type=jnp.float32) + b2_ref[...], 0.0)

    # ---- Final linear on cat([ts_feat, attr_feat]) == split-weight matmuls ---------
    out_ref[...] = (jnp.dot(ts_feat, wf_ts_ref[...], preferred_element_type=jnp.float32)
                    + jnp.dot(a2, wf_attr_ref[...], preferred_element_type=jnp.float32)
                    + bf_ref[...])


# ----------------------------------------------------------------------------------
# Wrapper
# ----------------------------------------------------------------------------------
@functools.partial(jax.jit, static_argnames=("tile_b",))
def multi_branch_forward(params, x_ts, x_attr, tile_b=32):
    """x_ts: [B, T, input_dim] (batch_first); x_attr: [B, attr_dim] -> out: [B]."""
    num_layers = len(params["lstm"])
    B, T, Din = x_ts.shape
    A = x_attr.shape[1]
    H = params["lstm"][0]["whh"].shape[0]

    assert B % tile_b == 0 and tile_b % 8 == 0, "batch tile must divide B and be sublane-aligned"
    assert (4 * H) % 128 == 0, "gate vector (4*hidden) must be lane-aligned"

    # Time-major for the kernel; done wrapper-side so it fuses into the HBM feed.
    x_tm = jnp.transpose(x_ts, (1, 0, 2))                                # [T, B, Din]

    args = [x_tm, x_attr]
    in_specs = [
        pl.BlockSpec((T, tile_b, Din), lambda i: (0, i, 0)),
        pl.BlockSpec((tile_b, A), lambda i: (i, 0)),
    ]

    def add_full(w):                                    # full-array weight, shared by all tiles
        args.append(w)
        in_specs.append(pl.BlockSpec(w.shape, lambda i: (0,) * w.ndim))

    l0 = params["lstm"][0]
    add_full(l0["wih"]); add_full(l0["whh"]); add_full(l0["b"])
    for layer in params["lstm"][1:]:
        # K-fused weight for layers >= 1: gates = [h_l, h_{l-1}] @ [whh_l ; wih_l] + b_l
        add_full(jnp.concatenate([layer["whh"], layer["wih"]], axis=0))
        add_full(layer["b"])
    p = params["head"]
    for w in (p["w1"], p["b1"], p["w2"], p["b2"], p["wf_ts"], p["wf_attr"], p["bf"]):
        add_full(w)

    out = pl.pallas_call(
        functools.partial(fused_kernel, num_layers),
        grid=(B // tile_b,),
        out_shape=jax.ShapeDtypeStruct((B, 1), jnp.float32),
        in_specs=in_specs,
        out_specs=pl.BlockSpec((tile_b, 1), lambda i: (i, 0)),
        compiler_params=pltpu.CompilerParams(
            dimension_semantics=("parallel",),          # v7x: split batch tiles across 2 TCs
            vmem_limit_bytes=32 * 1024 * 1024,
        ),
    )(*args)
    return out[:, 0]                                    # squeeze(-1)


# ----------------------------------------------------------------------------------
# Pure-JAX reference (correctness check; mirrors PyTorch semantics)
# ----------------------------------------------------------------------------------
def reference_forward(params, x_ts, x_attr):
    x = x_ts
    B = x.shape[0]
    for layer in params["lstm"]:
        H = layer["whh"].shape[0]

        def step(carry, x_t, layer=layer, H=H):
            h, c = carry
            gates = x_t @ layer["wih"] + h @ layer["whh"] + layer["b"][0]
            i = jax.nn.sigmoid(gates[:, 0 * H:1 * H])
            f = jax.nn.sigmoid(gates[:, 1 * H:2 * H])
            g = jnp.tanh(gates[:, 2 * H:3 * H])
            o = jax.nn.sigmoid(gates[:, 3 * H:4 * H])
            c = f * c + i * g
            h = o * jnp.tanh(c)
            return (h, c), h

        init = (jnp.zeros((B, H), jnp.float32), jnp.zeros((B, H), jnp.float32))
        _, hs = jax.lax.scan(step, init, jnp.transpose(x, (1, 0, 2)))
        x = jnp.transpose(hs, (1, 0, 2))
    ts_feat = x[:, -1, :]
    p = params["head"]
    a = jnp.maximum(x_attr @ p["w1"] + p["b1"][0], 0.0)
    a = jnp.maximum(a @ p["w2"] + p["b2"][0], 0.0)
    out = ts_feat @ p["wf_ts"] + a @ p["wf_attr"] + p["bf"][0]
    return out[:, 0]


# ----------------------------------------------------------------------------------
# Deterministic parameter init (synthetic; shapes follow nn.LSTM / nn.Linear)
# ----------------------------------------------------------------------------------
def init_params(key, input_dim, hidden_size, num_layers, attr_dim, fc_dim, output_dim=1):
    def unif(k, shape, scale=0.1):
        return jax.random.uniform(k, shape, jnp.float32, -scale, scale)

    keys = iter(jax.random.split(key, 4 * num_layers + 8))
    lstm = []
    for l in range(num_layers):
        din = input_dim if l == 0 else hidden_size
        lstm.append(dict(
            wih=unif(next(keys), (din, 4 * hidden_size)),             # weight_ih_l{l}.T
            whh=unif(next(keys), (hidden_size, 4 * hidden_size)),     # weight_hh_l{l}.T
            b=unif(next(keys), (1, 4 * hidden_size)),                 # bias_ih + bias_hh
        ))
    head_p = dict(
        w1=unif(next(keys), (attr_dim, fc_dim)),
        b1=unif(next(keys), (1, fc_dim)),
        w2=unif(next(keys), (fc_dim, fc_dim)),
        b2=unif(next(keys), (1, fc_dim)),
        wf_ts=unif(next(keys), (hidden_size, output_dim)),            # final_fc weight, ts half
        wf_attr=unif(next(keys), (fc_dim, output_dim)),               # final_fc weight, attr half
        bf=unif(next(keys), (1, output_dim)),
    )
    return dict(lstm=lstm, head=head_p)


if __name__ == "__main__":
    # Batched demo: grid over batch tiles (B=128, TILE_B=32 -> grid=(4,)).
    B, T = 128, 8               # batch, sequence length
    INPUT_DIM = 8               # time-series feature dim
    HIDDEN = 32                 # LSTM hidden size (4H = 128 lanes)
    NUM_LAYERS = 2
    ATTR_DIM = 8
    FC_DIM = 16
    TILE_B = 32

    key = jax.random.PRNGKey(0)
    kp, kx, ka = jax.random.split(key, 3)
    params = init_params(kp, INPUT_DIM, HIDDEN, NUM_LAYERS, ATTR_DIM, FC_DIM, output_dim=1)
    x_ts = jax.random.normal(kx, (B, T, INPUT_DIM), jnp.float32)
    x_attr = jax.random.normal(ka, (B, ATTR_DIM), jnp.float32)

    out = multi_branch_forward(params, x_ts, x_attr, tile_b=TILE_B)
    out = jax.block_until_ready(out)

    ref = reference_forward(params, x_ts, x_attr)
    np.testing.assert_allclose(np.asarray(out), np.asarray(ref), rtol=1e-4, atol=1e-4)
    assert out.shape == (B,)

    print("KERNEL_OK")
</pallas_src>

<mosaic_0001>
module attributes {stable_mosaic.version = 11 : i64} {
  func.func @fused_kernel(%arg0: i32, %arg1: memref<8x32x8xf32, #tpu.memory_space<vmem>>, %arg2: memref<32x8xf32, #tpu.memory_space<vmem>>, %arg3: memref<8x128xf32, #tpu.memory_space<vmem>>, %arg4: memref<32x128xf32, #tpu.memory_space<vmem>>, %arg5: memref<1x128xf32, #tpu.memory_space<vmem>>, %arg6: memref<64x128xf32, #tpu.memory_space<vmem>>, %arg7: memref<1x128xf32, #tpu.memory_space<vmem>>, %arg8: memref<8x16xf32, #tpu.memory_space<vmem>>, %arg9: memref<1x16xf32, #tpu.memory_space<vmem>>, %arg10: memref<16x16xf32, #tpu.memory_space<vmem>>, %arg11: memref<1x16xf32, #tpu.memory_space<vmem>>, %arg12: memref<32x1xf32, #tpu.memory_space<vmem>>, %arg13: memref<16x1xf32, #tpu.memory_space<vmem>>, %arg14: memref<1x1xf32, #tpu.memory_space<vmem>>, %arg15: memref<32x1xf32, #tpu.memory_space<vmem>>) attributes {dimension_semantics = [#tpu.dimension_semantics<parallel>], iteration_bounds = array<i64: 4>, scalar_prefetch = 0 : i64, scratch_operands = 0 : i64, tpu.core_type = #tpu.core_type<tc>, window_params = [{transform_indices = @transform_0, window_bounds = array<i64: 8, 32, 8>}, {transform_indices = @transform_1, window_bounds = array<i64: 32, 8>}, {pipeline_mode = #tpu.pipeline_mode<synchronous>, transform_indices = @transform_2, window_bounds = array<i64: 8, 128>}, {pipeline_mode = #tpu.pipeline_mode<synchronous>, transform_indices = @transform_3, window_bounds = array<i64: 32, 128>}, {pipeline_mode = #tpu.pipeline_mode<synchronous>, transform_indices = @transform_4, window_bounds = array<i64: 1, 128>}, {pipeline_mode = #tpu.pipeline_mode<synchronous>, transform_indices = @transform_5, window_bounds = array<i64: 64, 128>}, {pipeline_mode = #tpu.pipeline_mode<synchronous>, transform_indices = @transform_6, window_bounds = array<i64: 1, 128>}, {pipeline_mode = #tpu.pipeline_mode<synchronous>, transform_indices = @transform_7, window_bounds = array<i64: 8, 16>}, {pipeline_mode = #tpu.pipeline_mode<synchronous>, transform_indices = @transform_8, window_bounds = array<i64: 1, 16>}, {pipeline_mode = #tpu.pipeline_mode<synchronous>, transform_indices = @transform_9, window_bounds = array<i64: 16, 16>}, {pipeline_mode = #tpu.pipeline_mode<synchronous>, transform_indices = @transform_10, window_bounds = array<i64: 1, 16>}, {pipeline_mode = #tpu.pipeline_mode<synchronous>, transform_indices = @transform_11, window_bounds = array<i64: 32, 1>}, {pipeline_mode = #tpu.pipeline_mode<synchronous>, transform_indices = @transform_12, window_bounds = array<i64: 16, 1>}, {pipeline_mode = #tpu.pipeline_mode<synchronous>, transform_indices = @transform_13, window_bounds = array<i64: 1, 1>}, {transform_indices = @transform_14, window_bounds = array<i64: 32, 1>}]} {
    %c0 = arith.constant 0 : index
    %c0_0 = arith.constant 0 : index
    %0 = vector.load %arg3[%c0, %c0_0] : memref<8x128xf32, #tpu.memory_space<vmem>>, vector<8x128xf32>
    %c0_1 = arith.constant 0 : index
    %c0_2 = arith.constant 0 : index
    %1 = vector.load %arg4[%c0_1, %c0_2] : memref<32x128xf32, #tpu.memory_space<vmem>>, vector<32x128xf32>
    %c0_3 = arith.constant 0 : index
    %c0_4 = arith.constant 0 : index
    %2 = vector.load %arg5[%c0_3, %c0_4] : memref<1x128xf32, #tpu.memory_space<vmem>>, vector<1x128xf32>
    %c0_5 = arith.constant 0 : index
    %c0_6 = arith.constant 0 : index
    %c0_7 = arith.constant 0 : index
    %3 = vector.load %arg1[%c0_5, %c0_6, %c0_7] : memref<8x32x8xf32, #tpu.memory_space<vmem>>, vector<8x32x8xf32>
    %4 = vector.shape_cast %3 : vector<8x32x8xf32> to vector<256x8xf32>
    %cst = arith.constant dense<0.000000e+00> : vector<256x128xf32>
    %5 = tpu.matmul %4, %0, %cst {dimension_numbers = #tpu.dot_dimension_numbers<[1], [0], [0], [1], [0, 0, 1, 1], [], []>} : vector<256x8xf32>, vector<8x128xf32>, vector<256x128xf32> -> vector<256x128xf32>
    %6 = vector.broadcast %2 : vector<1x128xf32> to vector<256x128xf32>
    %7 = arith.addf %5, %6 : vector<256x128xf32>
    %8 = vector.shape_cast %7 : vector<256x128xf32> to vector<8x32x128xf32>
    %c0_8 = arith.constant 0 : index
    %c0_9 = arith.constant 0 : index
    %9 = vector.load %arg6[%c0_8, %c0_9] : memref<64x128xf32, #tpu.memory_space<vmem>>, vector<64x128xf32>
    %c0_10 = arith.constant 0 : index
    %c0_11 = arith.constant 0 : index
    %10 = vector.load %arg7[%c0_10, %c0_11] : memref<1x128xf32, #tpu.memory_space<vmem>>, vector<1x128xf32>
    %11 = vector.shape_cast %10 : vector<1x128xf32> to vector<1x128xf32>
    %12 = vector.broadcast %11 : vector<1x128xf32> to vector<32x128xf32>
    %cst_12 = arith.constant 0.000000e+00 : f32
    %13 = vector.broadcast %cst_12 : f32 to vector<32x32xf32>
    %cst_13 = arith.constant 0.000000e+00 : f32
    %14 = vector.broadcast %cst_13 : f32 to vector<32x32xf32>
    %cst_14 = arith.constant 0.000000e+00 : f32
    %15 = vector.broadcast %cst_14 : f32 to vector<32x32xf32>
    %cst_15 = arith.constant 0.000000e+00 : f32
    %16 = vector.broadcast %cst_15 : f32 to vector<32x32xf32>
    %17 = vector.extract_strided_slice %8 {offsets = [0, 0, 0], sizes = [1, 32, 128], strides = [1, 1, 1]} : vector<8x32x128xf32> to vector<1x32x128xf32>
    %18 = vector.shape_cast %17 : vector<1x32x128xf32> to vector<32x128xf32>
    %cst_16 = arith.constant dense<0.000000e+00> : vector<32x128xf32>
    %19 = tpu.matmul %13, %1, %cst_16 {dimension_numbers = #tpu.dot_dimension_numbers<[1], [0], [0], [1], [0, 0, 1, 1], [], []>} : vector<32x32xf32>, vector<32x128xf32>, vector<32x128xf32> -> vector<32x128xf32>
    %20 = arith.addf %18, %19 : vector<32x128xf32>
    %21 = arith.negf %20 : vector<32x128xf32>
    %22 = math.exp %21 : vector<32x128xf32>
    %cst_17 = arith.constant 1.000000e+00 : f32
    %23 = vector.broadcast %cst_17 : f32 to vector<32x128xf32>
    %24 = arith.addf %23, %22 : vector<32x128xf32>
    %25 = arith.divf %23, %24 : vector<32x128xf32>
    %26 = vector.extract_strided_slice %25 {offsets = [0, 0], sizes = [32, 32], strides = [1, 1]} : vector<32x128xf32> to vector<32x32xf32>
    %27 = vector.extract_strided_slice %25 {offsets = [0, 32], sizes = [32, 32], strides = [1, 1]} : vector<32x128xf32> to vector<32x32xf32>
    %28 = vector.extract_strided_slice %25 {offsets = [0, 96], sizes = [32, 32], strides = [1, 1]} : vector<32x128xf32> to vector<32x32xf32>
    %29 = vector.extract_strided_slice %20 {offsets = [0, 64], sizes = [32, 32], strides = [1, 1]} : vector<32x128xf32> to vector<32x32xf32>
    %30 = math.tanh %29 : vector<32x32xf32>
    %31 = arith.mulf %27, %15 : vector<32x32xf32>
    %32 = arith.mulf %26, %30 : vector<32x32xf32>
    %33 = arith.addf %31, %32 : vector<32x32xf32>
    %34 = math.tanh %33 : vector<32x32xf32>
    %35 = arith.mulf %28, %34 : vector<32x32xf32>
    %36 = tpu.concatenate %14, %35 in 1 : vector<32x32xf32>, vector<32x32xf32> -> vector<32x64xf32>
    %cst_18 = arith.constant dense<0.000000e+00> : vector<32x128xf32>
    %37 = tpu.matmul %36, %9, %cst_18 {dimension_numbers = #tpu.dot_dimension_numbers<[1], [0], [0], [1], [0, 0, 1, 1], [], []>} : vector<32x64xf32>, vector<64x128xf32>, vector<32x128xf32> -> vector<32x128xf32>
    %38 = arith.addf %37, %12 : vector<32x128xf32>
    %39 = arith.negf %38 : vector<32x128xf32>
    %40 = math.exp %39 : vector<32x128xf32>
    %cst_19 = arith.constant 1.000000e+00 : f32
    %41 = vector.broadcast %cst_19 : f32 to vector<32x128xf32>
    %42 = arith.addf %41, %40 : vector<32x128xf32>
    %43 = arith.divf %41, %42 : vector<32x128xf32>
    %44 = vector.extract_strided_slice %43 {offsets = [0, 0], sizes = [32, 32], strides = [1, 1]} : vector<32x128xf32> to vector<32x32xf32>
    %45 = vector.extract_strided_slice %43 {offsets = [0, 32], sizes = [32, 32], strides = [1, 1]} : vector<32x128xf32> to vector<32x32xf32>
    %46 = vector.extract_strided_slice %43 {offsets = [0, 96], sizes = [32, 32], strides = [1, 1]} : vector<32x128xf32> to vector<32x32xf32>
    %47 = vector.extract_strided_slice %38 {offsets = [0, 64], sizes = [32, 32], strides = [1, 1]} : vector<32x128xf32> to vector<32x32xf32>
    %48 = math.tanh %47 : vector<32x32xf32>
    %49 = arith.mulf %45, %16 : vector<32x32xf32>
    %50 = arith.mulf %44, %48 : vector<32x32xf32>
    %51 = arith.addf %49, %50 : vector<32x32xf32>
    %52 = math.tanh %51 : vector<32x32xf32>
    %53 = arith.mulf %46, %52 : vector<32x32xf32>
    %54 = vector.extract_strided_slice %8 {offsets = [1, 0, 0], sizes = [1, 32, 128], strides = [1, 1, 1]} : vector<8x32x128xf32> to vector<1x32x128xf32>
    %55 = vector.shape_cast %54 : vector<1x32x128xf32> to vector<32x128xf32>
    %cst_20 = arith.constant dense<0.000000e+00> : vector<32x128xf32>
    %56 = tpu.matmul %35, %1, %cst_20 {dimension_numbers = #tpu.dot_dimension_numbers<[1], [0], [0], [1], [0, 0, 1, 1], [], []>} : vector<32x32xf32>, vector<32x128xf32>, vector<32x128xf32> -> vector<32x128xf32>
    %57 = arith.addf %55, %56 : vector<32x128xf32>
    %58 = arith.negf %57 : vector<32x128xf32>
    %59 = math.exp %58 : vector<32x128xf32>
    %cst_21 = arith.constant 1.000000e+00 : f32
    %60 = vector.broadcast %cst_21 : f32 to vector<32x128xf32>
    %61 = arith.addf %60, %59 : vector<32x128xf32>
    %62 = arith.divf %60, %61 : vector<32x128xf32>
    %63 = vector.extract_strided_slice %62 {offsets = [0, 0], sizes = [32, 32], strides = [1, 1]} : vector<32x128xf32> to vector<32x32xf32>
    %64 = vector.extract_strided_slice %62 {offsets = [0, 32], sizes = [32, 32], strides = [1, 1]} : vector<32x128xf32> to vector<32x32xf32>
    %65 = vector.extract_strided_slice %62 {offsets = [0, 96], sizes = [32, 32], strides = [1, 1]} : vector<32x128xf32> to vector<32x32xf32>
    %66 = vector.extract_strided_slice %57 {offsets = [0, 64], sizes = [32, 32], strides = [1, 1]} : vector<32x128xf32> to vector<32x32xf32>
    %67 = math.tanh %66 : vector<32x32xf32>
    %68 = arith.mulf %64, %33 : vector<32x32xf32>
    %69 = arith.mulf %63, %67 : vector<32x32xf32>
    %70 = arith.addf %68, %69 : vector<32x32xf32>
    %71 = math.tanh %70 : vector<32x32xf32>
    %72 = arith.mulf %65, %71 : vector<32x32xf32>
    %73 = tpu.concatenate %53, %72 in 1 : vector<32x32xf32>, vector<32x32xf32> -> vector<32x64xf32>
    %cst_22 = arith.constant dense<0.000000e+00> : vector<32x128xf32>
    %74 = tpu.matmul %73, %9, %cst_22 {dimension_numbers = #tpu.dot_dimension_numbers<[1], [0], [0], [1], [0, 0, 1, 1], [], []>} : vector<32x64xf32>, vector<64x128xf32>, vector<32x128xf32> -> vector<32x128xf32>
    %75 = arith.addf %74, %12 : vector<32x128xf32>
    %76 = arith.negf %75 : vector<32x128xf32>
    %77 = math.exp %76 : vector<32x128xf32>
    %cst_23 = arith.constant 1.000000e+00 : f32
    %78 = vector.broadcast %cst_23 : f32 to vector<32x128xf32>
    %79 = arith.addf %78, %77 : vector<32x128xf32>
    %80 = arith.divf %78, %79 : vector<32x128xf32>
    %81 = vector.extract_strided_slice %80 {offsets = [0, 0], sizes = [32, 32], strides = [1, 1]} : vector<32x128xf32> to vector<32x32xf32>
    %82 = vector.extract_strided_slice %80 {offsets = [0, 32], sizes = [32, 32], strides = [1, 1]} : vector<32x128xf32> to vector<32x32xf32>
    %83 = vector.extract_strided_slice %80 {offsets = [0, 96], sizes = [32, 32], strides = [1, 1]} : vector<32x128xf32> to vector<32x32xf32>
    %84 = vector.extract_strided_slice %75 {offsets = [0, 64], sizes = [32, 32], strides = [1, 1]} : vector<32x128xf32> to vector<32x32xf32>
    %85 = math.tanh %84 : vector<32x32xf32>
    %86 = arith.mulf %82, %51 : vector<32x32xf32>
    %87 = arith.mulf %81, %85 : vector<32x32xf32>
    %88 = arith.addf %86, %87 : vector<32x32xf32>
    %89 = math.tanh %88 : vector<32x32xf32>
    %90 = arith.mulf %83, %89 : vector<32x32xf32>
    %91 = vector.extract_strided_slice %8 {offsets = [2, 0, 0], sizes = [1, 32, 128], strides = [1, 1, 1]} : vector<8x32x128xf32> to vector<1x32x128xf32>
    %92 = vector.shape_cast %91 : vector<1x32x128xf32> to vector<32x128xf32>
    %cst_24 = arith.constant dense<0.000000e+00> : vector<32x128xf32>
    %93 = tpu.matmul %72, %1, %cst_24 {dimension_numbers = #tpu.dot_dimension_numbers<[1], [0], [0], [1], [0, 0, 1, 1], [], []>} : vector<32x32xf32>, vector<32x128xf32>, vector<32x128xf32> -> vector<32x128xf32>
    %94 = arith.addf %92, %93 : vector<32x128xf32>
    %95 = arith.negf %94 : vector<32x128xf32>
    %96 = math.exp %95 : vector<32x128xf32>
    %cst_25 = arith.constant 1.000000e+00 : f32
    %97 = vector.broadcast %cst_25 : f32 to vector<32x128xf32>
    %98 = arith.addf %97, %96 : vector<32x128xf32>
    %99 = arith.divf %97, %98 : vector<32x128xf32>
    %100 = vector.extract_strided_slice %99 {offsets = [0, 0], sizes = [32, 32], strides = [1, 1]} : vector<32x128xf32> to vector<32x32xf32>
    %101 = vector.extract_strided_slice %99 {offsets = [0, 32], sizes = [32, 32], strides = [1, 1]} : vector<32x128xf32> to vector<32x32xf32>
    %102 = vector.extract_strided_slice %99 {offsets = [0, 96], sizes = [32, 32], strides = [1, 1]} : vector<32x128xf32> to vector<32x32xf32>
    %103 = vector.extract_strided_slice %94 {offsets = [0, 64], sizes = [32, 32], strides = [1, 1]} : vector<32x128xf32> to vector<32x32xf32>
    %104 = math.tanh %103 : vector<32x32xf32>
    %105 = arith.mulf %101, %70 : vector<32x32xf32>
    %106 = arith.mulf %100, %104 : vector<32x32xf32>
    %107 = arith.addf %105, %106 : vector<32x32xf32>
    %108 = math.tanh %107 : vector<32x32xf32>
    %109 = arith.mulf %102, %108 : vector<32x32xf32>
    %110 = tpu.concatenate %90, %109 in 1 : vector<32x32xf32>, vector<32x32xf32> -> vector<32x64xf32>
    %cst_26 = arith.constant dense<0.000000e+00> : vector<32x128xf32>
    %111 = tpu.matmul %110, %9, %cst_26 {dimension_numbers = #tpu.dot_dimension_numbers<[1], [0], [0], [1], [0, 0, 1, 1], [], []>} : vector<32x64xf32>, vector<64x128xf32>, vector<32x128xf32> -> vector<32x128xf32>
    %112 = arith.addf %111, %12 : vector<32x128xf32>
    %113 = arith.negf %112 : vector<32x128xf32>
    %114 = math.exp %113 : vector<32x128xf32>
    %cst_27 = arith.constant 1.000000e+00 : f32
    %115 = vector.broadcast %cst_27 : f32 to vector<32x128xf32>
    %116 = arith.addf %115, %114 : vector<32x128xf32>
    %117 = arith.divf %115, %116 : vector<32x128xf32>
    %118 = vector.extract_strided_slice %117 {offsets = [0, 0], sizes = [32, 32], strides = [1, 1]} : vector<32x128xf32> to vector<32x32xf32>
    %119 = vector.extract_strided_slice %117 {offsets = [0, 32], sizes = [32, 32], strides = [1, 1]} : vector<32x128xf32> to vector<32x32xf32>
    %120 = vector.extract_strided_slice %117 {offsets = [0, 96], sizes = [32, 32], strides = [1, 1]} : vector<32x128xf32> to vector<32x32xf32>
    %121 = vector.extract_strided_slice %112 {offsets = [0, 64], sizes = [32, 32], strides = [1, 1]} : vector<32x128xf32> to vector<32x32xf32>
    %122 = math.tanh %121 : vector<32x32xf32>
    %123 = arith.mulf %119, %88 : vector<32x32xf32>
    %124 = arith.mulf %118, %122 : vector<32x32xf32>
    %125 = arith.addf %123, %124 : vector<32x32xf32>
    %126 = math.tanh %125 : vector<32x32xf32>
    %127 = arith.mulf %120, %126 : vector<32x32xf32>
    %128 = vector.extract_strided_slice %8 {offsets = [3, 0, 0], sizes = [1, 32, 128], strides = [1, 1, 1]} : vector<8x32x128xf32> to vector<1x32x128xf32>
    %129 = vector.shape_cast %128 : vector<1x32x128xf32> to vector<32x128xf32>
    %cst_28 = arith.constant dense<0.000000e+00> : vector<32x128xf32>
    %130 = tpu.matmul %109, %1, %cst_28 {dimension_numbers = #tpu.dot_dimension_numbers<[1], [0], [0], [1], [0, 0, 1, 1], [], []>} : vector<32x32xf32>, vector<32x128xf32>, vector<32x128xf32> -> vector<32x128xf32>
    %131 = arith.addf %129, %130 : vector<32x128xf32>
    %132 = arith.negf %131 : vector<32x128xf32>
    %133 = math.exp %132 : vector<32x128xf32>
    %cst_29 = arith.constant 1.000000e+00 : f32
    %134 = vector.broadcast %cst_29 : f32 to vector<32x128xf32>
    %135 = arith.addf %134, %133 : vector<32x128xf32>
    %136 = arith.divf %134, %135 : vector<32x128xf32>
    %137 = vector.extract_strided_slice %136 {offsets = [0, 0], sizes = [32, 32], strides = [1, 1]} : vector<32x128xf32> to vector<32x32xf32>
    %138 = vector.extract_strided_slice %136 {offsets = [0, 32], sizes = [32, 32], strides = [1, 1]} : vector<32x128xf32> to vector<32x32xf32>
    %139 = vector.extract_strided_slice %136 {offsets = [0, 96], sizes = [32, 32], strides = [1, 1]} : vector<32x128xf32> to vector<32x32xf32>
    %140 = vector.extract_strided_slice %131 {offsets = [0, 64], sizes = [32, 32], strides = [1, 1]} : vector<32x128xf32> to vector<32x32xf32>
    %141 = math.tanh %140 : vector<32x32xf32>
    %142 = arith.mulf %138, %107 : vector<32x32xf32>
    %143 = arith.mulf %137, %141 : vector<32x32xf32>
    %144 = arith.addf %142, %143 : vector<32x32xf32>
    %145 = math.tanh %144 : vector<32x32xf32>
    %146 = arith.mulf %139, %145 : vector<32x32xf32>
    %147 = tpu.concatenate %127, %146 in 1 : vector<32x32xf32>, vector<32x32xf32> -> vector<32x64xf32>
    %cst_30 = arith.constant dense<0.000000e+00> : vector<32x128xf32>
    %148 = tpu.matmul %147, %9, %cst_30 {dimension_numbers = #tpu.dot_dimension_numbers<[1], [0], [0], [1], [0, 0, 1, 1], [], []>} : vector<32x64xf32>, vector<64x128xf32>, vector<32x128xf32> -> vector<32x128xf32>
    %149 = arith.addf %148, %12 : vector<32x128xf32>
    %150 = arith.negf %149 : vector<32x128xf32>
    %151 = math.exp %150 : vector<32x128xf32>
    %cst_31 = arith.constant 1.000000e+00 : f32
    %152 = vector.broadcast %cst_31 : f32 to vector<32x128xf32>
    %153 = arith.addf %152, %151 : vector<32x128xf32>
    %154 = arith.divf %152, %153 : vector<32x128xf32>
    %155 = vector.extract_strided_slice %154 {offsets = [0, 0], sizes = [32, 32], strides = [1, 1]} : vector<32x128xf32> to vector<32x32xf32>
    %156 = vector.extract_strided_slice %154 {offsets = [0, 32], sizes = [32, 32], strides = [1, 1]} : vector<32x128xf32> to vector<32x32xf32>
    %157 = vector.extract_strided_slice %154 {offsets = [0, 96], sizes = [32, 32], strides = [1, 1]} : vector<32x128xf32> to vector<32x32xf32>
    %158 = vector.extract_strided_slice %149 {offsets = [0, 64], sizes = [32, 32], strides = [1, 1]} : vector<32x128xf32> to vector<32x32xf32>
    %159 = math.tanh %158 : vector<32x32xf32>
    %160 = arith.mulf %156, %125 : vector<32x32xf32>
    %161 = arith.mulf %155, %159 : vector<32x32xf32>
    %162 = arith.addf %160, %161 : vector<32x32xf32>
    %163 = math.tanh %162 : vector<32x32xf32>
    %164 = arith.mulf %157, %163 : vector<32x32xf32>
    %165 = vector.extract_strided_slice %8 {offsets = [4, 0, 0], sizes = [1, 32, 128], strides = [1, 1, 1]} : vector<8x32x128xf32> to vector<1x32x128xf32>
    %166 = vector.shape_cast %165 : vector<1x32x128xf32> to vector<32x128xf32>
    %cst_32 = arith.constant dense<0.000000e+00> : vector<32x128xf32>
    %167 = tpu.matmul %146, %1, %cst_32 {dimension_numbers = #tpu.dot_dimension_numbers<[1], [0], [0], [1], [0, 0, 1, 1], [], []>} : vector<32x32xf32>, vector<32x128xf32>, vector<32x128xf32> -> vector<32x128xf32>
    %168 = arith.addf %166, %167 : vector<32x128xf32>
    %169 = arith.negf %168 : vector<32x128xf32>
    %170 = math.exp %169 : vector<32x128xf32>
    %cst_33 = arith.constant 1.000000e+00 : f32
    %171 = vector.broadcast %cst_33 : f32 to vector<32x128xf32>
    %172 = arith.addf %171, %170 : vector<32x128xf32>
    %173 = arith.divf %171, %172 : vector<32x128xf32>
    %174 = vector.extract_strided_slice %173 {offsets = [0, 0], sizes = [32, 32], strides = [1, 1]} : vector<32x128xf32> to vector<32x32xf32>
    %175 = vector.extract_strided_slice %173 {offsets = [0, 32], sizes = [32, 32], strides = [1, 1]} : vector<32x128xf32> to vector<32x32xf32>
    %176 = vector.extract_strided_slice %173 {offsets = [0, 96], sizes = [32, 32], strides = [1, 1]} : vector<32x128xf32> to vector<32x32xf32>
    %177 = vector.extract_strided_slice %168 {offsets = [0, 64], sizes = [32, 32], strides = [1, 1]} : vector<32x128xf32> to vector<32x32xf32>
    %178 = math.tanh %177 : vector<32x32xf32>
    %179 = arith.mulf %175, %144 : vector<32x32xf32>
    %180 = arith.mulf %174, %178 : vector<32x32xf32>
    %181 = arith.addf %179, %180 : vector<32x32xf32>
    %182 = math.tanh %181 : vector<32x32xf32>
    %183 = arith.mulf %176, %182 : vector<32x32xf32>
    %184 = tpu.concatenate %164, %183 in 1 : vector<32x32xf32>, vector<32x32xf32> -> vector<32x64xf32>
    %cst_34 = arith.constant dense<0.000000e+00> : vector<32x128xf32>
    %185 = tpu.matmul %184, %9, %cst_34 {dimension_numbers = #tpu.dot_dimension_numbers<[1], [0], [0], [1], [0, 0, 1, 1], [], []>} : vector<32x64xf32>, vector<64x128xf32>, vector<32x128xf32> -> vector<32x128xf32>
    %186 = arith.addf %185, %12 : vector<32x128xf32>
    %187 = arith.negf %186 : vector<32x128xf32>
    %188 = math.exp %187 : vector<32x128xf32>
    %cst_35 = arith.constant 1.000000e+00 : f32
    %189 = vector.broadcast %cst_35 : f32 to vector<32x128xf32>
    %190 = arith.addf %189, %188 : vector<32x128xf32>
    %191 = arith.divf %189, %190 : vector<32x128xf32>
    %192 = vector.extract_strided_slice %191 {offsets = [0, 0], sizes = [32, 32], strides = [1, 1]} : vector<32x128xf32> to vector<32x32xf32>
    %193 = vector.extract_strided_slice %191 {offsets = [0, 32], sizes = [32, 32], strides = [1, 1]} : vector<32x128xf32> to vector<32x32xf32>
    %194 = vector.extract_strided_slice %191 {offsets = [0, 96], sizes = [32, 32], strides = [1, 1]} : vector<32x128xf32> to vector<32x32xf32>
    %195 = vector.extract_strided_slice %186 {offsets = [0, 64], sizes = [32, 32], strides = [1, 1]} : vector<32x128xf32> to vector<32x32xf32>
    %196 = math.tanh %195 : vector<32x32xf32>
    %197 = arith.mulf %193, %162 : vector<32x32xf32>
    %198 = arith.mulf %192, %196 : vector<32x32xf32>
    %199 = arith.addf %197, %198 : vector<32x32xf32>
    %200 = math.tanh %199 : vector<32x32xf32>
    %201 = arith.mulf %194, %200 : vector<32x32xf32>
    %202 = vector.extract_strided_slice %8 {offsets = [5, 0, 0], sizes = [1, 32, 128], strides = [1, 1, 1]} : vector<8x32x128xf32> to vector<1x32x128xf32>
    %203 = vector.shape_cast %202 : vector<1x32x128xf32> to vector<32x128xf32>
    %cst_36 = arith.constant dense<0.000000e+00> : vector<32x128xf32>
    %204 = tpu.matmul %183, %1, %cst_36 {dimension_numbers = #tpu.dot_dimension_numbers<[1], [0], [0], [1], [0, 0, 1, 1], [], []>} : vector<32x32xf32>, vector<32x128xf32>, vector<32x128xf32> -> vector<32x128xf32>
    %205 = arith.addf %203, %204 : vector<32x128xf32>
    %206 = arith.negf %205 : vector<32x128xf32>
    %207 = math.exp %206 : vector<32x128xf32>
    %cst_37 = arith.constant 1.000000e+00 : f32
    %208 = vector.broadcast %cst_37 : f32 to vector<32x128xf32>
    %209 = arith.addf %208, %207 : vector<32x128xf32>
    %210 = arith.divf %208, %209 : vector<32x128xf32>
    %211 = vector.extract_strided_slice %210 {offsets = [0, 0], sizes = [32, 32], strides = [1, 1]} : vector<32x128xf32> to vector<32x32xf32>
    %212 = vector.extract_strided_slice %210 {offsets = [0, 32], sizes = [32, 32], strides = [1, 1]} : vector<32x128xf32> to vector<32x32xf32>
    %213 = vector.extract_strided_slice %210 {offsets = [0, 96], sizes = [32, 32], strides = [1, 1]} : vector<32x128xf32> to vector<32x32xf32>
    %214 = vector.extract_strided_slice %205 {offsets = [0, 64], sizes = [32, 32], strides = [1, 1]} : vector<32x128xf32> to vector<32x32xf32>
    %215 = math.tanh %214 : vector<32x32xf32>
    %216 = arith.mulf %212, %181 : vector<32x32xf32>
    %217 = arith.mulf %211, %215 : vector<32x32xf32>
    %218 = arith.addf %216, %217 : vector<32x32xf32>
    %219 = math.tanh %218 : vector<32x32xf32>
    %220 = arith.mulf %213, %219 : vector<32x32xf32>
    %221 = tpu.concatenate %201, %220 in 1 : vector<32x32xf32>, vector<32x32xf32> -> vector<32x64xf32>
    %cst_38 = arith.constant dense<0.000000e+00> : vector<32x128xf32>
    %222 = tpu.matmul %221, %9, %cst_38 {dimension_numbers = #tpu.dot_dimension_numbers<[1], [0], [0], [1], [0, 0, 1, 1], [], []>} : vector<32x64xf32>, vector<64x128xf32>, vector<32x128xf32> -> vector<32x128xf32>
    %223 = arith.addf %222, %12 : vector<32x128xf32>
    %224 = arith.negf %223 : vector<32x128xf32>
    %225 = math.exp %224 : vector<32x128xf32>
    %cst_39 = arith.constant 1.000000e+00 : f32
    %226 = vector.broadcast %cst_39 : f32 to vector<32x128xf32>
    %227 = arith.addf %226, %225 : vector<32x128xf32>
    %228 = arith.divf %226, %227 : vector<32x128xf32>
    %229 = vector.extract_strided_slice %228 {offsets = [0, 0], sizes = [32, 32], strides = [1, 1]} : vector<32x128xf32> to vector<32x32xf32>
    %230 = vector.extract_strided_slice %228 {offsets = [0, 32], sizes = [32, 32], strides = [1, 1]} : vector<32x128xf32> to vector<32x32xf32>
    %231 = vector.extract_strided_slice %228 {offsets = [0, 96], sizes = [32, 32], strides = [1, 1]} : vector<32x128xf32> to vector<32x32xf32>
    %232 = vector.extract_strided_slice %223 {offsets = [0, 64], sizes = [32, 32], strides = [1, 1]} : vector<32x128xf32> to vector<32x32xf32>
    %233 = math.tanh %232 : vector<32x32xf32>
    %234 = arith.mulf %230, %199 : vector<32x32xf32>
    %235 = arith.mulf %229, %233 : vector<32x32xf32>
    %236 = arith.addf %234, %235 : vector<32x32xf32>
    %237 = math.tanh %236 : vector<32x32xf32>
    %238 = arith.mulf %231, %237 : vector<32x32xf32>
    %239 = vector.extract_strided_slice %8 {offsets = [6, 0, 0], sizes = [1, 32, 128], strides = [1, 1, 1]} : vector<8x32x128xf32> to vector<1x32x128xf32>
    %240 = vector.shape_cast %239 : vector<1x32x128xf32> to vector<32x128xf32>
    %cst_40 = arith.constant dense<0.000000e+00> : vector<32x128xf32>
    %241 = tpu.matmul %220, %1, %cst_40 {dimension_numbers = #tpu.dot_dimension_numbers<[1], [0], [0], [1], [0, 0, 1, 1], [], []>} : vector<32x32xf32>, vector<32x128xf32>, vector<32x128xf32> -> vector<32x128xf32>
    %242 = arith.addf %240, %241 : vector<32x128xf32>
    %243 = arith.negf %242 : vector<32x128xf32>
    %244 = math.exp %243 : vector<32x128xf32>
    %cst_41 = arith.constant 1.000000e+00 : f32
    %245 = vector.broadcast %cst_41 : f32 to vector<32x128xf32>
    %246 = arith.addf %245, %244 : vector<32x128xf32>
    %247 = arith.divf %245, %246 : vector<32x128xf32>
    %248 = vector.extract_strided_slice %247 {offsets = [0, 0], sizes = [32, 32], strides = [1, 1]} : vector<32x128xf32> to vector<32x32xf32>
    %249 = vector.extract_strided_slice %247 {offsets = [0, 32], sizes = [32, 32], strides = [1, 1]} : vector<32x128xf32> to vector<32x32xf32>
    %250 = vector.extract_strided_slice %247 {offsets = [0, 96], sizes = [32, 32], strides = [1, 1]} : vector<32x128xf32> to vector<32x32xf32>
    %251 = vector.extract_strided_slice %242 {offsets = [0, 64], sizes = [32, 32], strides = [1, 1]} : vector<32x128xf32> to vector<32x32xf32>
    %252 = math.tanh %251 : vector<32x32xf32>
    %253 = arith.mulf %249, %218 : vector<32x32xf32>
    %254 = arith.mulf %248, %252 : vector<32x32xf32>
    %255 = arith.addf %253, %254 : vector<32x32xf32>
    %256 = math.tanh %255 : vector<32x32xf32>
    %257 = arith.mulf %250, %256 : vector<32x32xf32>
    %258 = tpu.concatenate %238, %257 in 1 : vector<32x32xf32>, vector<32x32xf32> -> vector<32x64xf32>
    %cst_42 = arith.constant dense<0.000000e+00> : vector<32x128xf32>
    %259 = tpu.matmul %258, %9, %cst_42 {dimension_numbers = #tpu.dot_dimension_numbers<[1], [0], [0], [1], [0, 0, 1, 1], [], []>} : vector<32x64xf32>, vector<64x128xf32>, vector<32x128xf32> -> vector<32x128xf32>
    %260 = arith.addf %259, %12 : vector<32x128xf32>
    %261 = arith.negf %260 : vector<32x128xf32>
    %262 = math.exp %261 : vector<32x128xf32>
    %cst_43 = arith.constant 1.000000e+00 : f32
    %263 = vector.broadcast %cst_43 : f32 to vector<32x128xf32>
    %264 = arith.addf %263, %262 : vector<32x128xf32>
    %265 = arith.divf %263, %264 : vector<32x128xf32>
    %266 = vector.extract_strided_slice %265 {offsets = [0, 0], sizes = [32, 32], strides = [1, 1]} : vector<32x128xf32> to vector<32x32xf32>
    %267 = vector.extract_strided_slice %265 {offsets = [0, 32], sizes = [32, 32], strides = [1, 1]} : vector<32x128xf32> to vector<32x32xf32>
    %268 = vector.extract_strided_slice %265 {offsets = [0, 96], sizes = [32, 32], strides = [1, 1]} : vector<32x128xf32> to vector<32x32xf32>
    %269 = vector.extract_strided_slice %260 {offsets = [0, 64], sizes = [32, 32], strides = [1, 1]} : vector<32x128xf32> to vector<32x32xf32>
    %270 = math.tanh %269 : vector<32x32xf32>
    %271 = arith.mulf %267, %236 : vector<32x32xf32>
    %272 = arith.mulf %266, %270 : vector<32x32xf32>
    %273 = arith.addf %271, %272 : vector<32x32xf32>
    %274 = math.tanh %273 : vector<32x32xf32>
    %275 = arith.mulf %268, %274 : vector<32x32xf32>
    %276 = vector.extract_strided_slice %8 {offsets = [7, 0, 0], sizes = [1, 32, 128], strides = [1, 1, 1]} : vector<8x32x128xf32> to vector<1x32x128xf32>
    %277 = vector.shape_cast %276 : vector<1x32x128xf32> to vector<32x128xf32>
    %cst_44 = arith.constant dense<0.000000e+00> : vector<32x128xf32>
    %278 = tpu.matmul %257, %1, %cst_44 {dimension_numbers = #tpu.dot_dimension_numbers<[1], [0], [0], [1], [0, 0, 1, 1], [], []>} : vector<32x32xf32>, vector<32x128xf32>, vector<32x128xf32> -> vector<32x128xf32>
    %279 = arith.addf %277, %278 : vector<32x128xf32>
    %280 = arith.negf %279 : vector<32x128xf32>
    %281 = math.exp %280 : vector<32x128xf32>
    %cst_45 = arith.constant 1.000000e+00 : f32
    %282 = vector.broadcast %cst_45 : f32 to vector<32x128xf32>
    %283 = arith.addf %282, %281 : vector<32x128xf32>
    %284 = arith.divf %282, %283 : vector<32x128xf32>
    %285 = vector.extract_strided_slice %284 {offsets = [0, 0], sizes = [32, 32], strides = [1, 1]} : vector<32x128xf32> to vector<32x32xf32>
    %286 = vector.extract_strided_slice %284 {offsets = [0, 32], sizes = [32, 32], strides = [1, 1]} : vector<32x128xf32> to vector<32x32xf32>
    %287 = vector.extract_strided_slice %284 {offsets = [0, 96], sizes = [32, 32], strides = [1, 1]} : vector<32x128xf32> to vector<32x32xf32>
    %288 = vector.extract_strided_slice %279 {offsets = [0, 64], sizes = [32, 32], strides = [1, 1]} : vector<32x128xf32> to vector<32x32xf32>
    %289 = math.tanh %288 : vector<32x32xf32>
    %290 = arith.mulf %286, %255 : vector<32x32xf32>
    %291 = arith.mulf %285, %289 : vector<32x32xf32>
    %292 = arith.addf %290, %291 : vector<32x32xf32>
    %293 = math.tanh %292 : vector<32x32xf32>
    %294 = arith.mulf %287, %293 : vector<32x32xf32>
    %295 = tpu.concatenate %275, %294 in 1 : vector<32x32xf32>, vector<32x32xf32> -> vector<32x64xf32>
    %cst_46 = arith.constant dense<0.000000e+00> : vector<32x128xf32>
    %296 = tpu.matmul %295, %9, %cst_46 {dimension_numbers = #tpu.dot_dimension_numbers<[1], [0], [0], [1], [0, 0, 1, 1], [], []>} : vector<32x64xf32>, vector<64x128xf32>, vector<32x128xf32> -> vector<32x128xf32>
    %297 = arith.addf %296, %12 : vector<32x128xf32>
    %298 = arith.negf %297 : vector<32x128xf32>
    %299 = math.exp %298 : vector<32x128xf32>
    %cst_47 = arith.constant 1.000000e+00 : f32
    %300 = vector.broadcast %cst_47 : f32 to vector<32x128xf32>
    %301 = arith.addf %300, %299 : vector<32x128xf32>
    %302 = arith.divf %300, %301 : vector<32x128xf32>
    %303 = vector.extract_strided_slice %302 {offsets = [0, 0], sizes = [32, 32], strides = [1, 1]} : vector<32x128xf32> to vector<32x32xf32>
    %304 = vector.extract_strided_slice %302 {offsets = [0, 32], sizes = [32, 32], strides = [1, 1]} : vector<32x128xf32> to vector<32x32xf32>
    %305 = vector.extract_strided_slice %302 {offsets = [0, 96], sizes = [32, 32], strides = [1, 1]} : vector<32x128xf32> to vector<32x32xf32>
    %306 = vector.extract_strided_slice %297 {offsets = [0, 64], sizes = [32, 32], strides = [1, 1]} : vector<32x128xf32> to vector<32x32xf32>
    %307 = math.tanh %306 : vector<32x32xf32>
    %308 = arith.mulf %304, %273 : vector<32x32xf32>
    %309 = arith.mulf %303, %307 : vector<32x32xf32>
    %310 = arith.addf %308, %309 : vector<32x32xf32>
    %311 = math.tanh %310 : vector<32x32xf32>
    %312 = arith.mulf %305, %311 : vector<32x32xf32>
    %c0_48 = arith.constant 0 : index
    %c0_49 = arith.constant 0 : index
    %313 = vector.load %arg2[%c0_48, %c0_49] : memref<32x8xf32, #tpu.memory_space<vmem>>, vector<32x8xf32>
    %c0_50 = arith.constant 0 : index
    %c0_51 = arith.constant 0 : index
    %314 = vector.load %arg8[%c0_50, %c0_51] : memref<8x16xf32, #tpu.memory_space<vmem>>, vector<8x16xf32>
    %cst_52 = arith.constant dense<0.000000e+00> : vector<32x16xf32>
    %315 = tpu.matmul %313, %314, %cst_52 {dimension_numbers = #tpu.dot_dimension_numbers<[1], [0], [0], [1], [0, 0, 1, 1], [], []>} : vector<32x8xf32>, vector<8x16xf32>, vector<32x16xf32> -> vector<32x16xf32>
    %c0_53 = arith.constant 0 : index
    %c0_54 = arith.constant 0 : index
    %316 = vector.load %arg9[%c0_53, %c0_54] : memref<1x16xf32, #tpu.memory_space<vmem>>, vector<1x16xf32>
    %317 = vector.broadcast %316 : vector<1x16xf32> to vector<32x16xf32>
    %318 = arith.addf %315, %317 : vector<32x16xf32>
    %cst_55 = arith.constant 0.000000e+00 : f32
    %319 = vector.broadcast %cst_55 : f32 to vector<32x16xf32>
    %320 = arith.maximumf %318, %319 : vector<32x16xf32>
    %c0_56 = arith.constant 0 : index
    %c0_57 = arith.constant 0 : index
    %321 = vector.load %arg10[%c0_56, %c0_57] : memref<16x16xf32, #tpu.memory_space<vmem>>, vector<16x16xf32>
    %cst_58 = arith.constant dense<0.000000e+00> : vector<32x16xf32>
    %322 = tpu.matmul %320, %321, %cst_58 {dimension_numbers = #tpu.dot_dimension_numbers<[1], [0], [0], [1], [0, 0, 1, 1], [], []>} : vector<32x16xf32>, vector<16x16xf32>, vector<32x16xf32> -> vector<32x16xf32>
    %c0_59 = arith.constant 0 : index
    %c0_60 = arith.constant 0 : index
    %323 = vector.load %arg11[%c0_59, %c0_60] : memref<1x16xf32, #tpu.memory_space<vmem>>, vector<1x16xf32>
    %324 = vector.broadcast %323 : vector<1x16xf32> to vector<32x16xf32>
    %325 = arith.addf %322, %324 : vector<32x16xf32>
    %cst_61 = arith.constant 0.000000e+00 : f32
    %326 = vector.broadcast %cst_61 : f32 to vector<32x16xf32>
    %327 = arith.maximumf %325, %326 : vector<32x16xf32>
    %c0_62 = arith.constant 0 : index
    %c0_63 = arith.constant 0 : index
    %328 = vector.load %arg12[%c0_62, %c0_63] : memref<32x1xf32, #tpu.memory_space<vmem>>, vector<32x1xf32>
    %cst_64 = arith.constant dense<0.000000e+00> : vector<32x1xf32>
    %329 = tpu.matmul %312, %328, %cst_64 {dimension_numbers = #tpu.dot_dimension_numbers<[1], [0], [0], [1], [0, 0, 1, 1], [], []>} : vector<32x32xf32>, vector<32x1xf32>, vector<32x1xf32> -> vector<32x1xf32>
    %c0_65 = arith.constant 0 : index
    %c0_66 = arith.constant 0 : index
    %330 = vector.load %arg13[%c0_65, %c0_66] : memref<16x1xf32, #tpu.memory_space<vmem>>, vector<16x1xf32>
    %cst_67 = arith.constant dense<0.000000e+00> : vector<32x1xf32>
    %331 = tpu.matmul %327, %330, %cst_67 {dimension_numbers = #tpu.dot_dimension_numbers<[1], [0], [0], [1], [0, 0, 1, 1], [], []>} : vector<32x16xf32>, vector<16x1xf32>, vector<32x1xf32> -> vector<32x1xf32>
    %332 = arith.addf %329, %331 : vector<32x1xf32>
    %c0_68 = arith.constant 0 : index
    %c0_69 = arith.constant 0 : index
    %333 = vector.load %arg14[%c0_68, %c0_69] : memref<1x1xf32, #tpu.memory_space<vmem>>, vector<1x1xf32>
    %334 = vector.broadcast %333 : vector<1x1xf32> to vector<32x1xf32>
    %335 = arith.addf %332, %334 : vector<32x1xf32>
    %c0_70 = arith.constant 0 : index
    %c0_71 = arith.constant 0 : index
    %336 = vector.load %arg15[%c0_70, %c0_71] : memref<32x1xf32, #tpu.memory_space<vmem>>, vector<32x1xf32>
    tpu.vector_store %arg15[%c0_70, %c0_71], %335 {strides = array<i32>} : memref<32x1xf32, #tpu.memory_space<vmem>>, vector<32x1xf32>,
    return
  }
  func.func @transform_0(%arg0: i32) -> (i32, i32, i32) {
    %c0_i32 = arith.constant 0 : i32
    %c0_i32_0 = arith.constant 0 : i32
    %c0_i32_1 = arith.constant 0 : i32
    return %c0_i32, %arg0, %c0_i32_0 : i32, i32, i32
  }
  func.func @transform_1(%arg0: i32) -> (i32, i32) {
    %c0_i32 = arith.constant 0 : i32
    %c0_i32_0 = arith.constant 0 : i32
    return %arg0, %c0_i32 : i32, i32
  }
  func.func @transform_2(%arg0: i32) -> (i32, i32) {
    %c0_i32 = arith.constant 0 : i32
    %c0_i32_0 = arith.constant 0 : i32
    %c0_i32_1 = arith.constant 0 : i32
    return %c0_i32, %c0_i32_0 : i32, i32
  }
  func.func @transform_3(%arg0: i32) -> (i32, i32) {
    %c0_i32 = arith.constant 0 : i32
    %c0_i32_0 = arith.constant 0 : i32
    %c0_i32_1 = arith.constant 0 : i32
    return %c0_i32, %c0_i32_0 : i32, i32
  }
  func.func @transform_4(%arg0: i32) -> (i32, i32) {
    %c0_i32 = arith.constant 0 : i32
    %c0_i32_0 = arith.constant 0 : i32
    %c0_i32_1 = arith.constant 0 : i32
    return %c0_i32, %c0_i32_0 : i32, i32
  }
  func.func @transform_5(%arg0: i32) -> (i32, i32) {
    %c0_i32 = arith.constant 0 : i32
    %c0_i32_0 = arith.constant 0 : i32
    %c0_i32_1 = arith.constant 0 : i32
    return %c0_i32, %c0_i32_0 : i32, i32
  }
  func.func @transform_6(%arg0: i32) -> (i32, i32) {
    %c0_i32 = arith.constant 0 : i32
    %c0_i32_0 = arith.constant 0 : i32
    %c0_i32_1 = arith.constant 0 : i32
    return %c0_i32, %c0_i32_0 : i32, i32
  }
  func.func @transform_7(%arg0: i32) -> (i32, i32) {
    %c0_i32 = arith.constant 0 : i32
    %c0_i32_0 = arith.constant 0 : i32
    %c0_i32_1 = arith.constant 0 : i32
    return %c0_i32, %c0_i32_0 : i32, i32
  }
  func.func @transform_8(%arg0: i32) -> (i32, i32) {
    %c0_i32 = arith.constant 0 : i32
    %c0_i32_0 = arith.constant 0 : i32
    %c0_i32_1 = arith.constant 0 : i32
    return %c0_i32, %c0_i32_0 : i32, i32
  }
  func.func @transform_9(%arg0: i32) -> (i32, i32) {
    %c0_i32 = arith.constant 0 : i32
    %c0_i32_0 = arith.constant 0 : i32
    %c0_i32_1 = arith.constant 0 : i32
    return %c0_i32, %c0_i32_0 : i32, i32
  }
  func.func @transform_10(%arg0: i32) -> (i32, i32) {
    %c0_i32 = arith.constant 0 : i32
    %c0_i32_0 = arith.constant 0 : i32
    %c0_i32_1 = arith.constant 0 : i32
    return %c0_i32, %c0_i32_0 : i32, i32
  }
  func.func @transform_11(%arg0: i32) -> (i32, i32) {
    %c0_i32 = arith.constant 0 : i32
    %c0_i32_0 = arith.constant 0 : i32
    %c0_i32_1 = arith.constant 0 : i32
    return %c0_i32, %c0_i32_0 : i32, i32
  }
  func.func @transform_12(%arg0: i32) -> (i32, i32) {
    %c0_i32 = arith.constant 0 : i32
    %c0_i32_0 = arith.constant 0 : i32
    %c0_i32_1 = arith.constant 0 : i32
    return %c0_i32, %c0_i32_0 : i32, i32
  }
  func.func @transform_13(%arg0: i32) -> (i32, i32) {
    %c0_i32 = arith.constant 0 : i32
    %c0_i32_0 = arith.constant 0 : i32
    %c0_i32_1 = arith.constant 0 : i32
    return %c0_i32, %c0_i32_0 : i32, i32
  }
  func.func @transform_14(%arg0: i32) -> (i32, i32) {
    %c0_i32 = arith.constant 0 : i32
    %c0_i32_0 = arith.constant 0 : i32
    return %arg0, %c0_i32 : i32, i32
  }
}

</mosaic_0001>

<bundles_post_ra>
// kernel: multi_branch_forward.1
= control target key start
LH: loop header
LB: loop body
LE: loop exit
PB: predicated region body
PF: predicated region fallthrough
CT: control target
= control target key end

     0   :  { %s8087_s0 = inlined_call_operand.vmem [shape: f32[8,128,8], index: 0, kind: input, shape index: {}]   ;;  %s8088_s1 = inlined_call_operand.vmem [shape: f32[128,8], index: 1, kind: input, shape index: {}]   ;;  %s8089_s2 = inlined_call_operand.vmem [shape: f32[8,128], index: 2, kind: input, shape index: {}]   ;;  %s8090_s3 = inlined_call_operand.vmem [shape: f32[32,128], index: 3, kind: input, shape index: {}]   ;;  %s8091_s4 = inlined_call_operand.vmem [shape: f32[1,128], index: 4, kind: input, shape index: {}]   ;;  %s8092_s5 = inlined_call_operand.vmem [shape: f32[64,128], index: 5, kind: input, shape index: {}]   ;;  %s8093_s6 = inlined_call_operand.vmem [shape: f32[1,128], index: 6, kind: input, shape index: {}]   ;;  %s8094_s7 = inlined_call_operand.vmem [shape: f32[8,16], index: 7, kind: input, shape index: {}]   ;;  %s8095_s8 = inlined_call_operand.vmem [shape: f32[1,16], index: 8, kind: input, shape index: {}]   ;;  %s8096_s9 = inlined_call_operand.vmem [shape: f32[16,16], index: 9, kind: input, shape index: {}]   ;;  %s8097_s10 = inlined_call_operand.vmem [shape: f32[1,16], index: 10, kind: input, shape index: {}]   ;;  %s8098_s11 = inlined_call_operand.vmem [shape: f32[32,1], index: 11, kind: input, shape index: {}]   ;;  %s8099_s12 = inlined_call_operand.vmem [shape: f32[16,1], index: 12, kind: input, shape index: {}]   ;;  %s8100_s13 = inlined_call_operand.<no memory space> [shape: f32[1,1], index: 13, kind: input, shape index: {}]   ;;  %s8101_s14 = inlined_call_operand.vmem [shape: f32[128,1], index: 14, kind: output, shape index: {}]  }
   0x1   :  { %v19_v0 = vstv %s8100_s13 }
   0x2   :  { %20 = vst [vmem:[#allocation2] sm:$0x1] %v19_v0 }
   0x3   :  { %s6686_s15 = smov 0   ;;  %s6688_s16 = smov 0  }
   0x4   :  { %s6690_s17 = smov 0  }
   0x5 LB: > { %s4969_s13 = sadd.s32 4294967295, %s6603_s17   ;;  %s6703_s18 = sadd.s32 1, %s6603_s17   ;;  %s6603_s17 = sphi %s6690_s17, %s8104_s17   ;;  %s6599_s16 = sphi %s6688_s16, %s8103_s16   ;;  %s6595_s15 = sphi %s6686_s15, %s8102_s15  }
   0x6   : > { %s30_s19 = ssub.s32 %s6603_s17, %s6703_s18  ;;  %s33_s20 = sadd.s32 1, %s6599_s16 }
   0x7   : > { %p31_p0 = scmp.eq.s32.totalorder %s30_s19, 0  ;;  %p40_p1 = scmp.ne.s32.totalorder %s6599_s16, %s6595_s15 }
   0x8   : > { %p41_p2 = scmp.eq.s32.totalorder %s6603_s17, 0  ;;  %p4972_p4 = scmp.ge.s32.totalorder %s6603_s17, 4 }
   0x9   : > { %s6712_s21 = scalar_select %p31_p0, %s6599_s16, %s33_s20  }
   0xa   : > { %p42_p3 = por %p41_p2, %p40_p1  ;;  %406 = sbr.rel (%p4972_p4) target bundleno = 37 (0x25), region = 64 }
  0x11   : > { %409 = sbr.rel (!%p42_p3) target bundleno = 37 (0x25), region = 68  ;;  %s411_s22 = sand.u32 (%p42_p3), 1, %s6599_s16  }
  0x12   : > { %s5161_s23 = sshll.u32 (%p42_p3), %s6603_s17, 5  ;;  %s4973_s24 = sshll.u32 (%p42_p3), %s411_s22, 8 }
  0x13   : > { %s6720_s27 = scalar_lea.vmem (%p42_p3), %s8087_s0, %s5161_s23  ;;  %s6725_s28 = scalar_lea.vmem (%p42_p3), [#allocation3], %s4973_s24 }
  0x14   : > { %v506_v1 = vld [vmem:[%s6720_s27] sm:$0xff] (%p42_p3)  ;;  %v508_v2 = vld [vmem:[%s6720_s27 + $0x8] sm:$0xff] (%p42_p3)  ;;  %v510_v3 = vld [vmem:[%s6720_s27 + $0x10] sm:$0xff] (%p42_p3) }
  0x15   : > { %507 = vst [vmem:[%s6725_s28] sm:$0xff] (%p42_p3), %v506_v1  ;;  %509 = vst [vmem:[%s6725_s28 + $0x8] sm:$0xff] (%p42_p3), %v508_v2  ;;  %v512_v4 = vld [vmem:[%s6720_s27 + $0x18] sm:$0xff] (%p42_p3)  ;;  %v514_v5 = vld [vmem:[%s6720_s27 + $0x80] sm:$0xff] (%p42_p3) }
  0x16   : > { %511 = vst [vmem:[%s6725_s28 + $0x10] sm:$0xff] (%p42_p3), %v510_v3  ;;  %v516_v6 = vld [vmem:[%s6720_s27 + $0x88] sm:$0xff] (%p42_p3)  ;;  %513 = vst [vmem:[%s6725_s28 + $0x18] sm:$0xff] (%p42_p3), %v512_v4  ;;  %v518_v7 = vld [vmem:[%s6720_s27 + $0x90] sm:$0xff] (%p42_p3) }
  0x17   : > { %515 = vst [vmem:[%s6725_s28 + $0x20] sm:$0xff] (%p42_p3), %v514_v5  ;;  %517 = vst [vmem:[%s6725_s28 + $0x28] sm:$0xff] (%p42_p3), %v516_v6  ;;  %v520_v8 = vld [vmem:[%s6720_s27 + $0x98] sm:$0xff] (%p42_p3)  ;;  %v522_v9 = vld [vmem:[%s6720_s27 + $0x100] sm:$0xff] (%p42_p3) }
  0x18   : > { %519 = vst [vmem:[%s6725_s28 + $0x30] sm:$0xff] %v518_v7  ;;  %521 = vst [vmem:[%s6725_s28 + $0x38] sm:$0xff] %v520_v8  ;;  %v524_v10 = vld [vmem:[%s6720_s27 + $0x108] sm:$0xff]  ;;  %v526_v11 = vld [vmem:[%s6720_s27 + $0x110] sm:$0xff] }
  0x19   : > { %523 = vst [vmem:[%s6725_s28 + $0x40] sm:$0xff] %v522_v9  ;;  %v528_v12 = vld [vmem:[%s6720_s27 + $0x118] sm:$0xff]  ;;  %525 = vst [vmem:[%s6725_s28 + $0x48] sm:$0xff] %v524_v10  ;;  %v530_v13 = vld [vmem:[%s6720_s27 + $0x180] sm:$0xff] }
  0x1a   : > { %527 = vst [vmem:[%s6725_s28 + $0x50] sm:$0xff] %v526_v11  ;;  %529 = vst [vmem:[%s6725_s28 + $0x58] sm:$0xff] %v528_v12  ;;  %v532_v14 = vld [vmem:[%s6720_s27 + $0x188] sm:$0xff]  ;;  %v534_v15 = vld [vmem:[%s6720_s27 + $0x190] sm:$0xff] }
  0x1b   : > { %531 = vst [vmem:[%s6725_s28 + $0x60] sm:$0xff] %v530_v13  ;;  %533 = vst [vmem:[%s6725_s28 + $0x68] sm:$0xff] %v532_v14  ;;  %v536_v16 = vld [vmem:[%s6720_s27 + $0x198] sm:$0xff]  ;;  %v538_v17 = vld [vmem:[%s6720_s27 + $0x200] sm:$0xff] }
  0x1c   : > { %535 = vst [vmem:[%s6725_s28 + $0x70] sm:$0xff] %v534_v15  ;;  %v540_v18 = vld [vmem:[%s6720_s27 + $0x208] sm:$0xff]  ;;  %537 = vst [vmem:[%s6725_s28 + $0x78] sm:$0xff] %v536_v16  ;;  %v542_v19 = vld [vmem:[%s6720_s27 + $0x210] sm:$0xff] }
  0x1d   : > { %539 = vst [vmem:[%s6725_s28 + $0x80] sm:$0xff] %v538_v17  ;;  %541 = vst [vmem:[%s6725_s28 + $0x88] sm:$0xff] %v540_v18  ;;  %v544_v20 = vld [vmem:[%s6720_s27 + $0x218] sm:$0xff]  ;;  %v546_v21 = vld [vmem:[%s6720_s27 + $0x280] sm:$0xff] }
  0x1e   : > { %543 = vst [vmem:[%s6725_s28 + $0x90] sm:$0xff] %v542_v19  ;;  %545 = vst [vmem:[%s6725_s28 + $0x98] sm:$0xff] %v544_v20  ;;  %v548_v22 = vld [vmem:[%s6720_s27 + $0x288] sm:$0xff]  ;;  %v550_v23 = vld [vmem:[%s6720_s27 + $0x290] sm:$0xff] }
  0x1f   : > { %547 = vst [vmem:[%s6725_s28 + $0xa0] sm:$0xff] %v546_v21  ;;  %v552_v24 = vld [vmem:[%s6720_s27 + $0x298] sm:$0xff]  ;;  %549 = vst [vmem:[%s6725_s28 + $0xa8] sm:$0xff] %v548_v22  ;;  %v554_v25 = vld [vmem:[%s6720_s27 + $0x300] sm:$0xff] }
  0x20   : > { %551 = vst [vmem:[%s6725_s28 + $0xb0] sm:$0xff] %v550_v23  ;;  %553 = vst [vmem:[%s6725_s28 + $0xb8] sm:$0xff] %v552_v24  ;;  %v556_v26 = vld [vmem:[%s6720_s27 + $0x308] sm:$0xff]  ;;  %v558_v27 = vld [vmem:[%s6720_s27 + $0x310] sm:$0xff] }
  0x21   : > { %555 = vst [vmem:[%s6725_s28 + $0xc0] sm:$0xff] %v554_v25  ;;  %557 = vst [vmem:[%s6725_s28 + $0xc8] sm:$0xff] %v556_v26  ;;  %v560_v28 = vld [vmem:[%s6720_s27 + $0x318] sm:$0xff]  ;;  %v562_v29 = vld [vmem:[%s6720_s27 + $0x380] sm:$0xff] }
  0x22   : > { %559 = vst [vmem:[%s6725_s28 + $0xd0] sm:$0xff] %v558_v27  ;;  %v564_v30 = vld [vmem:[%s6720_s27 + $0x388] sm:$0xff]  ;;  %561 = vst [vmem:[%s6725_s28 + $0xd8] sm:$0xff] %v560_v28  ;;  %v566_v31 = vld [vmem:[%s6720_s27 + $0x390] sm:$0xff] }
  0x23   : > { %563 = vst [vmem:[%s6725_s28 + $0xe0] sm:$0xff] %v562_v29  ;;  %565 = vst [vmem:[%s6725_s28 + $0xe8] sm:$0xff] %v564_v30  ;;  %v568_v32 = vld [vmem:[%s6720_s27 + $0x398] sm:$0xff] }
  0x24   : > { %567 = vst [vmem:[%s6725_s28 + $0xf0] sm:$0xff] %v566_v31  ;;  %569 = vst [vmem:[%s6725_s28 + $0xf8] sm:$0xff] %v568_v32 }
  0x25 PF: > { %p4976_p5 = scmp.ge.s32.totalorder %s6603_s17, 1  ;;  %p583_p6 = scmp.lt.s32.totalorder %s6603_s17, 5 }
  0x27   : > { %p584_p7 = pnand %p4976_p5, %p583_p6 }
  0x28   : > { %v653_v33 = vld [vmem:[%s8089_s2] sm:$0xff] (!%p584_p7)  ;;  %s590_s19 = sand.u32 (!%p584_p7), 1, %s6595_s15   ;;  %v655_v35 = vld [vmem:[%s8090_s3 + $0x8] sm:$0xff] (!%p584_p7)  ;;  %vm697_vm0 = vcmask (!%p584_p7), 64512   ;;  %v656_v37 = vld [vmem:[%s8090_s3 + $0x10] sm:$0xff] (!%p584_p7)  ;;  %v6605_v8 = vmov (!%p584_p7), 0.0  }
  0x29   : > { %587 = sbr.rel (%p584_p7) target bundleno = 6767 (0x1a6f), region = 110  ;;  %v654_v34 = vld [vmem:[%s8090_s3] sm:$0xff] (!%p584_p7)  ;;  %5380 = vmatprep.subr.mxu0 (!%p584_p7), %v653_v33  ;;  %s4977_s25 = sshll.u32 (!%p584_p7), %s590_s19, 8  ;;  %v657_v38 = vld [vmem:[%s8090_s3 + $0x18] sm:$0xff] (!%p584_p7)  ;;  %vm1034_vm1 = vcmask (!%p584_p7), 261120   ;;  %vm1243_vm2 = vcmask (!%p584_p7), 523264  }
  0x2a   : > { %v6800_v36 = vpack.c.bf16 (!%p584_p7), %v655_v35, %v654_v34  ;;  %5381 = vmatpush3.msra.mxu0 (!%p584_p7), %v653_v33  ;;  %s6808_s15 = scalar_lea.vmem (!%p584_p7), [#allocation3], %s4977_s25  ;;  %v6814_v42 = vpack.c.bf16 (!%p584_p7), %v657_v38, %v656_v37  ;;  %v6888_v9 = vld [vmem:[%s8091_s4] ss:$0 sm:$0xff] (!%p584_p7)  ;;  %s6606_s20 = smov (!%p584_p7), 64   ;;  %vm4569_vm3 = vcmask (!%p584_p7), 130048   ;;  %vm4890_vm4 = vcmask (!%p584_p7), 7168  }
  0x2b   : > { %v659_v39 = vld [vmem:[%s6808_s15] sm:$0xff] (!%p584_p7)  ;;  %v660_v40 = vld [vmem:[%s6808_s15 + $0x8] sm:$0xff] (!%p584_p7)  ;;  %v661_v41 = vld [vmem:[%s6808_s15 + $0x10] sm:$0xff] (!%p584_p7)  ;;  %s6607_s22 = smov (!%p584_p7), 32   ;;  %s4978_s29 = sshll.u32 (!%p584_p7), %s4969_s13, 2 }
  0x2c   : > { %5761 = vmatprep.subr.bf16.mxu0 (!%p584_p7), %v6800_v36  ;;  %5382 = vmatprep.mubr.msk.f32.mxu0 (!%p584_p7), %vm697_vm0, %v659_v39  ;;  %v662_v43 = vld [vmem:[%s6808_s15 + $0x18] sm:$0xff] (!%p584_p7)  ;;  %v663_v44 = vld [vmem:[%s6808_s15 + $0x20] sm:$0xff] (!%p584_p7)  ;;  %v664_v45 = vld [vmem:[%s6808_s15 + $0x28] sm:$0xff] (!%p584_p7)  ;;  %p642_p8 = scmp.lt.s32.totalorder (!%p584_p7), %s4978_s29, 15 }
  0x2d   : > { %5383 = vmatmul.mubr.msk.f32.vlgmr.msra.gmra.mrb[0].mxu0 (!%p584_p7), %vm697_vm0, %v660_v40  ;;  %v665_v46 = vld [vmem:[%s6808_s15 + $0x30] sm:$0xff] (!%p584_p7)  ;;  %v666_v47 = vld [vmem:[%s6808_s15 + $0x38] sm:$0xff] (!%p584_p7)  ;;  %v667_v48 = vld [vmem:[%s6808_s15 + $0x40] sm:$0xff] (!%p584_p7) }
  0x2e   : > { %5763 = vmatpush3.bf16.msra.mxu0 (!%p584_p7), %v6800_v36  ;;  %5385 = vmatprep.mubr.msk.f32.mxu0 (!%p584_p7), %vm697_vm0, %v661_v41  ;;  %v668_v49 = vld [vmem:[%s6808_s15 + $0x48] sm:$0xff] (!%p584_p7)  ;;  %v669_v50 = vld [vmem:[%s6808_s15 + $0x50] sm:$0xff] (!%p584_p7)  ;;  %v670_v51 = vld [vmem:[%s6808_s15 + $0x58] sm:$0xff] (!%p584_p7) }
  0x2f   : > { %5765 = vmatprep.subr.bf16.mxu0 (!%p584_p7), %v6814_v42  ;;  %v671_v52 = vld [vmem:[%s6808_s15 + $0x60] sm:$0xff] (!%p584_p7)  ;;  %v672_v53 = vld [vmem:[%s6808_s15 + $0x68] sm:$0xff] (!%p584_p7)  ;;  %v673_v54 = vld [vmem:[%s6808_s15 + $0x70] sm:$0xff] (!%p584_p7) }
  0x30   : > { %v674_v55 = vld [vmem:[%s6808_s15 + $0x78] sm:$0xff]  ;;  %v675_v56 = vld [vmem:[%s6808_s15 + $0x80] sm:$0xff]  ;;  %v676_v57 = vld [vmem:[%s6808_s15 + $0x88] sm:$0xff]  ;;  %s8106_s29 = smov (!%p642_p8, %s4978_s29), 15 }
  0x31   : > { %5386 = vmatmul.mubr.msk.f32.gmra.mrb[2].mxu0 %vm697_vm0, %v662_v43  ;;  %v677_v58 = vld [vmem:[%s6808_s15 + $0x90] sm:$0xff]  ;;  %v678_v59 = vld [vmem:[%s6808_s15 + $0x98] sm:$0xff]  ;;  %v679_v60 = vld [vmem:[%s6808_s15 + $0xa0] sm:$0xff] }
  0x32   : > { %5388 = vmatprep.mubr.msk.f32.mxu0 %vm697_vm0, %v663_v44  ;;  %5767 = vmatpush3.bf16.msra.mxu0 %v6814_v42  ;;  %v680_v61 = vld [vmem:[%s6808_s15 + $0xa8] sm:$0xff]  ;;  %v681_v62 = vld [vmem:[%s6808_s15 + $0xb0] sm:$0xff]  ;;  %v682_v63 = vld [vmem:[%s6808_s15 + $0xb8] sm:$0xff] }
  0x33   : > { %5785 = vmatprep.subr.bf16.mxu0 %v6800_v36  ;;  %v683_v0 = vld [vmem:[%s6808_s15 + $0xc0] sm:$0xff]  ;;  %v684_v1 = vld [vmem:[%s6808_s15 + $0xc8] sm:$0xff]  ;;  %v685_v2 = vld [vmem:[%s6808_s15 + $0xd0] sm:$0xff] }
  0x34   : > { %v686_v3 = vld [vmem:[%s6808_s15 + $0xd8] sm:$0xff]  ;;  %v687_v4 = vld [vmem:[%s6808_s15 + $0xe0] sm:$0xff]  ;;  %v688_v5 = vld [vmem:[%s6808_s15 + $0xe8] sm:$0xff] }
  0x35   : > { %5389 = vmatmul.mubr.msk.f32.gmra.mrb[4].mxu0 %vm697_vm0, %v664_v45  ;;  %v689_v6 = vld [vmem:[%s6808_s15 + $0xf0] sm:$0xff]  ;;  %v690_v7 = vld [vmem:[%s6808_s15 + $0xf8] sm:$0xff]  ;;  %s4979_s15 = sshll.u32 %s8106_s29, 3 }
  0x36   : > { %5391 = vmatprep.mubr.msk.f32.mxu0 %vm697_vm0, %v665_v46  ;;  %s645_s25 = scalar_lea.vmem %s8088_s1, %s4979_s15  ;;  %s651_s13 = scalar_lea.vmem %s8101_s14, %s4979_s15 }
  0x39   : > { %5392 = vmatmul.mubr.msk.f32.gmra.mrb[6].mxu0 %vm697_vm0, %v666_v47 }
  0x3a   : > { %5394 = vmatprep.mubr.msk.f32.mxu0 %vm697_vm0, %v667_v48 }
  0x3d   : > { %5395 = vmatmul.mubr.msk.f32.gmra.mrb[8].mxu0 %vm697_vm0, %v668_v49 }
  0x3e   : > { %5397 = vmatprep.mubr.msk.f32.mxu0 %vm697_vm0, %v669_v50 }
  0x41   : > { %5398 = vmatmul.mubr.msk.f32.gmra.mrb[10].mxu0 %vm697_vm0, %v670_v51 }
  0x42   : > { %5400 = vmatprep.mubr.msk.f32.mxu0 %vm697_vm0, %v671_v52 }
  0x45   : > { %5401 = vmatmul.mubr.msk.f32.gmra.mrb[12].mxu0 %vm697_vm0, %v672_v53 }
  0x46   : > { %5403 = vmatprep.mubr.msk.f32.mxu0 %vm697_vm0, %v673_v54 }
  0x49   : > { %5404 = vmatmul.mubr.msk.f32.gmra.mrb[14].mxu0 %vm697_vm0, %v674_v55 }
  0x4a   : > { %5406 = vmatprep.mubr.msk.f32.mxu0 %vm697_vm0, %v675_v56 }
  0x4d   : > { %5407 = vmatmul.mubr.msk.f32.gmra.mrb[16].mxu0 %vm697_vm0, %v676_v57 }
  0x4e   : > { %5409 = vmatprep.mubr.msk.f32.mxu0 %vm697_vm0, %v677_v58 }
  0x51   : > { %5410 = vmatmul.mubr.msk.f32.gmra.mrb[18].mxu0 %vm697_vm0, %v678_v59 }
  0x52   : > { %5412 = vmatprep.mubr.msk.f32.mxu0 %vm697_vm0, %v679_v60 }
  0x55   : > { %5413 = vmatmul.mubr.msk.f32.gmra.mrb[20].mxu0 %vm697_vm0, %v680_v61 }
  0x56   : > { %5415 = vmatprep.mubr.msk.f32.mxu0 %vm697_vm0, %v681_v62 }
  0x59   : > { %5416 = vmatmul.mubr.msk.f32.gmra.mrb[22].mxu0 %vm697_vm0, %v682_v63  ;;  %v1019_v63 = vld [vmem:[%s8092_s5] sm:$0xff] }
  0x5a   : > { %5418 = vmatprep.mubr.msk.f32.mxu0 %vm697_vm0, %v683_v0  ;;  %v1020_v0 = vld [vmem:[%s8092_s5 + $0x8] sm:$0xff] }
  0x5d   : > { %5419 = vmatmul.mubr.msk.f32.gmra.mrb[24].mxu0 %vm697_vm0, %v684_v1  ;;  %v1021_v1 = vld [vmem:[%s8092_s5 + $0x10] sm:$0xff] }
  0x5e   : > { %5421 = vmatprep.mubr.msk.f32.mxu0 %vm697_vm0, %v685_v2  ;;  %v6938_v2 = vpack.c.bf16 %v1020_v0, %v1019_v63 }
  0x60   : > { %5769 = vmatprep.subr.bf16.mxu1 %v6938_v2 }
  0x61   : > { %5422 = vmatmul.mubr.msk.f32.gmra.mrb[26].mxu0 %vm697_vm0, %v686_v3  ;;  %v1022_v3 = vld [vmem:[%s8092_s5 + $0x18] sm:$0xff]  ;;  %5771 = vmatpush3.bf16.msra.mxu1 %v6938_v2 }
  0x62   : > { %5424 = vmatprep.mubr.msk.f32.mxu0 %vm697_vm0, %v687_v4 }
  0x65   : > { %5425 = vmatmul.mubr.msk.f32.gmra.mrb[28].mxu0 %vm697_vm0, %v688_v5  ;;  %v6943_v5 = vpack.c.bf16 %v1022_v3, %v1021_v1 }
  0x66   : > { %5427 = vmatprep.mubr.msk.f32.mxu0 %vm697_vm0, %v689_v6  ;;  %v1023_v6 = vld [vmem:[%s8092_s5 + $0x20] sm:$0xff] }
  0x67   : > { %5773 = vmatprep.subr.bf16.mxu1 %v6943_v5 }
  0x68   : > { %5775 = vmatpush3.bf16.msra.mxu1 %v6943_v5 }
  0x69   : > { %5428 = vmatmul.mubr.msk.f32.gmra.mrb[30].mxu0 %vm697_vm0, %v690_v7  ;;  %v1024_v7 = vld [vmem:[%s8092_s5 + $0x28] sm:$0xff] }
  0x6a   : > { %5438 = vmatprep.mubr.f32.mxu0 %v6605_v8 }
  0x6d   : > { %5439 = vmatmul.mubr.f32.vlgmr.msra.gmra.mrb[0].mxu0 %v6605_v8 }
  0x6e   : > { %5441 = vmatprep.mubr.f32.mxu0 %v6605_v8  ;;  %5787 = vmatpush3.bf16.msra.mxu0 %v6800_v36 }
  0x6f   : > { %5789 = vmatprep.subr.bf16.mxu0 %v6814_v42 }
  0x71   : > { %5442 = vmatmul.mubr.f32.gmra.mrb[2].mxu0 %v6605_v8  ;;  %v6955_v8 = vpack.c.bf16 %v1024_v7, %v1023_v6 }
  0x72   : > { %5791 = vmatpush3.bf16.msra.mxu0 %v6814_v42 }
  0x73   : > { %5809 = vmatprep.subr.bf16.mxu0 %v6800_v36  ;;  %5777 = vmatprep.subr.bf16.mxu1 %v6955_v8 }
  0x74   : > { %5779 = vmatpush3.bf16.msra.mxu1 %v6955_v8 }
 0x140   : > { %v5440_v10 = vpop.f32.mrb[0].mxu0 }
 0x141   : > { %v1104_v11 = vpop.f32.mrb[1].mxu0  ;;  %v5970_v13 = vadd.f32 %v5440_v10, %v6888_v9  ;;  %v1025_v10 = vld [vmem:[%s8092_s5 + $0x30] sm:$0xff] }
 0x142   : > { %v5971_v12 = vadd.f32 %v6888_v9, %v1104_v11  ;;  %v1026_v11 = vld [vmem:[%s8092_s5 + $0x38] sm:$0xff] }
 0x143   : > { %v5017_v23 = vmul.f32 -1.442695, %v5970_v13 }
 0x144   : > { %6065 = vtanh.f32 %v5971_v12  ;;  %v5443_v14 = vpop.f32.mrb[2].mxu0  ;;  %v5016_v22 = vmul.f32 -1.442695, %v5971_v12  ;;  %v6966_v12 = vpack.c.bf16 %v1026_v11, %v1025_v10 }
 0x145   : > { %v1114_v15 = vpop.f32.mrb[3].mxu0  ;;  %6067 = vtanh.f32 %v5970_v13  ;;  %v5972_v17 = vadd.f32 %v5443_v14, %v6888_v9 }
 0x146   : > { %v5973_v16 = vadd.f32 %v6888_v9, %v1114_v15  ;;  %5781 = vmatprep.subr.bf16.mxu1 %v6966_v12 }
 0x147   : > { %v5019_v25 = vmul.f32 -1.442695, %v5972_v17  ;;  %5783 = vmatpush3.bf16.msra.mxu1 %v6966_v12 }
 0x148   : > { %6069 = vtanh.f32 %v5973_v16  ;;  %v5018_v24 = vmul.f32 -1.442695, %v5973_v16  ;;  %5793 = vmatprep.subr.bf16.mxu1 %v6938_v2 }
 0x149   : > { %6071 = vtanh.f32 %v5972_v17 }
 0x14a   : > { %6073 = vpow2.f32 %v5016_v22 }
 0x14b   : > { %6075 = vpow2.f32 %v5017_v23 }
 0x14c   : > { %6077 = vpow2.f32 %v5018_v24 }
 0x14d   : > { %6079 = vpow2.f32 %v5019_v25 }
 0x14e   : > { %v6066_v18 = vpop.eup %6065 }
 0x14f   : > { %1163 = vrot.lane.b32.xlu0 %v6066_v18, %s6606_s20  ;;  %v6068_v19 = vpop.eup %6067 }
 0x152   : > { %v6070_v20 = vpop.eup %6069 }
 0x153   : > { %1165 = vrot.lane.b32.xlu0 %v6068_v19, %s6606_s20  ;;  %1167 = vrot.lane.b32.xlu1 %v6070_v20, %s6606_s20  ;;  %v6072_v21 = vpop.eup %6071 }
 0x154   : > { %v6074_v26 = vpop.eup %6073 }
 0x155   : > { %v6076_v27 = vpop.eup %6075  ;;  %v1139_v28 = vadd.f32 1.0, %v6074_v26 }
 0x156   : > { %v6078_v29 = vpop.eup %6077  ;;  %v1140_v30 = vadd.f32 1.0, %v6076_v27 }
 0x157   : > { %1169 = vrot.lane.b32.xlu1 %v6072_v21, %s6606_s20  ;;  %6081 = vrcp.f32 %v1139_v28  ;;  %v1141_v31 = vadd.f32 1.0, %v6078_v29  ;;  %v6080_v32 = vpop.eup %6079 }
 0x158   : > { %6083 = vrcp.f32 %v1140_v30  ;;  %v1142_v33 = vadd.f32 1.0, %v6080_v32 }
 0x159   : > { %6085 = vrcp.f32 %v1141_v31 }
 0x15a   : > { %6087 = vrcp.f32 %v1142_v33  ;;  %v7009_v33 = vld [vmem:[%s8093_s6] ss:$0 sm:$0xff] }
 0x161   : > { %v6898_v34 = vpop.eup %6081 }
 0x162   : > { %v6901_v38 = vpop.eup %6083  ;;  %v1155_v48 = vmul.f32 0.0, %v6898_v34 }
 0x163   : > { %v6904_v39 = vpop.eup %6085  ;;  %v1156_v51 = vmul.f32 0.0, %v6901_v38 }
 0x164   : > { %v6088_v45 = vpop.eup %6087  ;;  %v1157_v52 = vmul.f32 0.0, %v6904_v39 }
 0x165   : > { %v1158_v57 = vmul.f32 0.0, %v6088_v45 }
 0x1c1   : > { %v1164_v35 = vpop.permute.xlu0 %1163 }
 0x1c2   : > { %v1175_v37 = vmul.f32 %v6898_v34, %v1164_v35 }
 0x1c4   : > { %1183 = vrot.lane.b32.xlu0 %v1175_v37, %s6607_s22 }
 0x1c5   : > { %v1166_v40 = vpop.permute.xlu0 %1165  ;;  %v1168_v41 = vpop.permute.xlu1 %1167 }
 0x1c6   : > { %v1176_v43 = vmul.f32 %v6901_v38, %v1166_v40  ;;  %v1177_v44 = vmul.f32 %v6904_v39, %v1168_v41 }
 0x1c8   : > { %1185 = vrot.lane.b32.xlu1 %v1176_v43, %s6607_s22  ;;  %1187 = vrot.lane.b32.xlu0 %v1177_v44, %s6607_s22 }
 0x1c9   : > { %v1170_v46 = vpop.permute.xlu1 %1169 }
 0x1ca   : > { %v1178_v47 = vmul.f32 %v6088_v45, %v1170_v46 }
 0x1cc   : > { %1189 = vrot.lane.b32.xlu1 %v1178_v47, %s6607_s22 }
 0x236   : > { %v1184_v49 = vpop.permute.xlu0 %1183 }
 0x237   : > { %v6912_v50 = vadd.f32 %v1184_v49, %v1155_v48 }
 0x239   : > { %6089 = vtanh.f32 %v6912_v50 }
 0x23a   : > { %v1186_v53 = vpop.permute.xlu1 %1185  ;;  %v1188_v54 = vpop.permute.xlu0 %1187 }
 0x23b   : > { %v6917_v55 = vadd.f32 %v1186_v53, %v1156_v51  ;;  %v6919_v56 = vadd.f32 %v1188_v54, %v1157_v52 }
 0x23d   : > { %6091 = vtanh.f32 %v6917_v55 }
 0x23e   : > { %6093 = vtanh.f32 %v6919_v56  ;;  %v1190_v58 = vpop.permute.xlu1 %1189 }
 0x23f   : > { %v6923_v59 = vadd.f32 %v1190_v58, %v1158_v57 }
 0x241   : > { %6095 = vtanh.f32 %v6923_v59 }
 0x243   : > { %v6090_v60 = vpop.eup %6089 }
 0x244   : > { %1207 = vrot.lane.b32.xlu0 %v6090_v60, %s6606_s20 }
 0x247   : > { %v6092_v61 = vpop.eup %6091 }
 0x248   : > { %v6094_v62 = vpop.eup %6093  ;;  %1209 = vrot.lane.b32.xlu1 %v6092_v61, %s6606_s20 }
 0x249   : > { %1211 = vrot.lane.b32.xlu0 %v6094_v62, %s6606_s20 }
 0x24b   : > { %v6096_v4 = vpop.eup %6095 }
 0x24c   : > { %1213 = vrot.lane.b32.xlu1 %v6096_v4, %s6606_s20 }
 0x2b6   : > { %v1208_v13 = vpop.permute.xlu0 %1207 }
 0x2b7   : > { %v1219_v14 = vmul.f32 %v6898_v34, %v1208_v13 }
 0x2b9   : > { %1227 = vrot.lane.b32.xlu0 %v1219_v14, %s6606_s20 }
 0x2ba   : > { %v1210_v15 = vpop.permute.xlu1 %1209 }
 0x2bb   : > { %v1220_v16 = vmul.f32 %v6901_v38, %v1210_v15  ;;  %v1212_v17 = vpop.permute.xlu0 %1211 }
 0x2bc   : > { %v1221_v18 = vmul.f32 %v6904_v39, %v1212_v17 }
 0x2bd   : > { %1229 = vrot.lane.b32.xlu1 %v1220_v16, %s6606_s20  ;;  %1437 = vrot.lane.b32.xlu0 %v1219_v14, %s6607_s22 }
 0x2be   : > { %v1214_v19 = vpop.permute.xlu1 %1213 }
 0x2bf   : > { %v1222_v20 = vmul.f32 %v6088_v45, %v1214_v19 }
 0x2c1   : > { %1439 = vrot.lane.b32.xlu1 %v1220_v16, %s6607_s22  ;;  %1231 = vrot.lane.b32.xlu0 %v1221_v18, %s6606_s20 }
 0x2c5   : > { %1233 = vrot.lane.b32.xlu1 %v1222_v20, %s6606_s20  ;;  %1441 = vrot.lane.b32.xlu0 %v1221_v18, %s6607_s22 }
 0x2c9   : > { %1443 = vrot.lane.b32.xlu1 %v1222_v20, %s6607_s22 }
 0x32b   : > { %v1228_v21 = vpop.permute.xlu0 %1227 }
 0x32c   : > { %v1239_v22 = vsel %vm1034_vm1, 0.0, %v1228_v21 }
 0x32d   : > { %5460 = vmatprep.mubr.msk.f32.mxu1 %vm1243_vm2, %v1239_v22 }
 0x32f   : > { %v1230_v23 = vpop.permute.xlu1 %1229  ;;  %v1438_v24 = vpop.permute.xlu0 %1437 }
 0x330   : > { %v1240_v25 = vsel %vm1034_vm1, 0.0, %v1230_v23  ;;  %5474 = vmatprep.mubr.msk.f32.mxu0 %vm1034_vm1, %v1438_v24 }
 0x331   : > { %5461 = vmatmul.mubr.msk.f32.vlgmr.msra.gmra.mrb[0].mxu1 %vm1243_vm2, %v1240_v25 }
 0x332   : > { %5795 = vmatpush3.bf16.msra.mxu1 %v6938_v2 }
 0x333   : > { %v1440_v26 = vpop.permute.xlu1 %1439  ;;  %v1232_v27 = vpop.permute.xlu0 %1231  ;;  %5797 = vmatprep.subr.bf16.mxu1 %v6943_v5 }
 0x334   : > { %v1241_v28 = vsel %vm1034_vm1, 0.0, %v1232_v27  ;;  %5475 = vmatmul.mubr.msk.f32.vlgmr.msra.gmra.mrb[4].mxu0 %vm1034_vm1, %v1440_v26 }
 0x335   : > { %5463 = vmatprep.mubr.msk.f32.mxu1 %vm1243_vm2, %v1241_v28  ;;  %5811 = vmatpush3.bf16.msra.mxu0 %v6800_v36 }
 0x336   : > { %5799 = vmatpush3.bf16.msra.mxu1 %v6943_v5  ;;  %5813 = vmatprep.subr.bf16.mxu0 %v6814_v42 }
 0x337   : > { %v1234_v29 = vpop.permute.xlu1 %1233  ;;  %v1442_v30 = vpop.permute.xlu0 %1441  ;;  %5801 = vmatprep.subr.bf16.mxu1 %v6955_v8 }
 0x338   : > { %v1242_v31 = vsel %vm1034_vm1, 0.0, %v1234_v29  ;;  %5477 = vmatprep.mubr.msk.f32.mxu0 %vm1034_vm1, %v1442_v30 }
 0x339   : > { %5464 = vmatmul.mubr.msk.f32.gmra.mrb[2].mxu1 %vm1243_vm2, %v1242_v31  ;;  %5815 = vmatpush3.bf16.msra.mxu0 %v6814_v42 }
 0x33a   : > { %5803 = vmatpush3.bf16.msra.mxu1 %v6955_v8  ;;  %5833 = vmatprep.subr.bf16.mxu0 %v6800_v36 }
 0x33b   : > { %v1444_v32 = vpop.permute.xlu1 %1443  ;;  %5805 = vmatprep.subr.bf16.mxu1 %v6966_v12 }
 0x33c   : > { %5478 = vmatmul.mubr.msk.f32.gmra.mrb[6].mxu0 %vm1034_vm1, %v1444_v32 }
 0x33e   : > { %5807 = vmatpush3.bf16.msra.mxu1 %v6966_v12 }
 0x33f   : > { %5817 = vmatprep.subr.bf16.mxu1 %v6938_v2 }
 0x404   : > { %v5462_v34 = vpop.f32.mrb[0].mxu1 }
 0x405   : > { %v1328_v35 = vadd.f32 %v5462_v34, %v7009_v33  ;;  %v1322_v37 = vpop.f32.mrb[1].mxu1 }
 0x406   : > { %v1323_v38 = vadd.f32 %v7009_v33, %v1322_v37 }
 0x407   : > { %6097 = vtanh.f32 %v1328_v35  ;;  %v5476_v39 = vpop.f32.mrb[4].mxu0  ;;  %v5025_v0 = vmul.f32 -1.442695, %v1328_v35 }
 0x408   : > { %v5974_v40 = vadd.f32 %v5476_v39, %v6888_v9  ;;  %v1519_v41 = vpop.f32.mrb[5].mxu0  ;;  %6099 = vtanh.f32 %v1323_v38  ;;  %v5024_v1 = vmul.f32 -1.442695, %v1323_v38 }
 0x409   : > { %v5975_v43 = vadd.f32 %v6888_v9, %v1519_v41 }
 0x40a   : > { %6101 = vtanh.f32 %v5974_v40  ;;  %v5033_v3 = vmul.f32 -1.442695, %v5974_v40 }
 0x40b   : > { %6103 = vtanh.f32 %v5975_v43  ;;  %v5032_v4 = vmul.f32 -1.442695, %v5975_v43 }
 0x40c   : > { %v5465_v44 = vpop.f32.mrb[2].mxu1 }
 0x40d   : > { %v1332_v45 = vpop.f32.mrb[3].mxu1  ;;  %v1338_v48 = vadd.f32 %v5465_v44, %v7009_v33 }
 0x40e   : > { %v1333_v46 = vadd.f32 %v7009_v33, %v1332_v45 }
 0x40f   : > { %v5479_v47 = vpop.f32.mrb[6].mxu0  ;;  %v5027_v7 = vmul.f32 -1.442695, %v1338_v48 }
 0x410   : > { %6105 = vtanh.f32 %v1333_v46  ;;  %v1529_v49 = vpop.f32.mrb[7].mxu0  ;;  %v5976_v57 = vadd.f32 %v5479_v47, %v6888_v9  ;;  %v5026_v6 = vmul.f32 -1.442695, %v1333_v46 }
 0x411   : > { %v6098_v51 = vpop.eup %6097  ;;  %6107 = vtanh.f32 %v1338_v48  ;;  %v5977_v53 = vadd.f32 %v6888_v9, %v1529_v49 }
 0x412   : > { %1379 = vrot.lane.b32.xlu0 %v6098_v51, %s6606_s20  ;;  %v6100_v52 = vpop.eup %6099  ;;  %v5035_v16 = vmul.f32 -1.442695, %v5976_v57 }
 0x413   : > { %6109 = vtanh.f32 %v5977_v53  ;;  %v5034_v11 = vmul.f32 -1.442695, %v5977_v53 }
 0x414   : > { %v6102_v54 = vpop.eup %6101  ;;  %6111 = vtanh.f32 %v5976_v57 }
 0x415   : > { %1580 = vrot.lane.b32.xlu1 %v6102_v54, %s6606_s20  ;;  %v6104_v58 = vpop.eup %6103  ;;  %6113 = vpow2.f32 %v5025_v0 }
 0x416   : > { %1377 = vrot.lane.b32.xlu0 %v6100_v52, %s6606_s20  ;;  %6115 = vpow2.f32 %v5024_v1 }
 0x417   : > { %6117 = vpow2.f32 %v5033_v3 }
 0x418   : > { %6119 = vpow2.f32 %v5032_v4 }
 0x419   : > { %1578 = vrot.lane.b32.xlu1 %v6104_v58, %s6606_s20  ;;  %6121 = vpow2.f32 %v5026_v6 }
 0x41a   : > { %v6106_v60 = vpop.eup %6105  ;;  %6123 = vpow2.f32 %v5027_v7 }
 0x41b   : > { %1381 = vrot.lane.b32.xlu0 %v6106_v60, %s6606_s20  ;;  %v6108_v61 = vpop.eup %6107  ;;  %6125 = vpow2.f32 %v5034_v11 }
 0x41d   : > { %v6110_v62 = vpop.eup %6109 }
 0x41e   : > { %1582 = vrot.lane.b32.xlu1 %v6110_v62, %s6606_s20  ;;  %v6112_v63 = vpop.eup %6111 }
 0x41f   : > { %1383 = vrot.lane.b32.xlu0 %v6108_v61, %s6606_s20  ;;  %v6114_v10 = vpop.eup %6113 }
 0x420   : > { %v6116_v13 = vpop.eup %6115  ;;  %v1354_v14 = vadd.f32 1.0, %v6114_v10 }
 0x421   : > { %v6118_v15 = vpop.eup %6117  ;;  %v1353_v17 = vadd.f32 1.0, %v6116_v13 }
 0x422   : > { %1584 = vrot.lane.b32.xlu1 %v6112_v63, %s6606_s20  ;;  %6127 = vrcp.f32 %v1354_v14  ;;  %v1555_v18 = vadd.f32 1.0, %v6118_v15  ;;  %v6120_v19 = vpop.eup %6119 }
 0x423   : > { %v6122_v20 = vpop.eup %6121  ;;  %6129 = vpow2.f32 %v5035_v16  ;;  %v1554_v21 = vadd.f32 1.0, %v6120_v19 }
 0x424   : > { %6131 = vrcp.f32 %v1353_v17  ;;  %v1355_v22 = vadd.f32 1.0, %v6122_v20  ;;  %v6124_v23 = vpop.eup %6123 }
 0x425   : > { %6133 = vrcp.f32 %v1555_v18  ;;  %v6126_v24 = vpop.eup %6125  ;;  %v1356_v25 = vadd.f32 1.0, %v6124_v23 }
 0x426   : > { %6135 = vrcp.f32 %v1554_v21  ;;  %v1556_v31 = vadd.f32 1.0, %v6126_v24 }
 0x427   : > { %6137 = vrcp.f32 %v1355_v22 }
 0x428   : > { %6139 = vrcp.f32 %v1356_v25 }
 0x429   : > { %6141 = vrcp.f32 %v1556_v31 }
 0x42c   : > { %v7027_v26 = vpop.eup %6127 }
 0x42d   : > { %v6130_v29 = vpop.eup %6129  ;;  %v1370_v60 = vmul.f32 0.0, %v7027_v26 }
 0x42e   : > { %v7030_v30 = vpop.eup %6131  ;;  %v1557_v39 = vadd.f32 1.0, %v6130_v29 }
 0x42f   : > { %v7033_v32 = vpop.eup %6133  ;;  %v1369_v0 = vmul.f32 0.0, %v7030_v30 }
 0x430   : > { %v7039_v40 = vpop.eup %6135  ;;  %6143 = vrcp.f32 %v1557_v39  ;;  %v1571_v63 = vmul.f32 %v7033_v32, %v6917_v55 }
 0x431   : > { %v7041_v43 = vpop.eup %6137  ;;  %v1570_v7 = vmul.f32 %v7039_v40, %v6912_v50 }
 0x432   : > { %v7047_v47 = vpop.eup %6139  ;;  %v1371_v11 = vmul.f32 0.0, %v7041_v43 }
 0x433   : > { %v7051_v51 = vpop.eup %6141  ;;  %v1372_v15 = vmul.f32 0.0, %v7047_v47 }
 0x434   : > { %v1572_v50 = vmul.f32 %v7051_v51, %v6919_v56 }
 0x43a   : > { %v7055_v54 = vpop.eup %6143 }
 0x43b   : > { %v1573_v23 = vmul.f32 %v7055_v54, %v6923_v59 }
 0x484   : > { %v1380_v27 = vpop.permute.xlu0 %1379 }
 0x485   : > { %v1390_v28 = vmul.f32 %v7027_v26, %v1380_v27 }
 0x487   : > { %1399 = vrot.lane.b32.xlu0 %v1390_v28, %s6607_s22  ;;  %v1581_v34 = vpop.permute.xlu1 %1580 }
 0x488   : > { %v1378_v35 = vpop.permute.xlu0 %1377  ;;  %v1591_v37 = vmul.f32 %v7033_v32, %v1581_v34 }
 0x489   : > { %v1389_v38 = vmul.f32 %v7030_v30, %v1378_v35 }
 0x48a   : > { %1600 = vrot.lane.b32.xlu1 %v1591_v37, %s6607_s22 }
 0x48b   : > { %1397 = vrot.lane.b32.xlu0 %v1389_v38, %s6607_s22  ;;  %v1579_v41 = vpop.permute.xlu1 %1578 }
 0x48c   : > { %v1590_v44 = vmul.f32 %v7039_v40, %v1579_v41 }
 0x48d   : > { %v1382_v45 = vpop.permute.xlu0 %1381 }
 0x48e   : > { %v1391_v46 = vmul.f32 %v7041_v43, %v1382_v45  ;;  %1598 = vrot.lane.b32.xlu1 %v1590_v44, %s6607_s22 }
 0x490   : > { %1401 = vrot.lane.b32.xlu0 %v1391_v46, %s6607_s22  ;;  %v1583_v52 = vpop.permute.xlu1 %1582 }
 0x491   : > { %v1384_v48 = vpop.permute.xlu0 %1383  ;;  %v1592_v53 = vmul.f32 %v7051_v51, %v1583_v52 }
 0x492   : > { %v1392_v49 = vmul.f32 %v7047_v47, %v1384_v48 }
 0x493   : > { %1602 = vrot.lane.b32.xlu1 %v1592_v53, %s6607_s22 }
 0x494   : > { %1403 = vrot.lane.b32.xlu0 %v1392_v49, %s6607_s22  ;;  %v1585_v57 = vpop.permute.xlu1 %1584 }
 0x495   : > { %v1593_v58 = vmul.f32 %v7055_v54, %v1585_v57 }
 0x497   : > { %1604 = vrot.lane.b32.xlu1 %v1593_v58, %s6607_s22 }
 0x4f9   : > { %v1400_v61 = vpop.permute.xlu0 %1399 }
 0x4fa   : > { %v7060_v62 = vadd.f32 %v1400_v61, %v1370_v60 }
 0x4fc   : > { %6145 = vtanh.f32 %v7060_v62  ;;  %v1601_v1 = vpop.permute.xlu1 %1600 }
 0x4fd   : > { %v1398_v3 = vpop.permute.xlu0 %1397  ;;  %v7066_v4 = vadd.f32 %v1601_v1, %v1571_v63 }
 0x4fe   : > { %v7068_v6 = vadd.f32 %v1398_v3, %v1369_v0 }
 0x4ff   : > { %6147 = vtanh.f32 %v7066_v4 }
 0x500   : > { %6149 = vtanh.f32 %v7068_v6  ;;  %v1599_v10 = vpop.permute.xlu1 %1598 }
 0x501   : > { %v7075_v13 = vadd.f32 %v1599_v10, %v1570_v7 }
 0x502   : > { %v1402_v55 = vpop.permute.xlu0 %1401 }
 0x503   : > { %v7077_v14 = vadd.f32 %v1402_v55, %v1371_v11  ;;  %6151 = vtanh.f32 %v7075_v13 }
 0x505   : > { %6153 = vtanh.f32 %v7077_v14  ;;  %v1603_v20 = vpop.permute.xlu1 %1602 }
 0x506   : > { %v6146_v16 = vpop.eup %6145  ;;  %v1404_v17 = vpop.permute.xlu0 %1403  ;;  %v7088_v22 = vadd.f32 %v1603_v20, %v1572_v50 }
 0x507   : > { %v7082_v18 = vadd.f32 %v1404_v17, %v1372_v15  ;;  %1423 = vrot.lane.b32.xlu0 %v6146_v16, %s6606_s20 }
 0x509   : > { %6155 = vtanh.f32 %v7082_v18  ;;  %v6148_v19 = vpop.eup %6147  ;;  %v1605_v25 = vpop.permute.xlu1 %1604 }
 0x50a   : > { %v6150_v21 = vpop.eup %6149  ;;  %1624 = vrot.lane.b32.xlu1 %v6148_v19, %s6606_s20  ;;  %6157 = vtanh.f32 %v7088_v22  ;;  %v7095_v56 = vadd.f32 %v1605_v25, %v1573_v23 }
 0x50b   : > { %1421 = vrot.lane.b32.xlu0 %v6150_v21, %s6606_s20 }
 0x50c   : > { %6159 = vtanh.f32 %v7095_v56 }
 0x50d   : > { %v6152_v24 = vpop.eup %6151 }
 0x50e   : > { %1622 = vrot.lane.b32.xlu1 %v6152_v24, %s6606_s20 }
 0x50f   : > { %v6154_v27 = vpop.eup %6153 }
 0x510   : > { %1425 = vrot.lane.b32.xlu0 %v6154_v27, %s6606_s20 }
 0x513   : > { %v6156_v28 = vpop.eup %6155 }
 0x514   : > { %1427 = vrot.lane.b32.xlu0 %v6156_v28, %s6606_s20  ;;  %v6158_v29 = vpop.eup %6157 }
 0x515   : > { %1626 = vrot.lane.b32.xlu1 %v6158_v29, %s6606_s20 }
 0x516   : > { %v6160_v31 = vpop.eup %6159 }
 0x519   : > { %1628 = vrot.lane.b32.xlu1 %v6160_v31, %s6606_s20 }
 0x579   : > { %v1424_v59 = vpop.permute.xlu0 %1423 }
 0x57a   : > { %v1434_v34 = vmul.f32 %v7027_v26, %v1424_v59 }
 0x57c   : > { %1644 = vrot.lane.b32.xlu0 %v1434_v34, %s6607_s22  ;;  %v1625_v35 = vpop.permute.xlu1 %1624 }
 0x57d   : > { %v1635_v37 = vmul.f32 %v7033_v32, %v1625_v35  ;;  %v1422_v38 = vpop.permute.xlu0 %1421 }
 0x57e   : > { %v1433_v45 = vmul.f32 %v7030_v30, %v1422_v38 }
 0x57f   : > { %1660 = vrot.lane.b32.xlu1 %v1635_v37, %s6606_s20 }
 0x580   : > { %v1623_v39 = vpop.permute.xlu1 %1622 }
 0x581   : > { %v1634_v41 = vmul.f32 %v7039_v40, %v1623_v39 }
 0x582   : > { %v1426_v44 = vpop.permute.xlu0 %1425 }
 0x583   : > { %1869 = vrot.lane.b32.xlu1 %v1635_v37, %s6607_s22  ;;  %1867 = vrot.lane.b32.xlu0 %v1634_v41, %s6607_s22  ;;  %v1435_v48 = vmul.f32 %v7041_v43, %v1426_v44 }
 0x586   : > { %v1428_v46 = vpop.permute.xlu0 %1427 }
 0x587   : > { %1658 = vrot.lane.b32.xlu1 %v1634_v41, %s6606_s20  ;;  %1642 = vrot.lane.b32.xlu0 %v1433_v45, %s6607_s22  ;;  %v1627_v26 = vpop.permute.xlu1 %1626  ;;  %v1436_v32 = vmul.f32 %v7047_v47, %v1428_v46 }
 0x588   : > { %v1636_v30 = vmul.f32 %v7051_v51, %v1627_v26 }
 0x58b   : > { %1648 = vrot.lane.b32.xlu0 %v1436_v32, %s6607_s22  ;;  %v1629_v40 = vpop.permute.xlu1 %1628 }
 0x58c   : > { %v1637_v49 = vmul.f32 %v7055_v54, %v1629_v40 }
 0x58e   : > { %1664 = vrot.lane.b32.xlu1 %v1637_v49, %s6606_s20 }
 0x58f   : > { %1646 = vrot.lane.b32.xlu0 %v1435_v48, %s6607_s22 }
 0x592   : > { %1662 = vrot.lane.b32.xlu1 %v1636_v30, %s6606_s20 }
 0x593   : > { %1871 = vrot.lane.b32.xlu0 %v1636_v30, %s6607_s22 }
 0x596   : > { %1873 = vrot.lane.b32.xlu1 %v1637_v49, %s6607_s22 }
 0x5ee   : > { %v1645_v47 = vpop.permute.xlu0 %1644 }
 0x5f1   : > { %v1661_v52 = vpop.permute.xlu1 %1660 }
 0x5f2   : > { %v1671_v58 = vsel %vm1034_vm1, %v1645_v47, %v1661_v52 }
 0x5f5   : > { %v1870_v53 = vpop.permute.xlu1 %1869  ;;  %v1868_v57 = vpop.permute.xlu0 %1867 }
 0x5f6   : > { %5510 = vmatprep.mubr.msk.f32.mxu0 %vm1034_vm1, %v1868_v57 }
 0x5f7   : > { %5511 = vmatmul.mubr.msk.f32.vlgmr.msra.gmra.mrb[8].mxu0 %vm1034_vm1, %v1870_v53 }
 0x5f8   : > { %5835 = vmatpush3.bf16.msra.mxu0 %v6800_v36 }
 0x5f9   : > { %v1659_v43 = vpop.permute.xlu1 %1658  ;;  %v1643_v54 = vpop.permute.xlu0 %1642  ;;  %5837 = vmatprep.subr.bf16.mxu0 %v6814_v42 }
 0x5fa   : > { %v1670_v51 = vsel %vm1034_vm1, %v1643_v54, %v1659_v43 }
 0x5fb   : > { %5496 = vmatprep.mubr.msk.f32.mxu1 %vm1243_vm2, %v1670_v51 }
 0x5fc   : > { %5497 = vmatmul.mubr.msk.f32.vlgmr.msra.gmra.mrb[4].mxu1 %vm1243_vm2, %v1671_v58  ;;  %5839 = vmatpush3.bf16.msra.mxu0 %v6814_v42 }
 0x5fd   : > { %v1649_v60 = vpop.permute.xlu0 %1648  ;;  %5819 = vmatpush3.bf16.msra.mxu1 %v6938_v2  ;;  %5857 = vmatprep.subr.bf16.mxu0 %v6800_v36 }
 0x5fe   : > { %5821 = vmatprep.subr.bf16.mxu1 %v6943_v5 }
 0x600   : > { %v1665_v63 = vpop.permute.xlu1 %1664 }
 0x601   : > { %v1647_v61 = vpop.permute.xlu0 %1646  ;;  %5823 = vmatpush3.bf16.msra.mxu1 %v6943_v5  ;;  %v1673_v7 = vsel %vm1034_vm1, %v1649_v60, %v1665_v63 }
 0x602   : > { %5825 = vmatprep.subr.bf16.mxu1 %v6955_v8 }
 0x604   : > { %v1663_v1 = vpop.permute.xlu1 %1662 }
 0x605   : > { %v1872_v0 = vpop.permute.xlu0 %1871  ;;  %5827 = vmatpush3.bf16.msra.mxu1 %v6955_v8  ;;  %v1672_v3 = vsel %vm1034_vm1, %v1647_v61, %v1663_v1 }
 0x606   : > { %5513 = vmatprep.mubr.msk.f32.mxu0 %vm1034_vm1, %v1872_v0  ;;  %5829 = vmatprep.subr.bf16.mxu1 %v6966_v12 }
 0x607   : > { %5499 = vmatprep.mubr.msk.f32.mxu1 %vm1243_vm2, %v1672_v3 }
 0x608   : > { %5500 = vmatmul.mubr.msk.f32.gmra.mrb[6].mxu1 %vm1243_vm2, %v1673_v7  ;;  %v1874_v10 = vpop.permute.xlu1 %1873 }
 0x609   : > { %5831 = vmatpush3.bf16.msra.mxu1 %v6966_v12  ;;  %5514 = vmatmul.mubr.msk.f32.gmra.mrb[10].mxu0 %vm1034_vm1, %v1874_v10 }
 0x60a   : > { %5841 = vmatprep.subr.bf16.mxu1 %v6938_v2 }
 0x6ca   : > { %v5512_v11 = vpop.f32.mrb[8].mxu0 }
 0x6cb   : > { %v5978_v55 = vadd.f32 %v5512_v11, %v6888_v9  ;;  %v1949_v15 = vpop.f32.mrb[9].mxu0 }
 0x6cc   : > { %v5979_v16 = vadd.f32 %v6888_v9, %v1949_v15 }
 0x6cd   : > { %6161 = vtanh.f32 %v5978_v55  ;;  %v5049_v45 = vmul.f32 -1.442695, %v5978_v55 }
 0x6ce   : > { %6163 = vtanh.f32 %v5979_v16  ;;  %v5048_v46 = vmul.f32 -1.442695, %v5979_v16 }
 0x6cf   : > { %v5498_v17 = vpop.f32.mrb[4].mxu1 }
 0x6d0   : > { %v1758_v50 = vadd.f32 %v5498_v17, %v7009_v33  ;;  %v1752_v19 = vpop.f32.mrb[5].mxu1 }
 0x6d1   : > { %v1753_v20 = vadd.f32 %v7009_v33, %v1752_v19 }
 0x6d2   : > { %6165 = vtanh.f32 %v1758_v50  ;;  %v5041_v26 = vmul.f32 -1.442695, %v1758_v50 }
 0x6d3   : > { %6167 = vtanh.f32 %v1753_v20 }
 0x6d7   : > { %v6162_v21 = vpop.eup %6161 }
 0x6d8   : > { %2010 = vrot.lane.b32.xlu1 %v6162_v21, %s6606_s20  ;;  %v6164_v23 = vpop.eup %6163 }
 0x6db   : > { %v5501_v25 = vpop.f32.mrb[6].mxu1 }
 0x6dc   : > { %v6166_v24 = vpop.eup %6165  ;;  %2008 = vrot.lane.b32.xlu1 %v6164_v23, %s6606_s20  ;;  %v1762_v27 = vpop.f32.mrb[7].mxu1  ;;  %v1768_v34 = vadd.f32 %v5501_v25, %v7009_v33 }
 0x6dd   : > { %1809 = vrot.lane.b32.xlu0 %v6166_v24, %s6606_s20  ;;  %v1763_v28 = vadd.f32 %v7009_v33, %v1762_v27  ;;  %v5515_v29 = vpop.f32.mrb[10].mxu0  ;;  %v6168_v59 = vpop.eup %6167 }
 0x6de   : > { %v1959_v31 = vpop.f32.mrb[11].mxu0  ;;  %v5980_v37 = vadd.f32 %v5515_v29, %v6888_v9  ;;  %v5043_v57 = vmul.f32 -1.442695, %v1768_v34 }
 0x6df   : > { %6169 = vtanh.f32 %v1763_v28  ;;  %v5981_v35 = vadd.f32 %v6888_v9, %v1959_v31  ;;  %v5040_v9 = vmul.f32 -1.442695, %v1753_v20  ;;  %v5042_v30 = vmul.f32 -1.442695, %v1763_v28 }
 0x6e0   : > { %6171 = vtanh.f32 %v1768_v34  ;;  %v5051_v58 = vmul.f32 -1.442695, %v5980_v37 }
 0x6e1   : > { %1807 = vrot.lane.b32.xlu0 %v6168_v59, %s6606_s20  ;;  %6173 = vtanh.f32 %v5981_v35  ;;  %v5050_v54 = vmul.f32 -1.442695, %v5981_v35 }
 0x6e2   : > { %6175 = vtanh.f32 %v5980_v37 }
 0x6e3   : > { %6177 = vpow2.f32 %v5049_v45 }
 0x6e4   : > { %6179 = vpow2.f32 %v5048_v46 }
 0x6e5   : > { %6181 = vpow2.f32 %v5041_v26 }
 0x6e6   : > { %6183 = vpow2.f32 %v5040_v9 }
 0x6e9   : > { %v6170_v38 = vpop.eup %6169 }
 0x6ea   : > { %1811 = vrot.lane.b32.xlu0 %v6170_v38, %s6606_s20  ;;  %v6172_v39 = vpop.eup %6171 }
 0x6eb   : > { %v6174_v41 = vpop.eup %6173 }
 0x6ec   : > { %2012 = vrot.lane.b32.xlu1 %v6174_v41, %s6606_s20  ;;  %v6176_v44 = vpop.eup %6175 }
 0x6ed   : > { %v6178_v32 = vpop.eup %6177 }
 0x6ee   : > { %1813 = vrot.lane.b32.xlu0 %v6172_v39, %s6606_s20  ;;  %v1985_v48 = vadd.f32 1.0, %v6178_v32  ;;  %v6180_v40 = vpop.eup %6179 }
 0x6ef   : > { %v6182_v49 = vpop.eup %6181  ;;  %v1984_v47 = vadd.f32 1.0, %v6180_v40 }
 0x6f0   : > { %2014 = vrot.lane.b32.xlu1 %v6176_v44, %s6606_s20  ;;  %6185 = vrcp.f32 %v1985_v48  ;;  %v1784_v52 = vadd.f32 1.0, %v6182_v49  ;;  %v6184_v53 = vpop.eup %6183 }
 0x6f1   : > { %6187 = vpow2.f32 %v5042_v30  ;;  %v1783_v43 = vadd.f32 1.0, %v6184_v53 }
 0x6f2   : > { %6189 = vrcp.f32 %v1984_v47 }
 0x6f3   : > { %6191 = vrcp.f32 %v1784_v52 }
 0x6f4   : > { %6193 = vpow2.f32 %v5043_v57 }
 0x6f5   : > { %6195 = vrcp.f32 %v1783_v43 }
 0x6f6   : > { %6197 = vpow2.f32 %v5050_v54 }
 0x6f7   : > { %6199 = vpow2.f32 %v5051_v58 }
 0x6fa   : > { %v7163_v51 = vpop.eup %6185 }
 0x6fb   : > { %v6188_v63 = vpop.eup %6187  ;;  %v2001_v44 = vmul.f32 %v7163_v51, %v7066_v4 }
 0x6fc   : > { %v7167_v0 = vpop.eup %6189  ;;  %v1785_v7 = vadd.f32 1.0, %v6188_v63 }
 0x6fd   : > { %v7169_v3 = vpop.eup %6191  ;;  %v2000_v26 = vmul.f32 %v7167_v0, %v7075_v13 }
 0x6fe   : > { %v6194_v55 = vpop.eup %6193  ;;  %6201 = vrcp.f32 %v1785_v7  ;;  %v1800_v32 = vmul.f32 %v7169_v3, %v7060_v62 }
 0x6ff   : > { %v7175_v16 = vpop.eup %6195  ;;  %v1786_v17 = vadd.f32 1.0, %v6194_v55 }
 0x700   : > { %v6198_v19 = vpop.eup %6197  ;;  %v1799_v4 = vmul.f32 %v7175_v16, %v7068_v6 }
 0x701   : > { %6203 = vrcp.f32 %v1786_v17  ;;  %v1986_v21 = vadd.f32 1.0, %v6198_v19  ;;  %v6200_v23 = vpop.eup %6199 }
 0x702   : > { %v1987_v24 = vadd.f32 1.0, %v6200_v23 }
 0x703   : > { %6205 = vrcp.f32 %v1986_v21 }
 0x704   : > { %6207 = vrcp.f32 %v1987_v24 }
 0x708   : > { %v7179_v25 = vpop.eup %6201 }
 0x709   : > { %v1801_v53 = vmul.f32 %v7179_v25, %v7077_v14 }
 0x70b   : > { %v7183_v29 = vpop.eup %6203 }
 0x70c   : > { %v1802_v54 = vmul.f32 %v7183_v29, %v7082_v18 }
 0x70d   : > { %v7187_v34 = vpop.eup %6205 }
 0x70e   : > { %v7191_v38 = vpop.eup %6207  ;;  %v2002_v14 = vmul.f32 %v7187_v34, %v7088_v22 }
 0x74a   : > { %v2011_v60 = vpop.permute.xlu1 %2010 }
 0x74b   : > { %v2021_v61 = vmul.f32 %v7163_v51, %v2011_v60 }
 0x74d   : > { %2030 = vrot.lane.b32.xlu1 %v2021_v61, %s6607_s22 }
 0x74e   : > { %v2009_v1 = vpop.permute.xlu1 %2008 }
 0x74f   : > { %v2020_v10 = vmul.f32 %v7167_v0, %v2009_v1  ;;  %v1810_v11 = vpop.permute.xlu0 %1809  ;;  %v2003_v1 = vmul.f32 %v7191_v38, %v7095_v56 }
 0x750   : > { %v1820_v15 = vmul.f32 %v7169_v3, %v1810_v11 }
 0x751   : > { %2028 = vrot.lane.b32.xlu1 %v2020_v10, %s6607_s22 }
 0x752   : > { %1829 = vrot.lane.b32.xlu0 %v1820_v15, %s6607_s22 }
 0x753   : > { %v1808_v50 = vpop.permute.xlu0 %1807 }
 0x754   : > { %v1819_v20 = vmul.f32 %v7175_v16, %v1808_v50 }
 0x756   : > { %1827 = vrot.lane.b32.xlu0 %v1819_v20, %s6607_s22 }
 0x75c   : > { %v1812_v27 = vpop.permute.xlu0 %1811 }
 0x75d   : > { %v1821_v28 = vmul.f32 %v7179_v25, %v1812_v27 }
 0x75e   : > { %v2013_v35 = vpop.permute.xlu1 %2012 }
 0x75f   : > { %1831 = vrot.lane.b32.xlu0 %v1821_v28, %s6607_s22  ;;  %v2022_v37 = vmul.f32 %v7187_v34, %v2013_v35 }
 0x760   : > { %v1814_v31 = vpop.permute.xlu0 %1813 }
 0x761   : > { %v1822_v59 = vmul.f32 %v7183_v29, %v1814_v31  ;;  %2032 = vrot.lane.b32.xlu1 %v2022_v37, %s6607_s22 }
 0x762   : > { %v2015_v39 = vpop.permute.xlu1 %2014 }
 0x763   : > { %1833 = vrot.lane.b32.xlu0 %v1822_v59, %s6607_s22  ;;  %v2023_v41 = vmul.f32 %v7191_v38, %v2015_v39 }
 0x765   : > { %2034 = vrot.lane.b32.xlu1 %v2023_v41, %s6607_s22 }
 0x7bf   : > { %v2031_v45 = vpop.permute.xlu1 %2030 }
 0x7c0   : > { %v7197_v46 = vadd.f32 %v2031_v45, %v2001_v44 }
 0x7c2   : > { %6209 = vtanh.f32 %v7197_v46 }
 0x7c3   : > { %v2029_v9 = vpop.permute.xlu1 %2028 }
 0x7c4   : > { %v7204_v48 = vadd.f32 %v2029_v9, %v2000_v26  ;;  %v1830_v40 = vpop.permute.xlu0 %1829 }
 0x7c5   : > { %v7206_v49 = vadd.f32 %v1830_v40, %v1800_v32 }
 0x7c6   : > { %6211 = vtanh.f32 %v7204_v48 }
 0x7c7   : > { %6213 = vtanh.f32 %v7206_v49 }
 0x7c8   : > { %v1828_v30 = vpop.permute.xlu0 %1827 }
 0x7c9   : > { %v7212_v47 = vadd.f32 %v1828_v30, %v1799_v4 }
 0x7cb   : > { %6215 = vtanh.f32 %v7212_v47 }
 0x7cc   : > { %v6210_v13 = vpop.eup %6209 }
 0x7cd   : > { %2054 = vrot.lane.b32.xlu1 %v6210_v13, %s6606_s20  ;;  %v7290_v13 = vld [vmem:[%s8091_s4] ss:$0 sm:$0xff] }
 0x7d0   : > { %v6212_v62 = vpop.eup %6211 }
 0x7d1   : > { %v6214_v52 = vpop.eup %6213  ;;  %2052 = vrot.lane.b32.xlu1 %v6212_v62, %s6606_s20  ;;  %v1832_v57 = vpop.permute.xlu0 %1831 }
 0x7d2   : > { %1853 = vrot.lane.b32.xlu0 %v6214_v52, %s6606_s20  ;;  %v7220_v43 = vadd.f32 %v1832_v57, %v1801_v53 }
 0x7d3   : > { %v2033_v61 = vpop.permute.xlu1 %2032 }
 0x7d4   : > { %6217 = vtanh.f32 %v7220_v43  ;;  %v7231_v63 = vadd.f32 %v2033_v61, %v2002_v14 }
 0x7d5   : > { %v6216_v6 = vpop.eup %6215  ;;  %v1834_v58 = vpop.permute.xlu0 %1833 }
 0x7d6   : > { %1851 = vrot.lane.b32.xlu0 %v6216_v6, %s6606_s20  ;;  %v7226_v60 = vadd.f32 %v1834_v58, %v1802_v54 }
 0x7d7   : > { %v2035_v7 = vpop.permute.xlu1 %2034 }
 0x7d8   : > { %6219 = vtanh.f32 %v7226_v60  ;;  %v7236_v10 = vadd.f32 %v2035_v7, %v2003_v1 }
 0x7d9   : > { %6221 = vtanh.f32 %v7231_v63 }
 0x7da   : > { %6223 = vtanh.f32 %v7236_v10 }
 0x7de   : > { %v6218_v18 = vpop.eup %6217 }
 0x7df   : > { %1855 = vrot.lane.b32.xlu0 %v6218_v18, %s6606_s20 }
 0x7e2   : > { %v6220_v11 = vpop.eup %6219 }
 0x7e3   : > { %1857 = vrot.lane.b32.xlu0 %v6220_v11, %s6606_s20  ;;  %v6222_v22 = vpop.eup %6221 }
 0x7e4   : > { %2056 = vrot.lane.b32.xlu1 %v6222_v22, %s6606_s20  ;;  %v6224_v55 = vpop.eup %6223 }
 0x7e8   : > { %2058 = vrot.lane.b32.xlu1 %v6224_v55, %s6606_s20 }
 0x83f   : > { %v2055_v15 = vpop.permute.xlu1 %2054 }
 0x840   : > { %v2065_v56 = vmul.f32 %v7163_v51, %v2055_v15 }
 0x842   : > { %2090 = vrot.lane.b32.xlu1 %v2065_v56, %s6606_s20 }
 0x843   : > { %v2053_v17 = vpop.permute.xlu1 %2052 }
 0x844   : > { %v2064_v50 = vmul.f32 %v7167_v0, %v2053_v17  ;;  %v1854_v19 = vpop.permute.xlu0 %1853 }
 0x845   : > { %v1864_v20 = vmul.f32 %v7169_v3, %v1854_v19 }
 0x846   : > { %2299 = vrot.lane.b32.xlu1 %v2065_v56, %s6607_s22  ;;  %2297 = vrot.lane.b32.xlu0 %v2064_v50, %s6607_s22 }
 0x848   : > { %v1852_v21 = vpop.permute.xlu0 %1851 }
 0x849   : > { %v1863_v23 = vmul.f32 %v7175_v16, %v1852_v21 }
 0x84a   : > { %2088 = vrot.lane.b32.xlu1 %v2064_v50, %s6606_s20  ;;  %2074 = vrot.lane.b32.xlu0 %v1864_v20, %s6607_s22 }
 0x84e   : > { %2072 = vrot.lane.b32.xlu0 %v1863_v23, %s6607_s22 }
 0x851   : > { %v1856_v51 = vpop.permute.xlu0 %1855 }
 0x852   : > { %v1865_v28 = vmul.f32 %v7179_v25, %v1856_v51 }
 0x855   : > { %v1858_v24 = vpop.permute.xlu0 %1857 }
 0x856   : > { %v1866_v0 = vmul.f32 %v7183_v29, %v1858_v24  ;;  %v2057_v27 = vpop.permute.xlu1 %2056 }
 0x857   : > { %v2066_v31 = vmul.f32 %v7187_v34, %v2057_v27 }
 0x858   : > { %2078 = vrot.lane.b32.xlu0 %v1866_v0, %s6607_s22 }
 0x85a   : > { %v2059_v3 = vpop.permute.xlu1 %2058 }
 0x85b   : > { %v2067_v59 = vmul.f32 %v7191_v38, %v2059_v3 }
 0x85c   : > { %2076 = vrot.lane.b32.xlu0 %v1865_v28, %s6607_s22 }
 0x85d   : > { %2094 = vrot.lane.b32.xlu1 %v2067_v59, %s6606_s20 }
 0x860   : > { %2301 = vrot.lane.b32.xlu0 %v2066_v31, %s6607_s22 }
 0x861   : > { %2092 = vrot.lane.b32.xlu1 %v2066_v31, %s6606_s20 }
 0x865   : > { %2303 = vrot.lane.b32.xlu1 %v2067_v59, %s6607_s22 }
 0x8b4   : > { %v2091_v16 = vpop.permute.xlu1 %2090 }
 0x8b8   : > { %v2300_v29 = vpop.permute.xlu1 %2299  ;;  %v2298_v35 = vpop.permute.xlu0 %2297 }
 0x8b9   : > { %5546 = vmatprep.mubr.msk.f32.mxu0 %vm1034_vm1, %v2298_v35 }
 0x8ba   : > { %5547 = vmatmul.mubr.msk.f32.vlgmr.msra.gmra.mrb[12].mxu0 %vm1034_vm1, %v2300_v29 }
 0x8bb   : > { %5859 = vmatpush3.bf16.msra.mxu0 %v6800_v36 }
 0x8bc   : > { %v2075_v25 = vpop.permute.xlu0 %2074  ;;  %5861 = vmatprep.subr.bf16.mxu0 %v6814_v42  ;;  %v2089_v34 = vpop.permute.xlu1 %2088 }
 0x8bd   : > { %v2101_v39 = vsel %vm1034_vm1, %v2075_v25, %v2091_v16 }
 0x8bf   : > { %5863 = vmatpush3.bf16.msra.mxu0 %v6814_v42 }
 0x8c0   : > { %v2073_v37 = vpop.permute.xlu0 %2072  ;;  %5881 = vmatprep.subr.bf16.mxu0 %v6800_v36 }
 0x8c1   : > { %v2100_v38 = vsel %vm1034_vm1, %v2073_v37, %v2089_v34 }
 0x8c2   : > { %5532 = vmatprep.mubr.msk.f32.mxu1 %vm1243_vm2, %v2100_v38 }
 0x8c3   : > { %5533 = vmatmul.mubr.msk.f32.vlgmr.msra.gmra.mrb[8].mxu1 %vm1243_vm2, %v2101_v39 }
 0x8c4   : > { %5843 = vmatpush3.bf16.msra.mxu1 %v6938_v2 }
 0x8c5   : > { %5845 = vmatprep.subr.bf16.mxu1 %v6943_v5 }
 0x8c8   : > { %5847 = vmatpush3.bf16.msra.mxu1 %v6943_v5 }
 0x8c9   : > { %5849 = vmatprep.subr.bf16.mxu1 %v6955_v8 }
 0x8ca   : > { %v2079_v41 = vpop.permute.xlu0 %2078 }
 0x8cc   : > { %5851 = vmatpush3.bf16.msra.mxu1 %v6955_v8 }
 0x8cd   : > { %5853 = vmatprep.subr.bf16.mxu1 %v6966_v12 }
 0x8ce   : > { %v2077_v44 = vpop.permute.xlu0 %2076 }
 0x8cf   : > { %v2095_v45 = vpop.permute.xlu1 %2094 }
 0x8d0   : > { %5855 = vmatpush3.bf16.msra.mxu1 %v6966_v12  ;;  %v2103_v40 = vsel %vm1034_vm1, %v2079_v41, %v2095_v45 }
 0x8d1   : > { %5865 = vmatprep.subr.bf16.mxu1 %v6938_v2 }
 0x8d2   : > { %v2302_v26 = vpop.permute.xlu0 %2301 }
 0x8d3   : > { %5549 = vmatprep.mubr.msk.f32.mxu0 %vm1034_vm1, %v2302_v26  ;;  %v2093_v9 = vpop.permute.xlu1 %2092 }
 0x8d4   : > { %v2102_v32 = vsel %vm1034_vm1, %v2077_v44, %v2093_v9 }
 0x8d5   : > { %5535 = vmatprep.mubr.msk.f32.mxu1 %vm1243_vm2, %v2102_v32 }
 0x8d6   : > { %5536 = vmatmul.mubr.msk.f32.gmra.mrb[10].mxu1 %vm1243_vm2, %v2103_v40 }
 0x8d7   : > { %v2304_v4 = vpop.permute.xlu1 %2303 }
 0x8d8   : > { %5550 = vmatmul.mubr.msk.f32.gmra.mrb[14].mxu0 %vm1034_vm1, %v2304_v4 }
 0x98d   : > { %v5548_v30 = vpop.f32.mrb[12].mxu0 }
 0x98e   : > { %v5982_v62 = vadd.f32 %v7290_v13, %v5548_v30  ;;  %v2379_v52 = vpop.f32.mrb[13].mxu0 }
 0x98f   : > { %v5983_v53 = vadd.f32 %v7290_v13, %v2379_v52 }
 0x990   : > { %6225 = vtanh.f32 %v5982_v62 }
 0x991   : > { %6227 = vtanh.f32 %v5983_v53  ;;  %v5064_v51 = vmul.f32 -1.442695, %v5983_v53 }
 0x996   : > { %v5534_v57 = vpop.f32.mrb[8].mxu1 }
 0x997   : > { %v2188_v6 = vadd.f32 %v5534_v57, %v7009_v33  ;;  %v2182_v54 = vpop.f32.mrb[9].mxu1 }
 0x998   : > { %v2183_v58 = vadd.f32 %v7009_v33, %v2182_v54 }
 0x999   : > { %6229 = vtanh.f32 %v2188_v6  ;;  %v5057_v24 = vmul.f32 -1.442695, %v2188_v6 }
 0x99a   : > { %v6226_v14 = vpop.eup %6225  ;;  %6231 = vtanh.f32 %v2183_v58  ;;  %v5056_v0 = vmul.f32 -1.442695, %v2183_v58 }
 0x99b   : > { %2440 = vrot.lane.b32.xlu1 %v6226_v14, %s6606_s20  ;;  %v6228_v61 = vpop.eup %6227 }
 0x99f   : > { %2438 = vrot.lane.b32.xlu1 %v6228_v61, %s6606_s20 }
 0x9a3   : > { %v6230_v1 = vpop.eup %6229 }
 0x9a4   : > { %2239 = vrot.lane.b32.xlu0 %v6230_v1, %s6606_s20  ;;  %v6232_v7 = vpop.eup %6231 }
 0x9a8   : > { %2237 = vrot.lane.b32.xlu0 %v6232_v7, %s6606_s20 }
 0x9a9   : > { %v5537_v18 = vpop.f32.mrb[10].mxu1 }
 0x9aa   : > { %v2192_v11 = vpop.f32.mrb[11].mxu1  ;;  %v2198_v56 = vadd.f32 %v5537_v18, %v7009_v33 }
 0x9ab   : > { %v2193_v22 = vadd.f32 %v7009_v33, %v2192_v11  ;;  %v5551_v55 = vpop.f32.mrb[14].mxu0  ;;  %v5065_v33 = vmul.f32 -1.442695, %v5982_v62 }
 0x9ac   : > { %v2389_v15 = vpop.f32.mrb[15].mxu0  ;;  %v5984_v50 = vadd.f32 %v7290_v13, %v5551_v55  ;;  %v5059_v45 = vmul.f32 -1.442695, %v2198_v56 }
 0x9ad   : > { %6233 = vtanh.f32 %v2193_v22  ;;  %v5985_v17 = vadd.f32 %v7290_v13, %v2389_v15  ;;  %v5058_v38 = vmul.f32 -1.442695, %v2193_v22 }
 0x9ae   : > { %6235 = vtanh.f32 %v2198_v56  ;;  %v5067_v4 = vmul.f32 -1.442695, %v5984_v50 }
 0x9af   : > { %6237 = vtanh.f32 %v5985_v17  ;;  %v5066_v26 = vmul.f32 -1.442695, %v5985_v17 }
 0x9b0   : > { %6239 = vtanh.f32 %v5984_v50 }
 0x9b1   : > { %6241 = vpow2.f32 %v5065_v33 }
 0x9b2   : > { %6243 = vpow2.f32 %v5064_v51 }
 0x9b3   : > { %6245 = vpow2.f32 %v5057_v24 }
 0x9b4   : > { %6247 = vpow2.f32 %v5056_v0 }
 0x9b7   : > { %v6234_v19 = vpop.eup %6233 }
 0x9b8   : > { %2241 = vrot.lane.b32.xlu0 %v6234_v19, %s6606_s20  ;;  %v6236_v20 = vpop.eup %6235 }
 0x9b9   : > { %v6238_v21 = vpop.eup %6237 }
 0x9ba   : > { %2442 = vrot.lane.b32.xlu1 %v6238_v21, %s6606_s20  ;;  %v6240_v23 = vpop.eup %6239 }
 0x9bb   : > { %v6242_v27 = vpop.eup %6241 }
 0x9bc   : > { %2243 = vrot.lane.b32.xlu0 %v6236_v20, %s6606_s20  ;;  %v2415_v28 = vadd.f32 1.0, %v6242_v27  ;;  %v6244_v3 = vpop.eup %6243 }
 0x9bd   : > { %v2414_v31 = vadd.f32 1.0, %v6244_v3  ;;  %v6246_v59 = vpop.eup %6245 }
 0x9be   : > { %2444 = vrot.lane.b32.xlu1 %v6240_v23, %s6606_s20  ;;  %6249 = vrcp.f32 %v2415_v28  ;;  %v2214_v16 = vadd.f32 1.0, %v6246_v59  ;;  %v6248_v29 = vpop.eup %6247 }
 0x9bf   : > { %6251 = vrcp.f32 %v2414_v31  ;;  %v2213_v35 = vadd.f32 1.0, %v6248_v29 }
 0x9c0   : > { %6253 = vrcp.f32 %v2214_v16 }
 0x9c1   : > { %6255 = vrcp.f32 %v2213_v35 }
 0x9c2   : > { %6257 = vpow2.f32 %v5058_v38 }
 0x9c3   : > { %6259 = vpow2.f32 %v5059_v45 }
 0x9c4   : > { %6261 = vpow2.f32 %v5066_v26 }
 0x9c5   : > { %6263 = vpow2.f32 %v5067_v4 }
 0x9c8   : > { %v7308_v25 = vpop.eup %6249 }
 0x9c9   : > { %v7312_v39 = vpop.eup %6251  ;;  %v2431_v23 = vmul.f32 %v7308_v25, %v7197_v46 }
 0x9ca   : > { %v7316_v9 = vpop.eup %6253  ;;  %v2430_v24 = vmul.f32 %v7312_v39, %v7204_v48 }
 0x9cb   : > { %v7320_v30 = vpop.eup %6255  ;;  %v2230_v28 = vmul.f32 %v7316_v9, %v7206_v49 }
 0x9cc   : > { %v6258_v53 = vpop.eup %6257  ;;  %v2229_v46 = vmul.f32 %v7320_v30, %v7212_v47 }
 0x9cd   : > { %v2215_v57 = vadd.f32 1.0, %v6258_v53  ;;  %v6260_v6 = vpop.eup %6259 }
 0x9ce   : > { %v6262_v54 = vpop.eup %6261  ;;  %v2216_v58 = vadd.f32 1.0, %v6260_v6 }
 0x9cf   : > { %6265 = vrcp.f32 %v2215_v57  ;;  %v2416_v14 = vadd.f32 1.0, %v6262_v54  ;;  %v6264_v61 = vpop.eup %6263 }
 0x9d0   : > { %6267 = vrcp.f32 %v2216_v58  ;;  %v2417_v1 = vadd.f32 1.0, %v6264_v61 }
 0x9d1   : > { %6269 = vrcp.f32 %v2416_v14 }
 0x9d2   : > { %6271 = vrcp.f32 %v2417_v1 }
 0x9d9   : > { %v7324_v7 = vpop.eup %6265 }
 0x9da   : > { %v7328_v22 = vpop.eup %6267  ;;  %v2231_v47 = vmul.f32 %v7324_v7, %v7220_v43 }
 0x9db   : > { %v7331_v56 = vpop.eup %6269  ;;  %v2232_v38 = vmul.f32 %v7328_v22, %v7226_v60 }
 0x9dc   : > { %v7336_v19 = vpop.eup %6271 }
 0x9dd   : > { %v2433_v43 = vmul.f32 %v7336_v19, %v7236_v10 }
 0xa0d   : > { %v2441_v34 = vpop.permute.xlu1 %2440 }
 0xa0e   : > { %v2451_v37 = vmul.f32 %v7308_v25, %v2441_v34 }
 0xa10   : > { %2460 = vrot.lane.b32.xlu1 %v2451_v37, %s6607_s22 }
 0xa11   : > { %v2439_v41 = vpop.permute.xlu1 %2438 }
 0xa12   : > { %v2450_v44 = vmul.f32 %v7312_v39, %v2439_v41 }
 0xa14   : > { %2458 = vrot.lane.b32.xlu1 %v2450_v44, %s6607_s22  ;;  %v2432_v44 = vmul.f32 %v7331_v56, %v7231_v63 }
 0xa16   : > { %v2240_v32 = vpop.permute.xlu0 %2239 }
 0xa17   : > { %v2250_v40 = vmul.f32 %v7316_v9, %v2240_v32 }
 0xa19   : > { %2259 = vrot.lane.b32.xlu0 %v2250_v40, %s6607_s22 }
 0xa1a   : > { %v2238_v62 = vpop.permute.xlu0 %2237 }
 0xa1b   : > { %v2249_v52 = vmul.f32 %v7320_v30, %v2238_v62 }
 0xa1d   : > { %2257 = vrot.lane.b32.xlu0 %v2249_v52, %s6607_s22 }
 0xa2a   : > { %v2242_v18 = vpop.permute.xlu0 %2241 }
 0xa2b   : > { %v2251_v11 = vmul.f32 %v7324_v7, %v2242_v18 }
 0xa2c   : > { %v2443_v17 = vpop.permute.xlu1 %2442 }
 0xa2d   : > { %2261 = vrot.lane.b32.xlu0 %v2251_v11, %s6607_s22  ;;  %v2452_v50 = vmul.f32 %v7331_v56, %v2443_v17 }
 0xa2e   : > { %v2244_v55 = vpop.permute.xlu0 %2243 }
 0xa2f   : > { %v2252_v15 = vmul.f32 %v7328_v22, %v2244_v55  ;;  %2462 = vrot.lane.b32.xlu1 %v2452_v50, %s6607_s22 }
 0xa30   : > { %v2445_v20 = vpop.permute.xlu1 %2444 }
 0xa31   : > { %2263 = vrot.lane.b32.xlu0 %v2252_v15, %s6607_s22  ;;  %v2453_v21 = vmul.f32 %v7336_v19, %v2445_v20 }
 0xa33   : > { %2464 = vrot.lane.b32.xlu1 %v2453_v21, %s6607_s22 }
 0xa82   : > { %v2461_v33 = vpop.permute.xlu1 %2460 }
 0xa83   : > { %v7342_v51 = vadd.f32 %v2461_v33, %v2431_v23 }
 0xa85   : > { %6273 = vtanh.f32 %v7342_v51 }
 0xa86   : > { %v2459_v0 = vpop.permute.xlu1 %2458 }
 0xa87   : > { %v7347_v27 = vadd.f32 %v2459_v0, %v2430_v24 }
 0xa89   : > { %6275 = vtanh.f32 %v7347_v27 }
 0xa8b   : > { %v2260_v3 = vpop.permute.xlu0 %2259 }
 0xa8c   : > { %v7352_v31 = vadd.f32 %v2260_v3, %v2230_v28 }
 0xa8e   : > { %6277 = vtanh.f32 %v7352_v31 }
 0xa8f   : > { %v6274_v59 = vpop.eup %6273  ;;  %v2258_v16 = vpop.permute.xlu0 %2257 }
 0xa90   : > { %v7357_v29 = vadd.f32 %v2258_v16, %v2229_v46  ;;  %2484 = vrot.lane.b32.xlu1 %v6274_v59, %s6606_s20 }
 0xa92   : > { %6279 = vtanh.f32 %v7357_v29 }
 0xa93   : > { %v6276_v48 = vpop.eup %6275 }
 0xa94   : > { %2482 = vrot.lane.b32.xlu1 %v6276_v48, %s6606_s20 }
 0xa98   : > { %v6278_v49 = vpop.eup %6277 }
 0xa99   : > { %2283 = vrot.lane.b32.xlu0 %v6278_v49, %s6606_s20 }
 0xa9c   : > { %v6280_v35 = vpop.eup %6279 }
 0xa9d   : > { %2281 = vrot.lane.b32.xlu0 %v6280_v35, %s6606_s20 }
 0xa9f   : > { %v2262_v34 = vpop.permute.xlu0 %2261 }
 0xaa0   : > { %v7366_v37 = vadd.f32 %v2262_v34, %v2231_v47  ;;  %v7437_v47 = vld [vmem:[%s8093_s6] ss:$0 sm:$0xff] }
 0xaa1   : > { %v2463_v26 = vpop.permute.xlu1 %2462 }
 0xaa2   : > { %6281 = vtanh.f32 %v7366_v37  ;;  %v7375_v32 = vadd.f32 %v2463_v26, %v2432_v44 }
 0xaa3   : > { %v2264_v41 = vpop.permute.xlu0 %2263 }
 0xaa4   : > { %v7373_v45 = vadd.f32 %v2264_v41, %v2232_v38 }
 0xaa5   : > { %v2465_v40 = vpop.permute.xlu1 %2464 }
 0xaa6   : > { %6283 = vtanh.f32 %v7373_v45  ;;  %v7381_v4 = vadd.f32 %v2465_v40, %v2433_v43 }
 0xaa7   : > { %6285 = vtanh.f32 %v7375_v32 }
 0xaa8   : > { %6287 = vtanh.f32 %v7381_v4 }
 0xaac   : > { %v6282_v60 = vpop.eup %6281 }
 0xaad   : > { %2285 = vrot.lane.b32.xlu0 %v6282_v60, %s6606_s20 }
 0xab0   : > { %v6284_v63 = vpop.eup %6283 }
 0xab1   : > { %2287 = vrot.lane.b32.xlu0 %v6284_v63, %s6606_s20  ;;  %v6286_v62 = vpop.eup %6285 }
 0xab2   : > { %2486 = vrot.lane.b32.xlu1 %v6286_v62, %s6606_s20  ;;  %v6288_v52 = vpop.eup %6287 }
 0xab6   : > { %2488 = vrot.lane.b32.xlu1 %v6288_v52, %s6606_s20 }
 0xb02   : > { %v2485_v53 = vpop.permute.xlu1 %2484 }
 0xb03   : > { %v2495_v10 = vmul.f32 %v7308_v25, %v2485_v53 }
 0xb05   : > { %2520 = vrot.lane.b32.xlu1 %v2495_v10, %s6606_s20 }
 0xb06   : > { %v2483_v57 = vpop.permute.xlu1 %2482 }
 0xb07   : > { %v2494_v6 = vmul.f32 %v7312_v39, %v2483_v57 }
 0xb09   : > { %2729 = vrot.lane.b32.xlu1 %v2495_v10, %s6607_s22  ;;  %2727 = vrot.lane.b32.xlu0 %v2494_v6, %s6607_s22 }
 0xb0b   : > { %v2284_v54 = vpop.permute.xlu0 %2283 }
 0xb0c   : > { %v2294_v58 = vmul.f32 %v7316_v9, %v2284_v54 }
 0xb0d   : > { %2518 = vrot.lane.b32.xlu1 %v2494_v6, %s6606_s20 }
 0xb0e   : > { %2504 = vrot.lane.b32.xlu0 %v2294_v58, %s6607_s22 }
 0xb0f   : > { %v2282_v14 = vpop.permute.xlu0 %2281 }
 0xb10   : > { %v2293_v61 = vmul.f32 %v7320_v30, %v2282_v14 }
 0xb12   : > { %2502 = vrot.lane.b32.xlu0 %v2293_v61, %s6607_s22 }
 0xb1f   : > { %v2286_v25 = vpop.permute.xlu0 %2285 }
 0xb20   : > { %v2295_v11 = vmul.f32 %v7324_v7, %v2286_v25 }
 0xb23   : > { %v2288_v1 = vpop.permute.xlu0 %2287 }
 0xb24   : > { %v2296_v39 = vmul.f32 %v7328_v22, %v2288_v1  ;;  %v2487_v18 = vpop.permute.xlu1 %2486 }
 0xb25   : > { %v2496_v15 = vmul.f32 %v7331_v56, %v2487_v18 }
 0xb26   : > { %2508 = vrot.lane.b32.xlu0 %v2296_v39, %s6607_s22 }
 0xb28   : > { %v2489_v55 = vpop.permute.xlu1 %2488 }
 0xb29   : > { %v2497_v9 = vmul.f32 %v7336_v19, %v2489_v55 }
 0xb2a   : > { %2506 = vrot.lane.b32.xlu0 %v2295_v11, %s6607_s22 }
 0xb2b   : > { %2524 = vrot.lane.b32.xlu1 %v2497_v9, %s6606_s20 }
 0xb2e   : > { %2731 = vrot.lane.b32.xlu0 %v2496_v15, %s6607_s22 }
 0xb2f   : > { %2522 = vrot.lane.b32.xlu1 %v2496_v15, %s6606_s20 }
 0xb33   : > { %2733 = vrot.lane.b32.xlu1 %v2497_v9, %s6607_s22 }
 0xb77   : > { %v2521_v30 = vpop.permute.xlu1 %2520 }
 0xb7b   : > { %v2730_v22 = vpop.permute.xlu1 %2729  ;;  %v2728_v17 = vpop.permute.xlu0 %2727 }
 0xb7c   : > { %5582 = vmatprep.mubr.msk.f32.mxu0 %vm1034_vm1, %v2728_v17 }
 0xb7d   : > { %5583 = vmatmul.mubr.msk.f32.vlgmr.msra.gmra.mrb[16].mxu0 %vm1034_vm1, %v2730_v22 }
 0xb7e   : > { %5883 = vmatpush3.bf16.msra.mxu0 %v6800_v36 }
 0xb7f   : > { %5885 = vmatprep.subr.bf16.mxu0 %v6814_v42  ;;  %v2519_v56 = vpop.permute.xlu1 %2518 }
 0xb80   : > { %v2505_v7 = vpop.permute.xlu0 %2504 }
 0xb81   : > { %v2531_v20 = vsel %vm1034_vm1, %v2505_v7, %v2521_v30 }
 0xb82   : > { %5887 = vmatpush3.bf16.msra.mxu0 %v6814_v42 }
 0xb83   : > { %5905 = vmatprep.subr.bf16.mxu0 %v6800_v36 }
 0xb84   : > { %v2503_v50 = vpop.permute.xlu0 %2502 }
 0xb85   : > { %v2530_v19 = vsel %vm1034_vm1, %v2503_v50, %v2519_v56 }
 0xb86   : > { %5568 = vmatprep.mubr.msk.f32.mxu1 %vm1243_vm2, %v2530_v19 }
 0xb87   : > { %5569 = vmatmul.mubr.msk.f32.vlgmr.msra.gmra.mrb[12].mxu1 %vm1243_vm2, %v2531_v20 }
 0xb88   : > { %5867 = vmatpush3.bf16.msra.mxu1 %v6938_v2 }
 0xb89   : > { %5869 = vmatprep.subr.bf16.mxu1 %v6943_v5 }
 0xb8c   : > { %5871 = vmatpush3.bf16.msra.mxu1 %v6943_v5 }
 0xb8d   : > { %5873 = vmatprep.subr.bf16.mxu1 %v6955_v8 }
 0xb90   : > { %5875 = vmatpush3.bf16.msra.mxu1 %v6955_v8 }
 0xb91   : > { %5877 = vmatprep.subr.bf16.mxu1 %v6966_v12 }
 0xb94   : > { %5879 = vmatpush3.bf16.msra.mxu1 %v6966_v12 }
 0xb95   : > { %5889 = vmatprep.subr.bf16.mxu1 %v6938_v2 }
 0xb98   : > { %v2509_v21 = vpop.permute.xlu0 %2508 }
 0xb9c   : > { %v2507_v23 = vpop.permute.xlu0 %2506 }
 0xb9d   : > { %v2525_v33 = vpop.permute.xlu1 %2524 }
 0xb9e   : > { %v2533_v3 = vsel %vm1034_vm1, %v2509_v21, %v2525_v33 }
 0xba0   : > { %v2732_v24 = vpop.permute.xlu0 %2731 }
 0xba1   : > { %5585 = vmatprep.mubr.msk.f32.mxu0 %vm1034_vm1, %v2732_v24  ;;  %v2523_v0 = vpop.permute.xlu1 %2522 }
 0xba2   : > { %v2532_v28 = vsel %vm1034_vm1, %v2507_v23, %v2523_v0 }
 0xba3   : > { %5571 = vmatprep.mubr.msk.f32.mxu1 %vm1243_vm2, %v2532_v28 }
 0xba4   : > { %5572 = vmatmul.mubr.msk.f32.gmra.mrb[14].mxu1 %vm1243_vm2, %v2533_v3 }
 0xba5   : > { %v2734_v46 = vpop.permute.xlu1 %2733 }
 0xba6   : > { %5586 = vmatmul.mubr.msk.f32.gmra.mrb[18].mxu0 %vm1034_vm1, %v2734_v46 }
 0xc50   : > { %v5584_v59 = vpop.f32.mrb[16].mxu0 }
 0xc51   : > { %v5986_v16 = vadd.f32 %v7290_v13, %v5584_v59  ;;  %v2809_v48 = vpop.f32.mrb[17].mxu0 }
 0xc52   : > { %v5987_v49 = vadd.f32 %v7290_v13, %v2809_v48 }
 0xc53   : > { %6289 = vtanh.f32 %v5986_v16  ;;  %v5081_v25 = vmul.f32 -1.442695, %v5986_v16 }
 0xc54   : > { %6291 = vtanh.f32 %v5987_v49  ;;  %v5080_v1 = vmul.f32 -1.442695, %v5987_v49 }
 0xc5a   : > { %v5570_v35 = vpop.f32.mrb[12].mxu1 }
 0xc5b   : > { %v2618_v34 = vadd.f32 %v7437_v47, %v5570_v35  ;;  %v2612_v38 = vpop.f32.mrb[13].mxu1 }
 0xc5c   : > { %v2613_v44 = vadd.f32 %v7437_v47, %v2612_v38 }
 0xc5d   : > { %v6290_v41 = vpop.eup %6289  ;;  %6293 = vtanh.f32 %v2618_v34  ;;  %v5073_v39 = vmul.f32 -1.442695, %v2618_v34 }
 0xc5e   : > { %2870 = vrot.lane.b32.xlu1 %v6290_v41, %s6606_s20  ;;  %v6292_v26 = vpop.eup %6291  ;;  %6295 = vtanh.f32 %v2613_v44  ;;  %v5072_v11 = vmul.f32 -1.442695, %v2613_v44 }
 0xc62   : > { %2868 = vrot.lane.b32.xlu1 %v6292_v26, %s6606_s20 }
 0xc67   : > { %v6294_v43 = vpop.eup %6293 }
 0xc68   : > { %2669 = vrot.lane.b32.xlu0 %v6294_v43, %s6606_s20  ;;  %v6296_v40 = vpop.eup %6295 }
 0xc6c   : > { %2667 = vrot.lane.b32.xlu0 %v6296_v40, %s6606_s20 }
 0xc77   : > { %v5573_v60 = vpop.f32.mrb[14].mxu1 }
 0xc78   : > { %v2622_v63 = vpop.f32.mrb[15].mxu1  ;;  %v2628_v10 = vadd.f32 %v7437_v47, %v5573_v60 }
 0xc79   : > { %v2623_v62 = vadd.f32 %v7437_v47, %v2622_v63  ;;  %v5587_v52 = vpop.f32.mrb[18].mxu0 }
 0xc7a   : > { %v2819_v53 = vpop.f32.mrb[19].mxu0  ;;  %v5988_v6 = vadd.f32 %v7290_v13, %v5587_v52  ;;  %v5075_v16 = vmul.f32 -1.442695, %v2628_v10 }
 0xc7b   : > { %6297 = vtanh.f32 %v2623_v62  ;;  %v5989_v57 = vadd.f32 %v7290_v13, %v2819_v53  ;;  %v5074_v3 = vmul.f32 -1.442695, %v2623_v62 }
 0xc7c   : > { %6299 = vtanh.f32 %v2628_v10  ;;  %v5083_v49 = vmul.f32 -1.442695, %v5988_v6 }
 0xc7d   : > { %6301 = vtanh.f32 %v5989_v57  ;;  %v5082_v48 = vmul.f32 -1.442695, %v5989_v57 }
 0xc7e   : > { %6303 = vtanh.f32 %v5988_v6 }
 0xc7f   : > { %6305 = vpow2.f32 %v5081_v25 }
 0xc80   : > { %6307 = vpow2.f32 %v5080_v1 }
 0xc81   : > { %6309 = vpow2.f32 %v5073_v39 }
 0xc82   : > { %6311 = vpow2.f32 %v5072_v11 }
 0xc85   : > { %v6298_v54 = vpop.eup %6297 }
 0xc86   : > { %2671 = vrot.lane.b32.xlu0 %v6298_v54, %s6606_s20  ;;  %v6300_v58 = vpop.eup %6299 }
 0xc87   : > { %v6302_v14 = vpop.eup %6301 }
 0xc88   : > { %2872 = vrot.lane.b32.xlu1 %v6302_v14, %s6606_s20  ;;  %v6304_v61 = vpop.eup %6303 }
 0xc89   : > { %v6306_v18 = vpop.eup %6305 }
 0xc8a   : > { %2673 = vrot.lane.b32.xlu0 %v6300_v58, %s6606_s20  ;;  %v2845_v55 = vadd.f32 1.0, %v6306_v18  ;;  %v6308_v9 = vpop.eup %6307 }
 0xc8b   : > { %v2844_v15 = vadd.f32 1.0, %v6308_v9  ;;  %v6310_v30 = vpop.eup %6309 }
 0xc8c   : > { %2874 = vrot.lane.b32.xlu1 %v6304_v61, %s6606_s20  ;;  %6313 = vrcp.f32 %v2845_v55  ;;  %v2644_v22 = vadd.f32 1.0, %v6310_v30  ;;  %v6312_v17 = vpop.eup %6311 }
 0xc8d   : > { %6315 = vrcp.f32 %v2844_v15  ;;  %v2643_v56 = vadd.f32 1.0, %v6312_v17 }
 0xc8e   : > { %6317 = vrcp.f32 %v2644_v22 }
 0xc8f   : > { %6319 = vrcp.f32 %v2643_v56 }
 0xc90   : > { %6321 = vpow2.f32 %v5074_v3 }
 0xc91   : > { %6323 = vpow2.f32 %v5075_v16 }
 0xc92   : > { %6325 = vpow2.f32 %v5082_v48 }
 0xc93   : > { %6327 = vpow2.f32 %v5083_v49 }
 0xc96   : > { %v7453_v7 = vpop.eup %6313 }
 0xc97   : > { %v7457_v20 = vpop.eup %6315  ;;  %v2861_v25 = vmul.f32 %v7453_v7, %v7342_v51 }
 0xc98   : > { %v7461_v33 = vpop.eup %6317  ;;  %v2860_v18 = vmul.f32 %v7457_v20, %v7347_v27 }
 0xc99   : > { %v7465_v28 = vpop.eup %6319  ;;  %v2660_v9 = vmul.f32 %v7461_v33, %v7352_v31 }
 0xc9a   : > { %v6322_v35 = vpop.eup %6321  ;;  %v2659_v22 = vmul.f32 %v7465_v28, %v7357_v29 }
 0xc9b   : > { %v2645_v34 = vadd.f32 1.0, %v6322_v35  ;;  %v6324_v38 = vpop.eup %6323 }
 0xc9c   : > { %v6326_v41 = vpop.eup %6325  ;;  %v2646_v44 = vadd.f32 1.0, %v6324_v38 }
 0xc9d   : > { %6329 = vrcp.f32 %v2645_v34  ;;  %v2846_v26 = vadd.f32 1.0, %v6326_v41  ;;  %v6328_v43 = vpop.eup %6327 }
 0xc9e   : > { %6331 = vrcp.f32 %v2646_v44  ;;  %v2847_v40 = vadd.f32 1.0, %v6328_v43 }
 0xc9f   : > { %6333 = vrcp.f32 %v2846_v26 }
 0xca0   : > { %6335 = vrcp.f32 %v2847_v40 }
 0xca7   : > { %v7469_v60 = vpop.eup %6329 }
 0xca8   : > { %v7473_v52 = vpop.eup %6331 }
 0xca9   : > { %v7476_v57 = vpop.eup %6333 }
 0xcaa   : > { %v7481_v58 = vpop.eup %6335 }
 0xcd0   : > { %v2871_v50 = vpop.permute.xlu1 %2870 }
 0xcd1   : > { %v2881_v19 = vmul.f32 %v7453_v7, %v2871_v50 }
 0xcd3   : > { %2890 = vrot.lane.b32.xlu1 %v2881_v19, %s6607_s22  ;;  %v2661_v19 = vmul.f32 %v7469_v60, %v7366_v37  ;;  %v2863_v37 = vmul.f32 %v7481_v58, %v7381_v4 }
 0xcd4   : > { %v2869_v21 = vpop.permute.xlu1 %2868 }
 0xcd5   : > { %v2880_v23 = vmul.f32 %v7457_v20, %v2869_v21 }
 0xcd7   : > { %2888 = vrot.lane.b32.xlu1 %v2880_v23, %s6607_s22  ;;  %v2662_v23 = vmul.f32 %v7473_v52, %v7373_v45 }
 0xcda   : > { %v2670_v24 = vpop.permute.xlu0 %2669 }
 0xcdb   : > { %v2680_v0 = vmul.f32 %v7461_v33, %v2670_v24 }
 0xcdd   : > { %2689 = vrot.lane.b32.xlu0 %v2680_v0, %s6607_s22  ;;  %v2862_v0 = vmul.f32 %v7476_v57, %v7375_v32 }
 0xcde   : > { %v2668_v46 = vpop.permute.xlu0 %2667 }
 0xcdf   : > { %v2679_v59 = vmul.f32 %v7465_v28, %v2668_v46 }
 0xce1   : > { %2687 = vrot.lane.b32.xlu0 %v2679_v59, %s6607_s22 }
 0xcf8   : > { %v2672_v63 = vpop.permute.xlu0 %2671 }
 0xcf9   : > { %v2681_v62 = vmul.f32 %v7469_v60, %v2672_v63 }
 0xcfa   : > { %v2873_v6 = vpop.permute.xlu1 %2872 }
 0xcfb   : > { %2691 = vrot.lane.b32.xlu0 %v2681_v62, %s6607_s22  ;;  %v2882_v54 = vmul.f32 %v7476_v57, %v2873_v6 }
 0xcfc   : > { %v2674_v53 = vpop.permute.xlu0 %2673 }
 0xcfd   : > { %v2682_v10 = vmul.f32 %v7473_v52, %v2674_v53  ;;  %2892 = vrot.lane.b32.xlu1 %v2882_v54, %s6607_s22 }
 0xcfe   : > { %v2875_v14 = vpop.permute.xlu1 %2874 }
 0xcff   : > { %2693 = vrot.lane.b32.xlu0 %v2682_v10, %s6607_s22  ;;  %v2883_v61 = vmul.f32 %v7481_v58, %v2875_v14 }
 0xd01   : > { %2894 = vrot.lane.b32.xlu1 %v2883_v61, %s6607_s22 }
 0xd45   : > { %v2891_v1 = vpop.permute.xlu1 %2890 }
 0xd46   : > { %v7487_v39 = vadd.f32 %v2891_v1, %v2861_v25 }
 0xd48   : > { %6337 = vtanh.f32 %v7487_v39 }
 0xd49   : > { %v2889_v11 = vpop.permute.xlu1 %2888 }
 0xd4a   : > { %v7492_v55 = vadd.f32 %v2889_v11, %v2860_v18 }
 0xd4c   : > { %6339 = vtanh.f32 %v7492_v55 }
 0xd4f   : > { %v2690_v15 = vpop.permute.xlu0 %2689 }
 0xd50   : > { %v7497_v30 = vadd.f32 %v2690_v15, %v2660_v9 }
 0xd52   : > { %v6338_v51 = vpop.eup %6337  ;;  %6341 = vtanh.f32 %v7497_v30 }
 0xd53   : > { %2914 = vrot.lane.b32.xlu1 %v6338_v51, %s6606_s20  ;;  %v2688_v27 = vpop.permute.xlu0 %2687 }
 0xd54   : > { %v7503_v17 = vadd.f32 %v2688_v27, %v2659_v22 }
 0xd56   : > { %v6340_v56 = vpop.eup %6339  ;;  %6343 = vtanh.f32 %v7503_v17 }
 0xd57   : > { %2912 = vrot.lane.b32.xlu1 %v6340_v56, %s6606_s20 }
 0xd5c   : > { %v6342_v31 = vpop.eup %6341 }
 0xd5d   : > { %2713 = vrot.lane.b32.xlu0 %v6342_v31, %s6606_s20 }
 0xd60   : > { %v6344_v50 = vpop.eup %6343 }
 0xd61   : > { %2711 = vrot.lane.b32.xlu0 %v6344_v50, %s6606_s20 }
 0xd6d   : > { %v2692_v29 = vpop.permute.xlu0 %2691 }
 0xd6e   : > { %v7511_v21 = vadd.f32 %v2692_v29, %v2661_v19 }
 0xd6f   : > { %v2893_v46 = vpop.permute.xlu1 %2892 }
 0xd70   : > { %6345 = vtanh.f32 %v7511_v21  ;;  %v7520_v59 = vadd.f32 %v2893_v46, %v2862_v0 }
 0xd71   : > { %v2694_v24 = vpop.permute.xlu0 %2693 }
 0xd72   : > { %v7518_v3 = vadd.f32 %v2694_v24, %v2662_v23 }
 0xd73   : > { %v2895_v16 = vpop.permute.xlu1 %2894 }
 0xd74   : > { %6347 = vtanh.f32 %v7518_v3  ;;  %v7526_v48 = vadd.f32 %v2895_v16, %v2863_v37 }
 0xd75   : > { %6349 = vtanh.f32 %v7520_v59 }
 0xd76   : > { %6351 = vtanh.f32 %v7526_v48 }
 0xd7a   : > { %v6346_v45 = vpop.eup %6345 }
 0xd7b   : > { %2715 = vrot.lane.b32.xlu0 %v6346_v45, %s6606_s20 }
 0xd7e   : > { %v6348_v32 = vpop.eup %6347 }
 0xd7f   : > { %2717 = vrot.lane.b32.xlu0 %v6348_v32, %s6606_s20  ;;  %v6350_v49 = vpop.eup %6349 }
 0xd80   : > { %2916 = vrot.lane.b32.xlu1 %v6350_v49, %s6606_s20  ;;  %v6352_v35 = vpop.eup %6351 }
 0xd84   : > { %2918 = vrot.lane.b32.xlu1 %v6352_v35, %s6606_s20 }
 0xdc5   : > { %v2915_v34 = vpop.permute.xlu1 %2914 }
 0xdc6   : > { %v2925_v4 = vmul.f32 %v7453_v7, %v2915_v34 }
 0xdc8   : > { %2950 = vrot.lane.b32.xlu1 %v2925_v4, %s6606_s20 }
 0xdc9   : > { %v2913_v38 = vpop.permute.xlu1 %2912 }
 0xdca   : > { %v2924_v41 = vmul.f32 %v7457_v20, %v2913_v38 }
 0xdcc   : > { %3159 = vrot.lane.b32.xlu1 %v2925_v4, %s6607_s22  ;;  %3157 = vrot.lane.b32.xlu0 %v2924_v41, %s6607_s22 }
 0xdcf   : > { %v2714_v44 = vpop.permute.xlu0 %2713 }
 0xdd0   : > { %v2724_v26 = vmul.f32 %v7461_v33, %v2714_v44  ;;  %2948 = vrot.lane.b32.xlu1 %v2924_v41, %s6606_s20 }
 0xdd2   : > { %2934 = vrot.lane.b32.xlu0 %v2724_v26, %s6607_s22 }
 0xdd3   : > { %v2712_v43 = vpop.permute.xlu0 %2711 }
 0xdd4   : > { %v2723_v40 = vmul.f32 %v7465_v28, %v2712_v43 }
 0xdd6   : > { %2932 = vrot.lane.b32.xlu0 %v2723_v40, %s6607_s22 }
 0xded   : > { %v2716_v7 = vpop.permute.xlu0 %2715 }
 0xdee   : > { %v2725_v53 = vmul.f32 %v7469_v60, %v2716_v7 }
 0xdf1   : > { %v2718_v63 = vpop.permute.xlu0 %2717 }
 0xdf2   : > { %v2726_v20 = vmul.f32 %v7473_v52, %v2718_v63  ;;  %v2917_v62 = vpop.permute.xlu1 %2916 }
 0xdf3   : > { %v2926_v6 = vmul.f32 %v7476_v57, %v2917_v62 }
 0xdf4   : > { %2938 = vrot.lane.b32.xlu0 %v2726_v20, %s6607_s22 }
 0xdf6   : > { %v2919_v10 = vpop.permute.xlu1 %2918 }
 0xdf7   : > { %v2927_v33 = vmul.f32 %v7481_v58, %v2919_v10 }
 0xdf8   : > { %2936 = vrot.lane.b32.xlu0 %v2725_v53, %s6607_s22 }
 0xdf9   : > { %2954 = vrot.lane.b32.xlu1 %v2927_v33, %s6606_s20 }
 0xdfc   : > { %3161 = vrot.lane.b32.xlu0 %v2926_v6, %s6607_s22 }
 0xdfd   : > { %2952 = vrot.lane.b32.xlu1 %v2926_v6, %s6606_s20 }
 0xe01   : > { %3163 = vrot.lane.b32.xlu1 %v2927_v33, %s6607_s22 }
 0xe3a   : > { %v2951_v28 = vpop.permute.xlu1 %2950 }
 0xe3e   : > { %v3160_v52 = vpop.permute.xlu1 %3159  ;;  %v3158_v54 = vpop.permute.xlu0 %3157 }
 0xe3f   : > { %5618 = vmatprep.mubr.msk.f32.mxu0 %vm1034_vm1, %v3158_v54 }
 0xe40   : > { %5619 = vmatmul.mubr.msk.f32.vlgmr.msra.gmra.mrb[20].mxu0 %vm1034_vm1, %v3160_v52 }
 0xe41   : > { %5907 = vmatpush3.bf16.msra.mxu0 %v6800_v36 }
 0xe42   : > { %5909 = vmatprep.subr.bf16.mxu0 %v6814_v42  ;;  %v2949_v57 = vpop.permute.xlu1 %2948 }
 0xe44   : > { %v2935_v60 = vpop.permute.xlu0 %2934 }
 0xe45   : > { %5911 = vmatpush3.bf16.msra.mxu0 %v6814_v42  ;;  %v2961_v61 = vsel %vm1034_vm1, %v2935_v60, %v2951_v28 }
 0xe46   : > { %5929 = vmatprep.subr.bf16.mxu0 %v6800_v36 }
 0xe48   : > { %v2933_v58 = vpop.permute.xlu0 %2932 }
 0xe49   : > { %v2960_v14 = vsel %vm1034_vm1, %v2933_v58, %v2949_v57 }
 0xe4a   : > { %5604 = vmatprep.mubr.msk.f32.mxu1 %vm1243_vm2, %v2960_v14 }
 0xe4b   : > { %5605 = vmatmul.mubr.msk.f32.vlgmr.msra.gmra.mrb[16].mxu1 %vm1243_vm2, %v2961_v61 }
 0xe4c   : > { %5891 = vmatpush3.bf16.msra.mxu1 %v6938_v2 }
 0xe4d   : > { %5893 = vmatprep.subr.bf16.mxu1 %v6943_v5 }
 0xe50   : > { %5895 = vmatpush3.bf16.msra.mxu1 %v6943_v5 }
 0xe51   : > { %5897 = vmatprep.subr.bf16.mxu1 %v6955_v8 }
 0xe54   : > { %5899 = vmatpush3.bf16.msra.mxu1 %v6955_v8 }
 0xe55   : > { %5901 = vmatprep.subr.bf16.mxu1 %v6966_v12 }
 0xe58   : > { %5903 = vmatpush3.bf16.msra.mxu1 %v6966_v12 }
 0xe59   : > { %5913 = vmatprep.subr.bf16.mxu1 %v6938_v2 }
 0xe66   : > { %v2939_v25 = vpop.permute.xlu0 %2938 }
 0xe6a   : > { %v2937_v1 = vpop.permute.xlu0 %2936 }
 0xe6b   : > { %v2955_v18 = vpop.permute.xlu1 %2954 }
 0xe6c   : > { %v2963_v51 = vsel %vm1034_vm1, %v2939_v25, %v2955_v18 }
 0xe6e   : > { %v3162_v11 = vpop.permute.xlu0 %3161 }
 0xe6f   : > { %5621 = vmatprep.mubr.msk.f32.mxu0 %vm1034_vm1, %v3162_v11  ;;  %v2953_v9 = vpop.permute.xlu1 %2952 }
 0xe70   : > { %v2962_v15 = vsel %vm1034_vm1, %v2937_v1, %v2953_v9 }
 0xe71   : > { %5607 = vmatprep.mubr.msk.f32.mxu1 %vm1243_vm2, %v2962_v15 }
 0xe72   : > { %5608 = vmatmul.mubr.msk.f32.gmra.mrb[18].mxu1 %vm1243_vm2, %v2963_v51 }
 0xe73   : > { %v3164_v22 = vpop.permute.xlu1 %3163 }
 0xe74   : > { %5622 = vmatmul.mubr.msk.f32.gmra.mrb[22].mxu0 %vm1034_vm1, %v3164_v22 }
 0xf13   : > { %v5620_v27 = vpop.f32.mrb[20].mxu0 }
 0xf14   : > { %v5990_v56 = vadd.f32 %v7290_v13, %v5620_v27  ;;  %v3239_v31 = vpop.f32.mrb[21].mxu0 }
 0xf15   : > { %v5991_v50 = vadd.f32 %v7290_v13, %v3239_v31 }
 0xf16   : > { %6353 = vtanh.f32 %v5990_v56  ;;  %v5097_v7 = vmul.f32 -1.442695, %v5990_v56 }
 0xf17   : > { %6355 = vtanh.f32 %v5991_v50  ;;  %v5096_v63 = vmul.f32 -1.442695, %v5991_v50 }
 0xf1e   : > { %v5606_v19 = vpop.f32.mrb[16].mxu1 }
 0xf1f   : > { %v3048_v29 = vadd.f32 %v7437_v47, %v5606_v19  ;;  %v3042_v23 = vpop.f32.mrb[17].mxu1 }
 0xf20   : > { %v6354_v24 = vpop.eup %6353  ;;  %v3043_v0 = vadd.f32 %v7437_v47, %v3042_v23 }
 0xf21   : > { %6357 = vtanh.f32 %v3048_v29  ;;  %3300 = vrot.lane.b32.xlu1 %v6354_v24, %s6606_s20  ;;  %v6356_v46 = vpop.eup %6355  ;;  %v5089_v20 = vmul.f32 -1.442695, %v3048_v29 }
 0xf22   : > { %6359 = vtanh.f32 %v3043_v0  ;;  %v5088_v62 = vmul.f32 -1.442695, %v3043_v0 }
 0xf25   : > { %3298 = vrot.lane.b32.xlu1 %v6356_v46, %s6606_s20 }
 0xf2b   : > { %v6358_v37 = vpop.eup %6357 }
 0xf2c   : > { %3099 = vrot.lane.b32.xlu0 %v6358_v37, %s6606_s20  ;;  %v6360_v16 = vpop.eup %6359 }
 0xf30   : > { %3097 = vrot.lane.b32.xlu0 %v6360_v16, %s6606_s20 }
 0xf45   : > { %v5609_v45 = vpop.f32.mrb[18].mxu1 }
 0xf46   : > { %v3052_v32 = vpop.f32.mrb[19].mxu1  ;;  %v3058_v4 = vadd.f32 %v7437_v47, %v5609_v45 }
 0xf47   : > { %v3053_v49 = vadd.f32 %v7437_v47, %v3052_v32  ;;  %v5623_v35 = vpop.f32.mrb[22].mxu0 }
 0xf48   : > { %v3249_v34 = vpop.f32.mrb[23].mxu0  ;;  %v5992_v41 = vadd.f32 %v7290_v13, %v5623_v35  ;;  %v5091_v27 = vmul.f32 -1.442695, %v3058_v4 }
 0xf49   : > { %6361 = vtanh.f32 %v3053_v49  ;;  %v5993_v38 = vadd.f32 %v7290_v13, %v3249_v34  ;;  %v5090_v22 = vmul.f32 -1.442695, %v3053_v49 }
 0xf4a   : > { %6363 = vtanh.f32 %v3058_v4  ;;  %v5099_v31 = vmul.f32 -1.442695, %v5992_v41 }
 0xf4b   : > { %6365 = vtanh.f32 %v5993_v38  ;;  %v5098_v56 = vmul.f32 -1.442695, %v5993_v38 }
 0xf4c   : > { %6367 = vtanh.f32 %v5992_v41 }
 0xf4d   : > { %6369 = vpow2.f32 %v5097_v7 }
 0xf4e   : > { %6371 = vpow2.f32 %v5096_v63 }
 0xf4f   : > { %6373 = vpow2.f32 %v5089_v20 }
 0xf50   : > { %6375 = vpow2.f32 %v5088_v62 }
 0xf53   : > { %v6362_v44 = vpop.eup %6361 }
 0xf54   : > { %3101 = vrot.lane.b32.xlu0 %v6362_v44, %s6606_s20  ;;  %v6364_v26 = vpop.eup %6363 }
 0xf55   : > { %v6366_v43 = vpop.eup %6365 }
 0xf56   : > { %3302 = vrot.lane.b32.xlu1 %v6366_v43, %s6606_s20  ;;  %v6368_v40 = vpop.eup %6367 }
 0xf57   : > { %v6370_v13 = vpop.eup %6369 }
 0xf58   : > { %3103 = vrot.lane.b32.xlu0 %v6364_v26, %s6606_s20  ;;  %v3275_v53 = vadd.f32 1.0, %v6370_v13  ;;  %v6372_v10 = vpop.eup %6371 }
 0xf59   : > { %v3274_v33 = vadd.f32 1.0, %v6372_v10  ;;  %v6374_v6 = vpop.eup %6373 }
 0xf5a   : > { %3304 = vrot.lane.b32.xlu1 %v6368_v40, %s6606_s20  ;;  %6377 = vrcp.f32 %v3275_v53  ;;  %v3074_v28 = vadd.f32 1.0, %v6374_v6  ;;  %v6376_v52 = vpop.eup %6375 }
 0xf5b   : > { %6379 = vrcp.f32 %v3274_v33  ;;  %v3073_v57 = vadd.f32 1.0, %v6376_v52 }
 0xf5c   : > { %6381 = vrcp.f32 %v3074_v28 }
 0xf5d   : > { %6383 = vrcp.f32 %v3073_v57 }
 0xf5e   : > { %6385 = vpow2.f32 %v5090_v22 }
 0xf5f   : > { %6387 = vpow2.f32 %v5091_v27 }
 0xf60   : > { %6389 = vpow2.f32 %v5098_v56 }
 0xf61   : > { %6391 = vpow2.f32 %v5099_v31 }
 0xf64   : > { %v7593_v54 = vpop.eup %6377 }
 0xf65   : > { %v7597_v14 = vpop.eup %6379  ;;  %v3291_v40 = vmul.f32 %v7593_v54, %v7487_v39 }
 0xf66   : > { %v7601_v1 = vpop.eup %6381  ;;  %v3290_v20 = vmul.f32 %v7597_v14, %v7492_v55 }
 0xf67   : > { %v7605_v9 = vpop.eup %6383  ;;  %v3090_v53 = vmul.f32 %v7601_v1, %v7497_v30 }
 0xf68   : > { %v6386_v50 = vpop.eup %6385  ;;  %v3089_v6 = vmul.f32 %v7605_v9, %v7503_v17 }
 0xf69   : > { %v3075_v19 = vadd.f32 1.0, %v6386_v50  ;;  %v6388_v29 = vpop.eup %6387 }
 0xf6a   : > { %v6390_v23 = vpop.eup %6389  ;;  %v3076_v24 = vadd.f32 1.0, %v6388_v29 }
 0xf6b   : > { %6393 = vrcp.f32 %v3075_v19  ;;  %v3276_v0 = vadd.f32 1.0, %v6390_v23  ;;  %v6392_v46 = vpop.eup %6391 }
 0xf6c   : > { %6395 = vrcp.f32 %v3076_v24  ;;  %v3277_v37 = vadd.f32 1.0, %v6392_v46 }
 0xf6d   : > { %6397 = vrcp.f32 %v3276_v0 }
 0xf6e   : > { %6399 = vrcp.f32 %v3277_v37 }
 0xf75   : > { %v7609_v16 = vpop.eup %6393 }
 0xf76   : > { %v7613_v49 = vpop.eup %6395  ;;  %v3091_v57 = vmul.f32 %v7609_v16, %v7511_v21 }
 0xf77   : > { %v7616_v4 = vpop.eup %6397  ;;  %v3092_v17 = vmul.f32 %v7613_v49, %v7518_v3 }
 0xf78   : > { %v7621_v44 = vpop.eup %6399 }
 0xf79   : > { %v3293_v21 = vmul.f32 %v7621_v44, %v7526_v48 }
 0xf93   : > { %v3301_v60 = vpop.permute.xlu1 %3300 }
 0xf94   : > { %v3311_v58 = vmul.f32 %v7593_v54, %v3301_v60 }
 0xf96   : > { %3320 = vrot.lane.b32.xlu1 %v3311_v58, %s6607_s22 }
 0xf97   : > { %v3299_v61 = vpop.permute.xlu1 %3298 }
 0xf98   : > { %v3310_v25 = vmul.f32 %v7597_v14, %v3299_v61 }
 0xf9a   : > { %3318 = vrot.lane.b32.xlu1 %v3310_v25, %s6607_s22 }
 0xf9e   : > { %v3100_v18 = vpop.permute.xlu0 %3099 }
 0xf9f   : > { %v3110_v11 = vmul.f32 %v7601_v1, %v3100_v18  ;;  %v3292_v18 = vmul.f32 %v7616_v4, %v7520_v59 }
 0xfa1   : > { %3119 = vrot.lane.b32.xlu0 %v3110_v11, %s6607_s22 }
 0xfa2   : > { %v3098_v15 = vpop.permute.xlu0 %3097 }
 0xfa3   : > { %v3109_v51 = vmul.f32 %v7605_v9, %v3098_v15 }
 0xfa5   : > { %3117 = vrot.lane.b32.xlu0 %v3109_v51, %s6607_s22 }
 0xfc6   : > { %v3102_v45 = vpop.permute.xlu0 %3101 }
 0xfc7   : > { %v3111_v32 = vmul.f32 %v7609_v16, %v3102_v45 }
 0xfc8   : > { %v3303_v38 = vpop.permute.xlu1 %3302 }
 0xfc9   : > { %3121 = vrot.lane.b32.xlu0 %v3111_v32, %s6607_s22  ;;  %v3312_v41 = vmul.f32 %v7616_v4, %v3303_v38 }
 0xfca   : > { %v3104_v35 = vpop.permute.xlu0 %3103 }
 0xfcb   : > { %v3112_v34 = vmul.f32 %v7613_v49, %v3104_v35  ;;  %3322 = vrot.lane.b32.xlu1 %v3312_v41, %s6607_s22 }
 0xfcc   : > { %v3305_v26 = vpop.permute.xlu1 %3304 }
 0xfcd   : > { %3123 = vrot.lane.b32.xlu0 %v3112_v34, %s6607_s22  ;;  %v3313_v43 = vmul.f32 %v7621_v44, %v3305_v26 }
 0xfcf   : > { %3324 = vrot.lane.b32.xlu1 %v3313_v43, %s6607_s22 }
0x1008   : > { %v3321_v7 = vpop.permute.xlu1 %3320 }
0x1009   : > { %v7627_v63 = vadd.f32 %v3321_v7, %v3291_v40 }
0x100b   : > { %6401 = vtanh.f32 %v7627_v63 }
0x100c   : > { %v3319_v13 = vpop.permute.xlu1 %3318 }
0x100d   : > { %v7632_v62 = vadd.f32 %v3319_v13, %v3290_v20 }
0x100f   : > { %6403 = vtanh.f32 %v7632_v62 }
0x1013   : > { %v3120_v10 = vpop.permute.xlu0 %3119 }
0x1014   : > { %v7637_v33 = vadd.f32 %v3120_v10, %v3090_v53 }
0x1015   : > { %v6402_v39 = vpop.eup %6401 }
0x1016   : > { %6405 = vtanh.f32 %v7637_v33  ;;  %3344 = vrot.lane.b32.xlu1 %v6402_v39, %s6606_s20  ;;  %v7719_v39 = vld [vmem:[%s8091_s4] ss:$0 sm:$0xff] }
0x1017   : > { %v3118_v55 = vpop.permute.xlu0 %3117 }
0x1018   : > { %v7643_v28 = vadd.f32 %v3118_v55, %v3089_v6 }
0x1019   : > { %v6404_v52 = vpop.eup %6403 }
0x101a   : > { %6407 = vtanh.f32 %v7643_v28  ;;  %3342 = vrot.lane.b32.xlu1 %v6404_v52, %s6606_s20 }
0x1020   : > { %v6406_v30 = vpop.eup %6405 }
0x1021   : > { %3143 = vrot.lane.b32.xlu0 %v6406_v30, %s6606_s20 }
0x1024   : > { %v6408_v60 = vpop.eup %6407 }
0x1025   : > { %3141 = vrot.lane.b32.xlu0 %v6408_v60, %s6606_s20 }
0x103b   : > { %v3122_v58 = vpop.permute.xlu0 %3121 }
0x103c   : > { %v7651_v61 = vadd.f32 %v3122_v58, %v3091_v57 }
0x103d   : > { %v3323_v15 = vpop.permute.xlu1 %3322 }
0x103e   : > { %6409 = vtanh.f32 %v7651_v61  ;;  %v7660_v51 = vadd.f32 %v3323_v15, %v3292_v18 }
0x103f   : > { %v3124_v25 = vpop.permute.xlu0 %3123 }
0x1040   : > { %v7658_v11 = vadd.f32 %v3124_v25, %v3092_v17 }
0x1041   : > { %v3325_v22 = vpop.permute.xlu1 %3324 }
0x1042   : > { %6411 = vtanh.f32 %v7658_v11  ;;  %v7666_v27 = vadd.f32 %v3325_v22, %v3293_v21 }
0x1043   : > { %6413 = vtanh.f32 %v7660_v51 }
0x1044   : > { %6415 = vtanh.f32 %v7666_v27 }
0x1048   : > { %v6410_v3 = vpop.eup %6409 }
0x1049   : > { %3145 = vrot.lane.b32.xlu0 %v6410_v3, %s6606_s20 }
0x104c   : > { %v6412_v59 = vpop.eup %6411 }
0x104d   : > { %3147 = vrot.lane.b32.xlu0 %v6412_v59, %s6606_s20  ;;  %v6414_v56 = vpop.eup %6413 }
0x104e   : > { %3346 = vrot.lane.b32.xlu1 %v6414_v56, %s6606_s20  ;;  %v6416_v31 = vpop.eup %6415 }
0x1052   : > { %3348 = vrot.lane.b32.xlu1 %v6416_v31, %s6606_s20 }
0x1088   : > { %v3345_v50 = vpop.permute.xlu1 %3344 }
0x1089   : > { %v3355_v48 = vmul.f32 %v7593_v54, %v3345_v50 }
0x108b   : > { %3380 = vrot.lane.b32.xlu1 %v3355_v48, %s6606_s20 }
0x108c   : > { %v3343_v19 = vpop.permute.xlu1 %3342 }
0x108d   : > { %v3354_v29 = vmul.f32 %v7597_v14, %v3343_v19 }
0x108f   : > { %3589 = vrot.lane.b32.xlu1 %v3355_v48, %s6607_s22  ;;  %3587 = vrot.lane.b32.xlu0 %v3354_v29, %s6607_s22 }
0x1093   : > { %3378 = vrot.lane.b32.xlu1 %v3354_v29, %s6606_s20  ;;  %v3144_v23 = vpop.permute.xlu0 %3143 }
0x1094   : > { %v3154_v24 = vmul.f32 %v7601_v1, %v3144_v23 }
0x1096   : > { %3364 = vrot.lane.b32.xlu0 %v3154_v24, %s6607_s22 }
0x1097   : > { %v3142_v0 = vpop.permute.xlu0 %3141 }
0x1098   : > { %v3153_v46 = vmul.f32 %v7605_v9, %v3142_v0 }
0x109a   : > { %3362 = vrot.lane.b32.xlu0 %v3153_v46, %s6607_s22 }
0x10bb   : > { %v3146_v54 = vpop.permute.xlu0 %3145 }
0x10bc   : > { %v3155_v32 = vmul.f32 %v7609_v16, %v3146_v54 }
0x10bf   : > { %v3148_v37 = vpop.permute.xlu0 %3147 }
0x10c0   : > { %v3156_v14 = vmul.f32 %v7613_v49, %v3148_v37  ;;  %v3347_v45 = vpop.permute.xlu1 %3346 }
0x10c1   : > { %v3356_v1 = vmul.f32 %v7616_v4, %v3347_v45 }
0x10c2   : > { %3368 = vrot.lane.b32.xlu0 %v3156_v14, %s6607_s22 }
0x10c4   : > { %v3349_v35 = vpop.permute.xlu1 %3348 }
0x10c5   : > { %v3357_v34 = vmul.f32 %v7621_v44, %v3349_v35 }
0x10c6   : > { %3366 = vrot.lane.b32.xlu0 %v3155_v32, %s6607_s22 }
0x10c7   : > { %3384 = vrot.lane.b32.xlu1 %v3357_v34, %s6606_s20 }
0x10ca   : > { %3591 = vrot.lane.b32.xlu0 %v3356_v1, %s6607_s22 }
0x10cb   : > { %3382 = vrot.lane.b32.xlu1 %v3356_v1, %s6606_s20 }
0x10cf   : > { %3593 = vrot.lane.b32.xlu1 %v3357_v34, %s6607_s22 }
0x10fd   : > { %v3381_v9 = vpop.permute.xlu1 %3380 }
0x1101   : > { %v3590_v49 = vpop.permute.xlu1 %3589  ;;  %v3588_v38 = vpop.permute.xlu0 %3587 }
0x1102   : > { %5654 = vmatprep.mubr.msk.f32.mxu0 %vm1034_vm1, %v3588_v38 }
0x1103   : > { %5655 = vmatmul.mubr.msk.f32.vlgmr.msra.gmra.mrb[24].mxu0 %vm1034_vm1, %v3590_v49 }
0x1104   : > { %5931 = vmatpush3.bf16.msra.mxu0 %v6800_v36 }
0x1105   : > { %5933 = vmatprep.subr.bf16.mxu0 %v6814_v42  ;;  %v3379_v4 = vpop.permute.xlu1 %3378 }
0x1108   : > { %v3365_v16 = vpop.permute.xlu0 %3364  ;;  %5935 = vmatpush3.bf16.msra.mxu0 %v6814_v42 }
0x1109   : > { %v3391_v26 = vsel %vm1034_vm1, %v3365_v16, %v3381_v9 }
0x110c   : > { %v3363_v41 = vpop.permute.xlu0 %3362 }
0x110d   : > { %v3390_v44 = vsel %vm1034_vm1, %v3363_v41, %v3379_v4 }
0x110e   : > { %5640 = vmatprep.mubr.msk.f32.mxu1 %vm1243_vm2, %v3390_v44 }
0x110f   : > { %5641 = vmatmul.mubr.msk.f32.vlgmr.msra.gmra.mrb[20].mxu1 %vm1243_vm2, %v3391_v26 }
0x1110   : > { %5915 = vmatpush3.bf16.msra.mxu1 %v6938_v2 }
0x1111   : > { %5917 = vmatprep.subr.bf16.mxu1 %v6943_v5 }
0x1114   : > { %5919 = vmatpush3.bf16.msra.mxu1 %v6943_v5 }
0x1115   : > { %5921 = vmatprep.subr.bf16.mxu1 %v6955_v8 }
0x1118   : > { %5923 = vmatpush3.bf16.msra.mxu1 %v6955_v8 }
0x1119   : > { %5925 = vmatprep.subr.bf16.mxu1 %v6966_v12 }
0x111c   : > { %5927 = vmatpush3.bf16.msra.mxu1 %v6966_v12 }
0x111d   : > { %5937 = vmatprep.subr.bf16.mxu1 %v6938_v2 }
0x1134   : > { %v3369_v36 = vpop.permute.xlu0 %3368 }
0x1138   : > { %v3367_v42 = vpop.permute.xlu0 %3366 }
0x1139   : > { %v3385_v43 = vpop.permute.xlu1 %3384 }
0x113a   : > { %v3393_v13 = vsel %vm1034_vm1, %v3369_v36, %v3385_v43 }
0x113c   : > { %v3592_v40 = vpop.permute.xlu0 %3591 }
0x113d   : > { %5657 = vmatprep.mubr.msk.f32.mxu0 %vm1034_vm1, %v3592_v40  ;;  %v3383_v7 = vpop.permute.xlu1 %3382 }
0x113e   : > { %v3392_v20 = vsel %vm1034_vm1, %v3367_v42, %v3383_v7 }
0x113f   : > { %5643 = vmatprep.mubr.msk.f32.mxu1 %vm1243_vm2, %v3392_v20 }
0x1140   : > { %5644 = vmatmul.mubr.msk.f32.gmra.mrb[22].mxu1 %vm1243_vm2, %v3393_v13 }
0x1141   : > { %v3594_v53 = vpop.permute.xlu1 %3593 }
0x1142   : > { %5658 = vmatmul.mubr.msk.f32.gmra.mrb[26].mxu0 %vm1034_vm1, %v3594_v53 }
0x11d6   : > { %v5656_v10 = vpop.f32.mrb[24].mxu0 }
0x11d7   : > { %v5994_v6 = vadd.f32 %v7719_v39, %v5656_v10  ;;  %v3669_v55 = vpop.f32.mrb[25].mxu0 }
0x11d8   : > { %v5995_v52 = vadd.f32 %v7719_v39, %v3669_v55 }
0x11d9   : > { %6417 = vtanh.f32 %v5994_v6 }
0x11da   : > { %6419 = vtanh.f32 %v5995_v52  ;;  %v5112_v0 = vmul.f32 -1.442695, %v5995_v52 }
0x11e2   : > { %v5642_v30 = vpop.f32.mrb[20].mxu1 }
0x11e3   : > { %v6418_v60 = vpop.eup %6417  ;;  %v3478_v57 = vadd.f32 %v7437_v47, %v5642_v30  ;;  %v3472_v58 = vpop.f32.mrb[21].mxu1 }
0x11e4   : > { %3730 = vrot.lane.b32.xlu1 %v6418_v60, %s6606_s20  ;;  %v3473_v17 = vadd.f32 %v7437_v47, %v3472_v58  ;;  %v6420_v25 = vpop.eup %6419 }
0x11e5   : > { %6421 = vtanh.f32 %v3478_v57  ;;  %v5105_v46 = vmul.f32 -1.442695, %v3478_v57 }
0x11e6   : > { %6423 = vtanh.f32 %v3473_v17  ;;  %v5104_v37 = vmul.f32 -1.442695, %v3473_v17 }
0x11e8   : > { %3728 = vrot.lane.b32.xlu1 %v6420_v25, %s6606_s20 }
0x11ef   : > { %v6422_v18 = vpop.eup %6421 }
0x11f0   : > { %3529 = vrot.lane.b32.xlu0 %v6422_v18, %s6606_s20  ;;  %v6424_v15 = vpop.eup %6423 }
0x11f4   : > { %3527 = vrot.lane.b32.xlu0 %v6424_v15, %s6606_s20 }
0x1213   : > { %v5645_v21 = vpop.f32.mrb[22].mxu1 }
0x1214   : > { %v3482_v22 = vpop.f32.mrb[23].mxu1  ;;  %v3488_v31 = vadd.f32 %v7437_v47, %v5645_v21 }
0x1215   : > { %v3483_v3 = vadd.f32 %v7437_v47, %v3482_v22  ;;  %v5659_v59 = vpop.f32.mrb[26].mxu0  ;;  %v5113_v47 = vmul.f32 -1.442695, %v5994_v6 }
0x1216   : > { %v3679_v56 = vpop.f32.mrb[27].mxu0  ;;  %v5996_v48 = vadd.f32 %v7719_v39, %v5659_v59  ;;  %v5107_v13 = vmul.f32 -1.442695, %v3488_v31 }
0x1217   : > { %6425 = vtanh.f32 %v3483_v3  ;;  %v5997_v50 = vadd.f32 %v7719_v39, %v3679_v56  ;;  %v5106_v20 = vmul.f32 -1.442695, %v3483_v3 }
0x1218   : > { %6427 = vtanh.f32 %v3488_v31  ;;  %v5115_v10 = vmul.f32 -1.442695, %v5996_v48 }
0x1219   : > { %6429 = vtanh.f32 %v5997_v50  ;;  %v5114_v53 = vmul.f32 -1.442695, %v5997_v50 }
0x121a   : > { %6431 = vtanh.f32 %v5996_v48 }
0x121b   : > { %6433 = vpow2.f32 %v5113_v47 }
0x121c   : > { %6435 = vpow2.f32 %v5112_v0 }
0x121d   : > { %6437 = vpow2.f32 %v5105_v46 }
0x121e   : > { %6439 = vpow2.f32 %v5104_v37 }
0x1221   : > { %v6426_v19 = vpop.eup %6425 }
0x1222   : > { %3531 = vrot.lane.b32.xlu0 %v6426_v19, %s6606_s20  ;;  %v6428_v29 = vpop.eup %6427 }
0x1223   : > { %v6430_v23 = vpop.eup %6429 }
0x1224   : > { %3732 = vrot.lane.b32.xlu1 %v6430_v23, %s6606_s20  ;;  %v6432_v24 = vpop.eup %6431 }
0x1225   : > { %v6434_v54 = vpop.eup %6433 }
0x1226   : > { %3533 = vrot.lane.b32.xlu0 %v6428_v29, %s6606_s20  ;;  %v3705_v14 = vadd.f32 1.0, %v6434_v54  ;;  %v6436_v45 = vpop.eup %6435 }
0x1227   : > { %v3704_v32 = vadd.f32 1.0, %v6436_v45  ;;  %v6438_v35 = vpop.eup %6437 }
0x1228   : > { %3734 = vrot.lane.b32.xlu1 %v6432_v24, %s6606_s20  ;;  %6441 = vrcp.f32 %v3705_v14  ;;  %v3504_v34 = vadd.f32 1.0, %v6438_v35  ;;  %v6440_v1 = vpop.eup %6439 }
0x1229   : > { %6443 = vrcp.f32 %v3704_v32  ;;  %v3503_v16 = vadd.f32 1.0, %v6440_v1 }
0x122a   : > { %6445 = vrcp.f32 %v3504_v34 }
0x122b   : > { %6447 = vrcp.f32 %v3503_v16 }
0x122c   : > { %6449 = vpow2.f32 %v5106_v20 }
0x122d   : > { %6451 = vpow2.f32 %v5107_v13 }
0x122e   : > { %6453 = vpow2.f32 %v5114_v53 }
0x122f   : > { %6455 = vpow2.f32 %v5115_v10 }
0x1232   : > { %v7737_v9 = vpop.eup %6441 }
0x1233   : > { %v7741_v4 = vpop.eup %6443  ;;  %v3721_v29 = vmul.f32 %v7737_v9, %v7627_v63 }
0x1234   : > { %v7745_v26 = vpop.eup %6445  ;;  %v3720_v47 = vmul.f32 %v7741_v4, %v7632_v62 }
0x1235   : > { %v7749_v43 = vpop.eup %6447  ;;  %v3520_v54 = vmul.f32 %v7745_v26, %v7637_v33 }
0x1236   : > { %v6450_v6 = vpop.eup %6449  ;;  %v3519_v63 = vmul.f32 %v7749_v43, %v7643_v28 }
0x1237   : > { %v3505_v55 = vadd.f32 1.0, %v6450_v6  ;;  %v6452_v52 = vpop.eup %6451 }
0x1238   : > { %v6454_v30 = vpop.eup %6453  ;;  %v3506_v60 = vadd.f32 1.0, %v6452_v52 }
0x1239   : > { %6457 = vrcp.f32 %v3505_v55  ;;  %v3706_v57 = vadd.f32 1.0, %v6454_v30  ;;  %v6456_v58 = vpop.eup %6455 }
0x123a   : > { %6459 = vrcp.f32 %v3506_v60  ;;  %v3707_v17 = vadd.f32 1.0, %v6456_v58 }
0x123b   : > { %6461 = vrcp.f32 %v3706_v57 }
0x123c   : > { %6463 = vrcp.f32 %v3707_v17 }
0x1243   : > { %v7753_v25 = vpop.eup %6457 }
0x1244   : > { %v7757_v21 = vpop.eup %6459  ;;  %v3521_v1 = vmul.f32 %v7753_v25, %v7651_v61 }
0x1245   : > { %v7760_v59 = vpop.eup %6461  ;;  %v3522_v28 = vmul.f32 %v7757_v21, %v7658_v11 }
0x1246   : > { %v7765_v50 = vpop.eup %6463 }
0x1247   : > { %v3723_v61 = vmul.f32 %v7765_v50, %v7666_v27 }
0x1256   : > { %v3731_v49 = vpop.permute.xlu1 %3730 }
0x1257   : > { %v3741_v38 = vmul.f32 %v7737_v9, %v3731_v49 }
0x1259   : > { %3750 = vrot.lane.b32.xlu1 %v3741_v38, %s6607_s22 }
0x125a   : > { %v3729_v41 = vpop.permute.xlu1 %3728 }
0x125b   : > { %v3740_v44 = vmul.f32 %v7741_v4, %v3729_v41  ;;  %v3722_v41 = vmul.f32 %v7760_v59, %v7660_v51 }
0x125d   : > { %3748 = vrot.lane.b32.xlu1 %v3740_v44, %s6607_s22 }
0x1262   : > { %v3530_v36 = vpop.permute.xlu0 %3529 }
0x1263   : > { %v3540_v42 = vmul.f32 %v7745_v26, %v3530_v36 }
0x1265   : > { %3549 = vrot.lane.b32.xlu0 %v3540_v42, %s6607_s22 }
0x1266   : > { %v3528_v40 = vpop.permute.xlu0 %3527 }
0x1267   : > { %v3539_v7 = vmul.f32 %v7749_v43, %v3528_v40 }
0x1269   : > { %3547 = vrot.lane.b32.xlu0 %v3539_v7, %s6607_s22 }
0x1294   : > { %v3532_v18 = vpop.permute.xlu0 %3531 }
0x1295   : > { %v3541_v15 = vmul.f32 %v7753_v25, %v3532_v18 }
0x1296   : > { %v3733_v56 = vpop.permute.xlu1 %3732 }
0x1297   : > { %3551 = vrot.lane.b32.xlu0 %v3541_v15, %s6607_s22  ;;  %v3742_v31 = vmul.f32 %v7760_v59, %v3733_v56 }
0x1298   : > { %v3534_v22 = vpop.permute.xlu0 %3533 }
0x1299   : > { %v3542_v3 = vmul.f32 %v7757_v21, %v3534_v22  ;;  %3752 = vrot.lane.b32.xlu1 %v3742_v31, %s6607_s22 }
0x129a   : > { %v3735_v48 = vpop.permute.xlu1 %3734 }
0x129b   : > { %3553 = vrot.lane.b32.xlu0 %v3542_v3, %s6607_s22  ;;  %v3743_v19 = vmul.f32 %v7765_v50, %v3735_v48 }
0x129d   : > { %3754 = vrot.lane.b32.xlu1 %v3743_v19, %s6607_s22 }
0x12cb   : > { %v3751_v23 = vpop.permute.xlu1 %3750 }
0x12cc   : > { %v7771_v24 = vadd.f32 %v3751_v23, %v3721_v29 }
0x12ce   : > { %6465 = vtanh.f32 %v7771_v24 }
0x12cf   : > { %v3749_v0 = vpop.permute.xlu1 %3748 }
0x12d0   : > { %v7776_v46 = vadd.f32 %v3749_v0, %v3720_v47 }
0x12d2   : > { %6467 = vtanh.f32 %v7776_v46 }
0x12d7   : > { %v3550_v37 = vpop.permute.xlu0 %3549 }
0x12d8   : > { %v6466_v14 = vpop.eup %6465  ;;  %v7781_v45 = vadd.f32 %v3550_v37, %v3520_v54 }
0x12d9   : > { %3774 = vrot.lane.b32.xlu1 %v6466_v14, %s6606_s20 }
0x12da   : > { %6469 = vtanh.f32 %v7781_v45 }
0x12db   : > { %v3548_v62 = vpop.permute.xlu0 %3547 }
0x12dc   : > { %v6468_v32 = vpop.eup %6467  ;;  %v7787_v35 = vadd.f32 %v3548_v62, %v3519_v63  ;;  %v7861_v63 = vld [vmem:[%s8093_s6] ss:$0 sm:$0xff] }
0x12dd   : > { %3772 = vrot.lane.b32.xlu1 %v6468_v32, %s6606_s20 }
0x12de   : > { %6471 = vtanh.f32 %v7787_v35 }
0x12e4   : > { %v6470_v33 = vpop.eup %6469 }
0x12e5   : > { %3573 = vrot.lane.b32.xlu0 %v6470_v33, %s6606_s20 }
0x12e8   : > { %v6472_v34 = vpop.eup %6471 }
0x12e9   : > { %3571 = vrot.lane.b32.xlu0 %v6472_v34, %s6606_s20 }
0x1309   : > { %v3552_v49 = vpop.permute.xlu0 %3551 }
0x130a   : > { %v7795_v38 = vadd.f32 %v3552_v49, %v3521_v1 }
0x130b   : > { %v3753_v36 = vpop.permute.xlu1 %3752 }
0x130c   : > { %6473 = vtanh.f32 %v7795_v38  ;;  %v7804_v42 = vadd.f32 %v3753_v36, %v3722_v41 }
0x130d   : > { %v3554_v16 = vpop.permute.xlu0 %3553 }
0x130e   : > { %v7802_v44 = vadd.f32 %v3554_v16, %v3522_v28 }
0x130f   : > { %v3755_v40 = vpop.permute.xlu1 %3754 }
0x1310   : > { %6475 = vtanh.f32 %v7802_v44  ;;  %v7810_v7 = vadd.f32 %v3755_v40, %v3723_v61 }
0x1311   : > { %6477 = vtanh.f32 %v7804_v42 }
0x1312   : > { %6479 = vtanh.f32 %v7810_v7 }
0x1316   : > { %v6474_v11 = vpop.eup %6473 }
0x1317   : > { %3575 = vrot.lane.b32.xlu0 %v6474_v11, %s6606_s20 }
0x131a   : > { %v6476_v51 = vpop.eup %6475 }
0x131b   : > { %3577 = vrot.lane.b32.xlu0 %v6476_v51, %s6606_s20  ;;  %v6478_v20 = vpop.eup %6477 }
0x131c   : > { %3776 = vrot.lane.b32.xlu1 %v6478_v20, %s6606_s20  ;;  %v6480_v13 = vpop.eup %6479 }
0x1320   : > { %3778 = vrot.lane.b32.xlu1 %v6480_v13, %s6606_s20 }
0x134b   : > { %v3775_v53 = vpop.permute.xlu1 %3774 }
0x134c   : > { %v3785_v27 = vmul.f32 %v7737_v9, %v3775_v53 }
0x134e   : > { %3810 = vrot.lane.b32.xlu1 %v3785_v27, %s6606_s20 }
0x134f   : > { %v3773_v10 = vpop.permute.xlu1 %3772 }
0x1350   : > { %v3784_v6 = vmul.f32 %v7741_v4, %v3773_v10 }
0x1352   : > { %4019 = vrot.lane.b32.xlu1 %v3785_v27, %s6607_s22  ;;  %4017 = vrot.lane.b32.xlu0 %v3784_v6, %s6607_s22 }
0x1356   : > { %3808 = vrot.lane.b32.xlu1 %v3784_v6, %s6606_s20 }
0x1357   : > { %v3574_v55 = vpop.permute.xlu0 %3573 }
0x1358   : > { %v3584_v52 = vmul.f32 %v7745_v26, %v3574_v55 }
0x135a   : > { %3794 = vrot.lane.b32.xlu0 %v3584_v52, %s6607_s22 }
0x135b   : > { %v3572_v30 = vpop.permute.xlu0 %3571 }
0x135c   : > { %v3583_v60 = vmul.f32 %v7749_v43, %v3572_v30 }
0x135e   : > { %3792 = vrot.lane.b32.xlu0 %v3583_v60, %s6607_s22 }
0x1389   : > { %v3576_v9 = vpop.permute.xlu0 %3575 }
0x138a   : > { %v3585_v17 = vmul.f32 %v7753_v25, %v3576_v9 }
0x138d   : > { %v3578_v57 = vpop.permute.xlu0 %3577 }
0x138e   : > { %v3586_v4 = vmul.f32 %v7757_v21, %v3578_v57  ;;  %v3777_v58 = vpop.permute.xlu1 %3776 }
0x138f   : > { %v3786_v26 = vmul.f32 %v7760_v59, %v3777_v58 }
0x1390   : > { %3798 = vrot.lane.b32.xlu0 %v3586_v4, %s6607_s22 }
0x1392   : > { %v3779_v18 = vpop.permute.xlu1 %3778 }
0x1393   : > { %v3787_v15 = vmul.f32 %v7765_v50, %v3779_v18 }
0x1394   : > { %3796 = vrot.lane.b32.xlu0 %v3585_v17, %s6607_s22 }
0x1395   : > { %3814 = vrot.lane.b32.xlu1 %v3787_v15, %s6606_s20 }
0x1398   : > { %4021 = vrot.lane.b32.xlu0 %v3786_v26, %s6607_s22 }
0x1399   : > { %3812 = vrot.lane.b32.xlu1 %v3786_v26, %s6606_s20 }
0x139d   : > { %4023 = vrot.lane.b32.xlu1 %v3787_v15, %s6607_s22 }
0x13c0   : > { %v3811_v43 = vpop.permute.xlu1 %3810 }
0x13c4   : > { %v4020_v21 = vpop.permute.xlu1 %4019  ;;  %v4018_v22 = vpop.permute.xlu0 %4017 }
0x13c5   : > { %5690 = vmatprep.mubr.msk.f32.mxu0 %vm1034_vm1, %v4018_v22 }
0x13c6   : > { %5691 = vmatmul.mubr.msk.f32.vlgmr.msra.gmra.mrb[28].mxu0 %vm1034_vm1, %v4020_v21 }
0x13c8   : > { %v3809_v3 = vpop.permute.xlu1 %3808 }
0x13cc   : > { %v3795_v25 = vpop.permute.xlu0 %3794 }
0x13cd   : > { %v3821_v31 = vsel %vm1034_vm1, %v3795_v25, %v3811_v43 }
0x13d0   : > { %v3793_v56 = vpop.permute.xlu0 %3792 }
0x13d1   : > { %v3820_v59 = vsel %vm1034_vm1, %v3793_v56, %v3809_v3 }
0x13d2   : > { %5676 = vmatprep.mubr.msk.f32.mxu1 %vm1243_vm2, %v3820_v59 }
0x13d3   : > { %5677 = vmatmul.mubr.msk.f32.vlgmr.msra.gmra.mrb[24].mxu1 %vm1243_vm2, %v3821_v31 }
0x13d4   : > { %5939 = vmatpush3.bf16.msra.mxu1 %v6938_v2 }
0x13d5   : > { %5941 = vmatprep.subr.bf16.mxu1 %v6943_v5 }
0x13d8   : > { %5943 = vmatpush3.bf16.msra.mxu1 %v6943_v5 }
0x13d9   : > { %5945 = vmatprep.subr.bf16.mxu1 %v6955_v8 }
0x13dc   : > { %5947 = vmatpush3.bf16.msra.mxu1 %v6955_v8 }
0x13dd   : > { %5949 = vmatprep.subr.bf16.mxu1 %v6966_v12 }
0x13e0   : > { %5951 = vmatpush3.bf16.msra.mxu1 %v6966_v12 }
0x1402   : > { %v3799_v50 = vpop.permute.xlu0 %3798 }
0x1406   : > { %v3797_v48 = vpop.permute.xlu0 %3796 }
0x1407   : > { %v3815_v19 = vpop.permute.xlu1 %3814 }
0x1408   : > { %v3823_v47 = vsel %vm1034_vm1, %v3799_v50, %v3815_v19 }
0x140a   : > { %v4022_v29 = vpop.permute.xlu0 %4021 }
0x140b   : > { %5693 = vmatprep.mubr.msk.f32.mxu0 %vm1034_vm1, %v4022_v29  ;;  %v3813_v23 = vpop.permute.xlu1 %3812 }
0x140c   : > { %v3822_v2 = vsel %vm1034_vm1, %v3797_v48, %v3813_v23 }
0x140d   : > { %5679 = vmatprep.mubr.msk.f32.mxu1 %vm1243_vm2, %v3822_v2 }
0x140e   : > { %5680 = vmatmul.mubr.msk.f32.gmra.mrb[26].mxu1 %vm1243_vm2, %v3823_v47 }
0x140f   : > { %v4024_v5 = vpop.permute.xlu1 %4023 }
0x1410   : > { %5694 = vmatmul.mubr.msk.f32.gmra.mrb[30].mxu0 %vm1034_vm1, %v4024_v5 }
0x1499   : > { %v5692_v8 = vpop.f32.mrb[28].mxu0 }
0x149a   : > { %v5998_v12 = vadd.f32 %v7719_v39, %v5692_v8  ;;  %v4099_v0 = vpop.f32.mrb[29].mxu0 }
0x149b   : > { %v5999_v54 = vadd.f32 %v7719_v39, %v4099_v0 }
0x149c   : > { %6481 = vtanh.f32 %v5998_v12  ;;  %v5129_v13 = vmul.f32 -1.442695, %v5998_v12 }
0x149d   : > { %6483 = vtanh.f32 %v5999_v54  ;;  %v5128_v10 = vmul.f32 -1.442695, %v5999_v54 }
0x14a6   : > { %v6482_v37 = vpop.eup %6481  ;;  %v5678_v14 = vpop.f32.mrb[24].mxu1 }
0x14a7   : > { %v3908_v62 = vadd.f32 %v7861_v63, %v5678_v14  ;;  %4160 = vrot.lane.b32.xlu1 %v6482_v37, %s6606_s20  ;;  %v3902_v32 = vpop.f32.mrb[25].mxu1  ;;  %v6484_v34 = vpop.eup %6483 }
0x14a8   : > { %v3903_v33 = vadd.f32 %v7861_v63, %v3902_v32 }
0x14a9   : > { %6485 = vtanh.f32 %v3908_v62 }
0x14aa   : > { %6487 = vtanh.f32 %v3903_v33  ;;  %v5120_v30 = vmul.f32 -1.442695, %v3903_v33 }
0x14ab   : > { %4158 = vrot.lane.b32.xlu1 %v6484_v34, %s6606_s20 }
0x14b3   : > { %v6486_v1 = vpop.eup %6485 }
0x14b4   : > { %3959 = vrot.lane.b32.xlu0 %v6486_v1, %s6606_s20  ;;  %v6488_v49 = vpop.eup %6487 }
0x14b8   : > { %3957 = vrot.lane.b32.xlu0 %v6488_v49, %s6606_s20 }
0x14e1   : > { %v5681_v28 = vpop.f32.mrb[26].mxu1 }
0x14e2   : > { %v3912_v16 = vpop.f32.mrb[27].mxu1  ;;  %v3918_v40 = vadd.f32 %v7861_v63, %v5681_v28 }
0x14e3   : > { %v3913_v41 = vadd.f32 %v7861_v63, %v3912_v16  ;;  %v5695_v36 = vpop.f32.mrb[30].mxu0 }
0x14e4   : > { %v4109_v61 = vpop.f32.mrb[31].mxu0  ;;  %v6000_v51 = vadd.f32 %v7719_v39, %v5695_v36  ;;  %v5123_v19 = vmul.f32 -1.442695, %v3918_v40 }
0x14e5   : > { %6489 = vtanh.f32 %v3913_v41  ;;  %v6001_v11 = vadd.f32 %v7719_v39, %v4109_v61  ;;  %v5121_v39 = vmul.f32 -1.442695, %v3908_v62  ;;  %v5122_v48 = vmul.f32 -1.442695, %v3913_v41 }
0x14e6   : > { %6491 = vtanh.f32 %v3918_v40  ;;  %v5131_v23 = vmul.f32 -1.442695, %v6000_v51 }
0x14e7   : > { %6493 = vtanh.f32 %v6001_v11  ;;  %v5130_v29 = vmul.f32 -1.442695, %v6001_v11 }
0x14e8   : > { %6495 = vtanh.f32 %v6000_v51 }
0x14e9   : > { %6497 = vpow2.f32 %v5129_v13 }
0x14ea   : > { %6499 = vpow2.f32 %v5128_v10 }
0x14eb   : > { %6501 = vpow2.f32 %v5121_v39 }
0x14ef   : > { %v6490_v20 = vpop.eup %6489 }
0x14f0   : > { %3961 = vrot.lane.b32.xlu0 %v6490_v20, %s6606_s20  ;;  %v6492_v53 = vpop.eup %6491 }
0x14f1   : > { %v6494_v27 = vpop.eup %6493 }
0x14f2   : > { %4162 = vrot.lane.b32.xlu1 %v6494_v27, %s6606_s20  ;;  %v6496_v6 = vpop.eup %6495 }
0x14f3   : > { %v6498_v55 = vpop.eup %6497 }
0x14f4   : > { %3963 = vrot.lane.b32.xlu0 %v6492_v53, %s6606_s20  ;;  %v4135_v52 = vadd.f32 1.0, %v6498_v55  ;;  %v6500_v60 = vpop.eup %6499 }
0x14f5   : > { %v4134_v9 = vadd.f32 1.0, %v6500_v60  ;;  %v6502_v57 = vpop.eup %6501 }
0x14f6   : > { %4164 = vrot.lane.b32.xlu1 %v6496_v6, %s6606_s20  ;;  %6503 = vrcp.f32 %v4135_v52  ;;  %v3934_v58 = vadd.f32 1.0, %v6502_v57 }
0x14f7   : > { %6505 = vpow2.f32 %v5120_v30 }
0x14f8   : > { %6507 = vrcp.f32 %v4134_v9 }
0x14f9   : > { %6509 = vrcp.f32 %v3934_v58 }
0x1500   : > { %v7877_v4 = vpop.eup %6503 }
0x1501   : > { %v6506_v17 = vpop.eup %6505  ;;  %v4151_v40 = vmul.f32 %v7877_v4, %v7771_v24 }
0x1502   : > { %v3933_v26 = vadd.f32 1.0, %v6506_v17  ;;  %v7881_v43 = vpop.eup %6507 }
0x1503   : > { %v7885_v25 = vpop.eup %6509  ;;  %v4150_v20 = vmul.f32 %v7881_v43, %v7776_v46 }
0x1504   : > { %6511 = vrcp.f32 %v3933_v26  ;;  %v3950_v27 = vmul.f32 %v7885_v25, %v7781_v45 }
0x1505   : > { %6513 = vpow2.f32 %v5122_v48 }
0x1506   : > { %6515 = vpow2.f32 %v5123_v19 }
0x1507   : > { %6517 = vpow2.f32 %v5130_v29 }
0x1508   : > { %6519 = vpow2.f32 %v5131_v23 }
0x150e   : > { %v7889_v59 = vpop.eup %6511 }
0x150f   : > { %v6514_v2 = vpop.eup %6513  ;;  %v3949_v24 = vmul.f32 %v7889_v59, %v7787_v35 }
0x1510   : > { %v3935_v47 = vadd.f32 1.0, %v6514_v2  ;;  %v6516_v5 = vpop.eup %6515 }
0x1511   : > { %v6518_v8 = vpop.eup %6517  ;;  %v3936_v12 = vadd.f32 1.0, %v6516_v5 }
0x1512   : > { %6521 = vrcp.f32 %v3935_v47  ;;  %v4136_v0 = vadd.f32 1.0, %v6518_v8  ;;  %v6520_v54 = vpop.eup %6519 }
0x1513   : > { %6523 = vrcp.f32 %v3936_v12  ;;  %v4137_v37 = vadd.f32 1.0, %v6520_v54 }
0x1514   : > { %6525 = vrcp.f32 %v4136_v0 }
0x1515   : > { %6527 = vrcp.f32 %v4137_v37 }
0x1519   : > { %v4161_v18 = vpop.permute.xlu1 %4160 }
0x151a   : > { %v4171_v15 = vmul.f32 %v7877_v4, %v4161_v18 }
0x151c   : > { %4180 = vrot.lane.b32.xlu1 %v4171_v15, %s6607_s22  ;;  %v7893_v14 = vpop.eup %6521 }
0x151d   : > { %v4159_v21 = vpop.permute.xlu1 %4158  ;;  %v7897_v33 = vpop.eup %6523  ;;  %v3951_v60 = vmul.f32 %v7893_v14, %v7795_v38 }
0x151e   : > { %v4170_v22 = vmul.f32 %v7881_v43, %v4159_v21  ;;  %v7900_v49 = vpop.eup %6525  ;;  %v3952_v35 = vmul.f32 %v7897_v33, %v7802_v44 }
0x151f   : > { %v7905_v41 = vpop.eup %6527  ;;  %v4152_v17 = vmul.f32 %v7900_v49, %v7804_v42 }
0x1520   : > { %4178 = vrot.lane.b32.xlu1 %v4170_v22, %s6607_s22  ;;  %v4153_v38 = vmul.f32 %v7905_v41, %v7810_v7 }
0x1526   : > { %v3960_v3 = vpop.permute.xlu0 %3959 }
0x1527   : > { %v3970_v56 = vmul.f32 %v7885_v25, %v3960_v3 }
0x1529   : > { %3979 = vrot.lane.b32.xlu0 %v3970_v56, %s6607_s22 }
0x152a   : > { %v3958_v31 = vpop.permute.xlu0 %3957 }
0x152b   : > { %v3969_v50 = vmul.f32 %v7889_v59, %v3958_v31 }
0x152d   : > { %3977 = vrot.lane.b32.xlu0 %v3969_v50, %s6607_s22 }
0x1562   : > { %v3962_v62 = vpop.permute.xlu0 %3961 }
0x1563   : > { %v3971_v32 = vmul.f32 %v7893_v14, %v3962_v62 }
0x1564   : > { %v4163_v28 = vpop.permute.xlu1 %4162 }
0x1565   : > { %3981 = vrot.lane.b32.xlu0 %v3971_v32, %s6607_s22  ;;  %v4172_v16 = vmul.f32 %v7900_v49, %v4163_v28 }
0x1566   : > { %v3964_v34 = vpop.permute.xlu0 %3963 }
0x1567   : > { %v3972_v1 = vmul.f32 %v7897_v33, %v3964_v34  ;;  %4182 = vrot.lane.b32.xlu1 %v4172_v16, %s6607_s22 }
0x1568   : > { %v4165_v36 = vpop.permute.xlu1 %4164 }
0x1569   : > { %3983 = vrot.lane.b32.xlu0 %v3972_v1, %s6607_s22  ;;  %v4173_v61 = vmul.f32 %v7905_v41, %v4165_v36  ;;  %v4447_v36 = vld [vmem:[%s645_s25] sm:$0xff] }
0x156a   : > { %5720 = vmatprep.mubr.msk.f32.mxu0 %vm697_vm0, %v4447_v36 }
0x156b   : > { %4184 = vrot.lane.b32.xlu1 %v4173_v61, %s6607_s22  ;;  %v4448_v61 = vld [vmem:[%s645_s25 + $0x8] sm:$0xff] }
0x158e   : > { %v4181_v11 = vpop.permute.xlu1 %4180 }
0x158f   : > { %v4191_v51 = vadd.f32 %v4181_v11, %v4151_v40  ;;  %v4449_v40 = vld [vmem:[%s645_s25 + $0x10] sm:$0xff]  ;;  %v4450_v11 = vld [vmem:[%s645_s25 + $0x18] sm:$0xff] }
0x1591   : > { %6529 = vtanh.f32 %v4191_v51 }
0x1592   : > { %v4179_v13 = vpop.permute.xlu1 %4178 }
0x1593   : > { %v4190_v53 = vadd.f32 %v4179_v13, %v4150_v20 }
0x1595   : > { %6531 = vtanh.f32 %v4190_v53 }
0x159b   : > { %v6530_v10 = vpop.eup %6529  ;;  %v3980_v6 = vpop.permute.xlu0 %3979 }
0x159c   : > { %v7915_v55 = vadd.f32 %v3980_v6, %v3950_v27  ;;  %4204 = vrot.lane.b32.xlu1 %v6530_v10, %s6606_s20 }
0x159e   : > { %6533 = vtanh.f32 %v7915_v55 }
0x159f   : > { %v6532_v39 = vpop.eup %6531  ;;  %v3978_v52 = vpop.permute.xlu0 %3977 }
0x15a0   : > { %v7921_v46 = vadd.f32 %v3978_v52, %v3949_v24  ;;  %4202 = vrot.lane.b32.xlu1 %v6532_v39, %s6606_s20 }
0x15a2   : > { %6535 = vtanh.f32 %v7921_v46 }
0x15a8   : > { %v6534_v45 = vpop.eup %6533 }
0x15a9   : > { %4003 = vrot.lane.b32.xlu0 %v6534_v45, %s6606_s20 }
0x15ac   : > { %v6536_v30 = vpop.eup %6535 }
0x15ad   : > { %4001 = vrot.lane.b32.xlu0 %v6536_v30, %s6606_s20 }
0x15d7   : > { %v3982_v9 = vpop.permute.xlu0 %3981 }
0x15d8   : > { %v7929_v57 = vadd.f32 %v3982_v9, %v3951_v60 }
0x15d9   : > { %v4183_v15 = vpop.permute.xlu1 %4182 }
0x15da   : > { %6537 = vtanh.f32 %v7929_v57  ;;  %v4192_v26 = vadd.f32 %v4183_v15, %v4152_v17 }
0x15db   : > { %v3984_v58 = vpop.permute.xlu0 %3983 }
0x15dc   : > { %v7936_v18 = vadd.f32 %v3984_v58, %v3952_v35 }
0x15dd   : > { %v4185_v21 = vpop.permute.xlu1 %4184 }
0x15de   : > { %6539 = vtanh.f32 %v7936_v18  ;;  %v4193_v22 = vadd.f32 %v4185_v21, %v4153_v38 }
0x15df   : > { %6541 = vtanh.f32 %v4192_v26 }
0x15e0   : > { %6543 = vtanh.f32 %v4193_v22 }
0x15e4   : > { %v6538_v3 = vpop.eup %6537 }
0x15e5   : > { %4005 = vrot.lane.b32.xlu0 %v6538_v3, %s6606_s20 }
0x15e8   : > { %v6540_v44 = vpop.eup %6539 }
0x15e9   : > { %4007 = vrot.lane.b32.xlu0 %v6540_v44, %s6606_s20  ;;  %v6542_v42 = vpop.eup %6541  ;;  %v4560_v44 = vld [vmem:[%s8096_s9] sm:$0xff] }
0x15ea   : > { %4206 = vrot.lane.b32.xlu1 %v6542_v42, %s6606_s20  ;;  %v6544_v56 = vpop.eup %6543  ;;  %v4561_v42 = vld [vmem:[%s8096_s9 + $0x8] sm:$0xff] }
0x15ee   : > { %4208 = vrot.lane.b32.xlu1 %v6544_v56, %s6606_s20  ;;  %v5952_v56 = vpack.c.bf16 %v4561_v42, %v4560_v44 }
0x160e   : > { %v4205_v31 = vpop.permute.xlu1 %4204 }
0x160f   : > { %v4215_v50 = vmul.f32 %v7877_v4, %v4205_v31  ;;  %v5140_v31 = vld [vmem:[%s8095_s8] ss:$0 sm:$0xff] }
0x1611   : > { %4240 = vrot.lane.b32.xlu1 %v4215_v50, %s6606_s20 }
0x1612   : > { %v4203_v7 = vpop.permute.xlu1 %4202 }
0x1613   : > { %v4214_v48 = vmul.f32 %v7881_v43, %v4203_v7 }
0x1615   : > { %4238 = vrot.lane.b32.xlu1 %v4214_v48, %s6606_s20 }
0x161b   : > { %v4004_v19 = vpop.permute.xlu0 %4003 }
0x161c   : > { %v4014_v29 = vmul.f32 %v7885_v25, %v4004_v19 }
0x161e   : > { %4224 = vrot.lane.b32.xlu0 %v4014_v29, %s6607_s22 }
0x161f   : > { %v4002_v23 = vpop.permute.xlu0 %4001 }
0x1620   : > { %v4013_v2 = vmul.f32 %v7889_v59, %v4002_v23 }
0x1622   : > { %4222 = vrot.lane.b32.xlu0 %v4013_v2, %s6607_s22 }
0x1657   : > { %v4006_v47 = vpop.permute.xlu0 %4005 }
0x1658   : > { %v4015_v4 = vmul.f32 %v7893_v14, %v4006_v47 }
0x165a   : > { %4226 = vrot.lane.b32.xlu0 %v4015_v4, %s6607_s22 }
0x165b   : > { %v4008_v5 = vpop.permute.xlu0 %4007 }
0x165c   : > { %v4016_v43 = vmul.f32 %v7897_v33, %v4008_v5  ;;  %v4207_v8 = vpop.permute.xlu1 %4206 }
0x165d   : > { %v4216_v12 = vmul.f32 %v7900_v49, %v4207_v8 }
0x165e   : > { %4228 = vrot.lane.b32.xlu0 %v4016_v43, %s6607_s22 }
0x165f   : > { %4242 = vrot.lane.b32.xlu1 %v4216_v12, %s6606_s20 }
0x1660   : > { %v4209_v25 = vpop.permute.xlu1 %4208 }
0x1661   : > { %v4217_v59 = vmul.f32 %v7905_v41, %v4209_v25  ;;  %v4451_v41 = vld [vmem:[%s8094_s7] sm:$0xff] }
0x1662   : > { %5718 = vmatprep.subr.mxu0 %v4451_v41  ;;  %5968 = vmatprep.subr.mxu1 %v4451_v41 }
0x1663   : > { %4244 = vrot.lane.b32.xlu1 %v4217_v59, %s6606_s20  ;;  %5719 = vmatpush3.msra.mxu0 %v4451_v41 }
0x1664   : > { %5721 = vmatmul.mubr.msk.f32.vlgmr.msra.gmra.mrb[32].mxu0 %vm697_vm0, %v4448_v61 }
0x1683   : > { %v4241_v0 = vpop.permute.xlu1 %4240 }
0x1687   : > { %v4239_v37 = vpop.permute.xlu1 %4238 }
0x1690   : > { %v4225_v54 = vpop.permute.xlu0 %4224 }
0x1691   : > { %v4251_v32 = vsel %vm1034_vm1, %v4225_v54, %v4241_v0 }
0x1694   : > { %v4223_v14 = vpop.permute.xlu0 %4222 }
0x1695   : > { %v4250_v62 = vsel %vm1034_vm1, %v4223_v14, %v4239_v37 }
0x1696   : > { %5712 = vmatprep.mubr.msk.f32.mxu1 %vm1243_vm2, %v4250_v62 }
0x1697   : > { %5713 = vmatmul.mubr.msk.f32.vlgmr.msra.gmra.mrb[28].mxu1 %vm1243_vm2, %v4251_v32 }
0x1698   : > { %5969 = vmatpush3.msra.mxu1 %v4451_v41 }
0x1699   : > { %5953 = vmatprep.subr.bf16.mxu1 %v5952_v56 }
0x16cc   : > { %v4227_v33 = vpop.permute.xlu0 %4226 }
0x16d0   : > { %v4229_v49 = vpop.permute.xlu0 %4228 }
0x16d1   : > { %v4243_v34 = vpop.permute.xlu1 %4242 }
0x16d2   : > { %v4252_v1 = vsel %vm1034_vm1, %v4227_v33, %v4243_v34 }
0x16d3   : > { %5715 = vmatprep.mubr.msk.f32.mxu1 %vm1243_vm2, %v4252_v1 }
0x16d5   : > { %v4245_v28 = vpop.permute.xlu1 %4244 }
0x16d6   : > { %v4253_v16 = vsel %vm1034_vm1, %v4229_v49, %v4245_v28 }
0x16d7   : > { %5716 = vmatmul.mubr.msk.f32.gmra.mrb[30].mxu1 %vm1243_vm2, %v4253_v16 }
0x16d8   : > { %5723 = vmatprep.mubr.msk.f32.mxu1 %vm697_vm0, %v4449_v40 }
0x16db   : > { %5724 = vmatmul.mubr.msk.f32.vlgmr.msra.gmra.mrb[32].mxu1 %vm697_vm0, %v4450_v11 }
0x16dc   : > { %5955 = vmatpush3.bf16.msra.mxu1 %v5952_v56 }
0x1737   : > { %v5722_v50 = vpop.f32.mrb[32].mxu0 }
0x1738   : > { %v4543_v7 = vadd.f32 %v5722_v50, %v5140_v31  ;;  %v4537_v48 = vpop.f32.mrb[33].mxu0 }
0x1739   : > { %v4538_v19 = vadd.f32 %v5140_v31, %v4537_v48 }
0x173a   : > { %v4557_v29 = vmax.f32 %v4543_v7, 0.0 }
0x173b   : > { %v4556_v23 = vmax.f32 %v4538_v19, 0.0 }
0x173d   : > { %5730 = vmatprep.mubr.msk.f32.mxu1 %vm4569_vm3, %v4556_v23 }
0x173e   : > { %5731 = vmatmul.mubr.msk.f32.vlgmr.msra.gmra.mrb[34].mxu1 %vm4569_vm3, %v4557_v29 }
0x176a   : > { %v5714_v51 = vpop.f32.mrb[28].mxu1 }
0x176b   : > { %v4338_v20 = vadd.f32 %v7861_v63, %v5714_v51  ;;  %v4332_v13 = vpop.f32.mrb[29].mxu1 }
0x176c   : > { %v4333_v53 = vadd.f32 %v7861_v63, %v4332_v13 }
0x176d   : > { %6545 = vtanh.f32 %v4338_v20  ;;  %v5137_v60 = vmul.f32 -1.442695, %v4338_v20 }
0x176e   : > { %6547 = vtanh.f32 %v4333_v53  ;;  %v5136_v9 = vmul.f32 -1.442695, %v4333_v53 }
0x1777   : > { %v6546_v27 = vpop.eup %6545 }
0x1778   : > { %v6548_v10 = vpop.eup %6547  ;;  %4389 = vrot.lane.b32.xlu1 %v6546_v27, %s6606_s20  ;;  %v4675_v27 = vld [vmem:[%s8099_s12] sm:$0xff] }
0x1779   : > { %4387 = vrot.lane.b32.xlu0 %v6548_v10, %s6606_s20  ;;  %v4676_v10 = vld [vmem:[%s8099_s12 + $0x8] sm:$0xff] }
0x17aa   : > { %v5717_v6 = vpop.f32.mrb[30].mxu1 }
0x17ab   : > { %v4348_v24 = vadd.f32 %v7861_v63, %v5717_v6  ;;  %v4342_v39 = vpop.f32.mrb[31].mxu1  ;;  %v5956_v6 = vpack.c.bf16 %v4676_v10, %v4675_v27 }
0x17ac   : > { %v4343_v52 = vadd.f32 %v7861_v63, %v4342_v39 }
0x17ad   : > { %6549 = vtanh.f32 %v4348_v24  ;;  %v5139_v8 = vmul.f32 -1.442695, %v4348_v24  ;;  %5957 = vmatprep.subr.bf16.mxu0 %v5956_v6 }
0x17ae   : > { %6551 = vtanh.f32 %v4343_v52  ;;  %v5725_v2 = vpop.f32.mrb[32].mxu1  ;;  %v5138_v25 = vmul.f32 -1.442695, %v4343_v52  ;;  %5959 = vmatpush3.bf16.msra.mxu0 %v5956_v6 }
0x17af   : > { %6553 = vpow2.f32 %v5137_v60  ;;  %v4553_v47 = vadd.f32 %v5725_v2, %v5140_v31  ;;  %v4547_v4 = vpop.f32.mrb[33].mxu1 }
0x17b0   : > { %6555 = vpow2.f32 %v5136_v9  ;;  %v4548_v5 = vadd.f32 %v5140_v31, %v4547_v4 }
0x17b1   : > { %v4559_v43 = vmax.f32 %v4553_v47, 0.0 }
0x17b2   : > { %v4558_v12 = vmax.f32 %v4548_v5, 0.0 }
0x17b4   : > { %5733 = vmatprep.mubr.msk.f32.mxu1 %vm4569_vm3, %v4558_v12 }
0x17b5   : > { %5734 = vmatmul.mubr.msk.f32.gmra.mrb[36].mxu1 %vm4569_vm3, %v4559_v43  ;;  %v5158_v43 = vld [vmem:[#allocation2] ss:$0 sm:$0xff] }
0x17b7   : > { %v6550_v45 = vpop.eup %6549 }
0x17b8   : > { %v6552_v30 = vpop.eup %6551  ;;  %4393 = vrot.lane.b32.xlu1 %v6550_v45, %s6606_s20 }
0x17b9   : > { %4391 = vrot.lane.b32.xlu0 %v6552_v30, %s6606_s20  ;;  %v6554_v35 = vpop.eup %6553 }
0x17ba   : > { %v6556_v58 = vpop.eup %6555  ;;  %v4364_v17 = vadd.f32 1.0, %v6554_v35  ;;  %v5145_v35 = vld [vmem:[%s8097_s10] ss:$0 sm:$0xff] }
0x17bb   : > { %v4363_v15 = vadd.f32 1.0, %v6556_v58 }
0x17bc   : > { %6557 = vrcp.f32 %v4364_v17 }
0x17bd   : > { %6559 = vrcp.f32 %v4363_v15 }
0x17be   : > { %6561 = vpow2.f32 %v5139_v8 }
0x17bf   : > { %6563 = vpow2.f32 %v5138_v25 }
0x17c6   : > { %v7994_v26 = vpop.eup %6557 }
0x17c7   : > { %v7996_v38 = vpop.eup %6559  ;;  %v4380_v49 = vmul.f32 %v7994_v26, %v7915_v55 }
0x17c8   : > { %v6562_v59 = vpop.eup %6561  ;;  %v4379_v16 = vmul.f32 %v7996_v38, %v7921_v46 }
0x17c9   : > { %v6564_v0 = vpop.eup %6563  ;;  %v4366_v54 = vadd.f32 1.0, %v6562_v59 }
0x17ca   : > { %v4365_v37 = vadd.f32 1.0, %v6564_v0 }
0x17cb   : > { %6565 = vrcp.f32 %v4366_v54 }
0x17cc   : > { %6567 = vrcp.f32 %v4365_v37 }
0x17d5   : > { %v8015_v14 = vpop.eup %6565 }
0x17d6   : > { %v8017_v32 = vpop.eup %6567  ;;  %v4382_v51 = vmul.f32 %v8015_v14, %v7936_v18  ;;  %v4671_v18 = vld [vmem:[%s8098_s11] sm:$0xff] }
0x17d7   : > { %v4381_v55 = vmul.f32 %v8017_v32, %v7929_v57  ;;  %v4672_v57 = vld [vmem:[%s8098_s11 + $0x8] sm:$0xff] }
0x17d8   : > { %v5960_v24 = vpack.c.bf16 %v4672_v57, %v4671_v18 }
0x17da   : > { %5961 = vmatprep.subr.bf16.mxu0 %v5960_v24 }
0x17ea   : > { %v4390_v63 = vpop.permute.xlu1 %4389 }
0x17eb   : > { %v4400_v21 = vmul.f32 %v7994_v26, %v4390_v63  ;;  %v4388_v22 = vpop.permute.xlu0 %4387 }
0x17ec   : > { %v4399_v3 = vmul.f32 %v7996_v38, %v4388_v22 }
0x17ed   : > { %4409 = vrot.lane.b32.xlu1 %v4400_v21, %s6607_s22  ;;  %v4673_v21 = vld [vmem:[%s8098_s11 + $0x10] sm:$0xff] }
0x17ee   : > { %4407 = vrot.lane.b32.xlu0 %v4399_v3, %s6607_s22 }
0x1811   : > { %v5732_v58 = vpop.f32.mrb[34].mxu1 }
0x1812   : > { %v4654_v17 = vadd.f32 %v5732_v58, %v5145_v35  ;;  %v4648_v15 = vpop.f32.mrb[35].mxu1 }
0x1813   : > { %v4649_v63 = vadd.f32 %v5145_v35, %v4648_v15 }
0x1815   : > { %v4667_v22 = vmax.f32 %v4649_v63, 0.0 }
0x1817   : > { %5740 = vmatprep.mubr.msk.f32.mxu0 %vm4569_vm3, %v4667_v22 }
0x182a   : > { %v4394_v62 = vpop.permute.xlu1 %4393 }
0x182b   : > { %v4402_v33 = vmul.f32 %v8015_v14, %v4394_v62  ;;  %v4392_v34 = vpop.permute.xlu0 %4391 }
0x182c   : > { %v4401_v1 = vmul.f32 %v8017_v32, %v4392_v34 }
0x182d   : > { %4413 = vrot.lane.b32.xlu1 %v4402_v33, %s6607_s22 }
0x182e   : > { %4411 = vrot.lane.b32.xlu0 %v4401_v1, %s6607_s22 }
0x185f   : > { %v4410_v28 = vpop.permute.xlu1 %4409 }
0x1860   : > { %v4420_v41 = vadd.f32 %v4410_v28, %v4380_v49  ;;  %v4408_v36 = vpop.permute.xlu0 %4407 }
0x1861   : > { %v4419_v61 = vadd.f32 %v4408_v36, %v4379_v16 }
0x1862   : > { %6569 = vtanh.f32 %v4420_v41 }
0x1863   : > { %6571 = vtanh.f32 %v4419_v61 }
0x186c   : > { %v6570_v40 = vpop.eup %6569 }
0x186d   : > { %v6572_v11 = vpop.eup %6571  ;;  %4433 = vrot.lane.b32.xlu1 %v6570_v40, %s6606_s20 }
0x186e   : > { %4431 = vrot.lane.b32.xlu0 %v6572_v11, %s6606_s20 }
0x1888   : > { %v5735_v3 = vpop.f32.mrb[36].mxu1 }
0x1889   : > { %v4664_v44 = vadd.f32 %v5735_v3, %v5145_v35  ;;  %v4658_v42 = vpop.f32.mrb[37].mxu1 }
0x188a   : > { %v4659_v31 = vadd.f32 %v5145_v35, %v4658_v42 }
0x188b   : > { %v4670_v50 = vmax.f32 %v4664_v44, 0.0 }
0x188c   : > { %v4669_v7 = vmax.f32 %v4659_v31, 0.0 }
0x189f   : > { %v4414_v20 = vpop.permute.xlu1 %4413 }
0x18a0   : > { %v4422_v13 = vadd.f32 %v4414_v20, %v4382_v51  ;;  %v4412_v46 = vpop.permute.xlu0 %4411 }
0x18a1   : > { %v4421_v53 = vadd.f32 %v4412_v46, %v4381_v55 }
0x18a2   : > { %6573 = vtanh.f32 %v4422_v13 }
0x18a3   : > { %6575 = vtanh.f32 %v4421_v53 }
0x18ac   : > { %v6574_v39 = vpop.eup %6573 }
0x18ad   : > { %v6576_v52 = vpop.eup %6575  ;;  %4437 = vrot.lane.b32.xlu1 %v6574_v39, %s6606_s20 }
0x18ae   : > { %4435 = vrot.lane.b32.xlu0 %v6576_v52, %s6606_s20 }
0x18df   : > { %v4434_v45 = vpop.permute.xlu1 %4433 }
0x18e0   : > { %v4444_v30 = vmul.f32 %v7994_v26, %v4434_v45  ;;  %v4432_v60 = vpop.permute.xlu0 %4431  ;;  %v4674_v26 = vld [vmem:[%s8098_s11 + $0x18] sm:$0xff] }
0x18e1   : > { %v4443_v9 = vmul.f32 %v7996_v38, %v4432_v60  ;;  %v4668_v38 = vmax.f32 %v4654_v17, 0.0  ;;  %v5964_v56 = vpack.c.bf16 %v4674_v26, %v4673_v21 }
0x18e2   : > { %4780 = vrot.lane.b32.xlu1 %v4444_v30, %s6607_s22 }
0x18e3   : > { %4778 = vrot.lane.b32.xlu0 %v4443_v9, %s6607_s22  ;;  %5741 = vmatmul.mubr.msk.f32.vlgmr.msra.gmra.mrb[34].mxu0 %vm4569_vm3, %v4668_v38 }
0x18e4   : > { %5963 = vmatpush3.bf16.msra.mxu0 %v5960_v24  ;;  %5743 = vmatprep.mubr.msk.f32.mxu0 %vm4569_vm3, %v4669_v7 }
0x18e5   : > { %5965 = vmatprep.subr.bf16.mxu0 %v5964_v56 }
0x18e7   : > { %5744 = vmatmul.mubr.msk.f32.gmra.mrb[36].mxu0 %vm4569_vm3, %v4670_v50 }
0x18e8   : > { %5967 = vmatpush3.bf16.msra.mxu0 %v5964_v56 }
0x191f   : > { %v4438_v48 = vpop.permute.xlu1 %4437 }
0x1920   : > { %v4446_v19 = vmul.f32 %v8015_v14, %v4438_v48  ;;  %v4436_v29 = vpop.permute.xlu0 %4435 }
0x1921   : > { %v4445_v23 = vmul.f32 %v8017_v32, %v4436_v29 }
0x1922   : > { %4784 = vrot.lane.b32.xlu1 %v4446_v19, %s6607_s22 }
0x1923   : > { %4782 = vrot.lane.b32.xlu0 %v4445_v23, %s6607_s22 }
0x1954   : > { %v4781_v47 = vpop.permute.xlu1 %4780 }
0x1955   : > { %v4779_v2 = vpop.permute.xlu0 %4778 }
0x1956   : > { %5754 = vmatprep.mubr.msk.f32.mxu0 %vm1034_vm1, %v4779_v2 }
0x1957   : > { %5755 = vmatmul.mubr.msk.f32.vlgmr.msra.gmra.mrb[34].mxu0 %vm1034_vm1, %v4781_v47 }
0x1994   : > { %v4785_v5 = vpop.permute.xlu1 %4784 }
0x1995   : > { %v4783_v4 = vpop.permute.xlu0 %4782 }
0x1996   : > { %5757 = vmatprep.mubr.msk.f32.mxu0 %vm1034_vm1, %v4783_v4 }
0x1997   : > { %5758 = vmatmul.mubr.msk.f32.gmra.mrb[36].mxu0 %vm1034_vm1, %v4785_v5 }
0x1a2a   : > { %v5756_v8 = vpop.f32.mrb[34].mxu0 }
0x1a2b   : > { %v4887_v12 = vadd.f32 %v5756_v8, %v5158_v43  ;;  %v4860_v25 = vpop.f32.mrb[35].mxu0 }
0x1a2c   : > { %v4886_v59 = vadd.f32 %v5158_v43, %v4860_v25 }
0x1a2d   : > { %4892 = vst.msk [vmem:[%s651_s13 + $0x8] sm:$0xff] %vm4890_vm4, %v4887_v12 }
0x1a2e   : > { %4891 = vst.msk [vmem:[%s651_s13] sm:$0xff] %vm4890_vm4, %v4886_v59 }
0x1a6a   : > { %v5759_v0 = vpop.f32.mrb[36].mxu0 }
0x1a6b   : > { %v4889_v54 = vadd.f32 %v5759_v0, %v5158_v43  ;;  %v4870_v37 = vpop.f32.mrb[37].mxu0 }
0x1a6c   : > { %v4888_v14 = vadd.f32 %v5158_v43, %v4870_v37 }
0x1a6d   : > { %4894 = vst.msk [vmem:[%s651_s13 + $0x18] sm:$0xff] %vm4890_vm4, %v4889_v54 }
0x1a6e   : > { %4893 = vst.msk [vmem:[%s651_s13 + $0x10] sm:$0xff] %vm4890_vm4, %v4888_v14 }
0x1a6f PF: > { %p23_p9 = scmp.ge.s32.totalorder %s6703_s18, 6   ;;  %s8102_s15 = smov %s6599_s16 }
0x1a70   : > { %s8103_s16 = smov %s6712_s21  ;;  %s8104_s17 = smov %s6703_s18 }
0x1a71   :  { %25 = sbr.rel (!%p23_p9) target bundleno = 5 (0x5), region = 152 }

</bundles_post_ra>
